<compile_context>
chip_gen: v5e
topology: v5e:2x2
jax: 0.10.0
libtpu: 0.0.40
codegen_flags: <defaults>
</compile_context>

<pallas_src>
import jax
import jax.numpy as jnp
from jax.experimental import pallas as pl
from jax.experimental.pallas import tpu as pltpu

LANE = 128
VMEM_LIMIT = 32 * 1024 * 1024  # safe on v5e/v6e/v7x; >= v5e's 16 MiB default


def _round_up(x, m):
    return (x + m - 1) // m * m


# ---------------- Pallas kernels ----------------

def _bottleneck_kernel(x_ref, s1_ref, b1_ref, w1_ref, b2_ref, o_ref):
    # BN1 (folded affine) + ReLU in f32 on the VPU, 1x1x1 conv on the MXU in bf16
    # with f32 accumulation, folded-BN2 bias + ReLU, stored lane-dense bf16.
    y = jnp.maximum(x_ref[...] * s1_ref[...] + b1_ref[...], 0.0)
    h = jnp.dot(y.astype(jnp.bfloat16), w1_ref[...],
                preferred_element_type=jnp.float32)
    o_ref[...] = jnp.maximum(h + b2_ref[...], 0.0).astype(jnp.bfloat16)


def _make_conv3x3x3_kernel(wp, hwp_out):
    # 3x3x3 conv as 27 accumulated matmuls.  hp*_ref are three consecutive padded
    # depth slices, each flattened to (Hp*Wp, Cpad); for tap (kh, kw) the needed rows
    # are the contiguous slice starting at kh*Wp + kw.  Slicing is done on an f32
    # upcast (safe sublane shifts); matmul operands are cast back to bf16 (exact).
    def kernel(hp0_ref, hp1_ref, hp2_ref, w2_ref, o_ref):
        acc = jnp.zeros(o_ref.shape, jnp.float32)
        for kd, ref in enumerate((hp0_ref, hp1_ref, hp2_ref)):
            blk = ref[...].astype(jnp.float32)            # (Hp*Wp, Cpad)
            for kh in range(3):
                for kw in range(3):
                    off = kh * wp + kw
                    tap = (kd * 3 + kh) * 3 + kw
                    sl = blk[off:off + hwp_out, :].astype(jnp.bfloat16)
                    acc = acc + jnp.dot(sl, w2_ref[tap],
                                        preferred_element_type=jnp.float32)
        o_ref[...] = acc
    return kernel


# ---------------- Pallas wrappers ----------------

def bottleneck(x2d, s1, b1, w1f, b2f, *, tm=512):
    m, cin = x2d.shape
    cpad = w1f.shape[1]
    tm = min(tm, _round_up(m, 8))
    m_pad = _round_up(m, tm)
    if m_pad != m:
        x2d = jnp.pad(x2d, ((0, m_pad - m), (0, 0)))
    out = pl.pallas_call(
        _bottleneck_kernel,
        out_shape=jax.ShapeDtypeStruct((m_pad, cpad), jnp.bfloat16),
        grid_spec=pltpu.PrefetchScalarGridSpec(
            num_scalar_prefetch=0,
            grid=(m_pad // tm,),
            in_specs=[
                pl.BlockSpec((tm, cin), lambda i: (i, 0)),
                pl.BlockSpec((1, cin), lambda i: (0, 0)),
                pl.BlockSpec((1, cin), lambda i: (0, 0)),
                pl.BlockSpec((cin, cpad), lambda i: (0, 0)),
                pl.BlockSpec((1, cpad), lambda i: (0, 0)),
            ],
            out_specs=pl.BlockSpec((tm, cpad), lambda i: (i, 0)),
        ),
        compiler_params=pltpu.CompilerParams(
            dimension_semantics=("parallel",),
            vmem_limit_bytes=VMEM_LIMIT),
    )(x2d, s1, b1, w1f, b2f)
    return out[:m] if m_pad != m else out


def conv3x3x3(hp_flat, w2p, *, hwp_out, wp):
    # hp_flat: (N, Dp, Hp*Wp, Cpad) bf16 (zero-padded activation), w2p: (27, Cpad, Gpad)
    n, dp, hpwp, cpad = hp_flat.shape
    d = dp - 2
    gpad = w2p.shape[-1]
    kernel = _make_conv3x3x3_kernel(wp, hwp_out)

    def hp_spec(kd):
        return pl.BlockSpec((None, None, hpwp, cpad),
                            lambda ni, di, kd=kd: (ni, di + kd, 0, 0))

    return pl.pallas_call(
        kernel,
        out_shape=jax.ShapeDtypeStruct((n, d, hwp_out, gpad), jnp.float32),
        grid_spec=pltpu.PrefetchScalarGridSpec(
            num_scalar_prefetch=0,
            grid=(n, d),
            in_specs=[
                hp_spec(0), hp_spec(1), hp_spec(2),
                pl.BlockSpec((27, cpad, gpad), lambda ni, di: (0, 0, 0)),
            ],
            out_specs=pl.BlockSpec((None, None, hwp_out, gpad),
                                   lambda ni, di: (ni, di, 0, 0)),
        ),
        compiler_params=pltpu.CompilerParams(
            dimension_semantics=("parallel", "parallel"),
            vmem_limit_bytes=VMEM_LIMIT),
    )(hp_flat, hp_flat, hp_flat, w2p)


# ---------------- conv_block3d / dense_block3d forward ----------------

def prepare_layer_params(p):
    # Fold BN2 into w1, pad channel dims to lane multiples, cast matmul weights to bf16.
    s1, b1, w1, s2, b2, w2 = p
    cin, cmid = w1.shape
    growth = w2.shape[-1]
    cpad = _round_up(cmid, LANE)
    gpad = _round_up(growth, LANE)
    w1f = jnp.pad(w1 * s2, ((0, 0), (0, cpad - cmid))).astype(jnp.bfloat16)
    b2f = jnp.pad(b2, ((0, 0), (0, cpad - cmid)))                      # f32 bias row
    w2p = jnp.pad(w2, ((0, 0), (0, 0), (0, 0),
                       (0, cpad - cmid), (0, gpad - growth)))
    w2p = w2p.reshape(27, cpad, gpad).astype(jnp.bfloat16)
    return (s1, b1, w1f, b2f, w2p, growth)


def conv_block3d_forward(x5, kparams, *, tm=512):
    s1, b1, w1f, b2f, w2p, growth = kparams
    n, dd, hh, ww, cin = x5.shape
    m = n * dd * hh * ww
    cpad = w1f.shape[1]
    gpad = w2p.shape[-1]

    # Bottleneck: BN1+ReLU+1x1x1 conv (+folded BN2)+ReLU -> (m, Cpad) bf16 lane-dense.
    hmid = bottleneck(x5.reshape(m, cin), s1, b1, w1f, b2f, tm=tm)
    h5 = hmid.reshape(n, dd, hh, ww, cpad)

    # Single zero-pad (D:1/1, H:1/2, W:1/1) -- NO 27x im2col buffer.  The extra H row
    # keeps every in-kernel row-shifted tap slice in bounds.
    hp = jnp.pad(h5, ((0, 0), (1, 1), (1, 2), (1, 1), (0, 0)))
    dp, hp_h, wp = dd + 2, hh + 3, ww + 2
    hp_flat = hp.reshape(n, dp, hp_h * wp, cpad)

    hwp_out = hh * wp
    out = conv3x3x3(hp_flat, w2p, hwp_out=hwp_out, wp=wp)   # (n, d, hh*wp, gpad) f32
    # Drop the Wp-garbage columns and padded output channels (layout glue only).
    out = out.reshape(n, dd, hh, wp, gpad)[:, :, :, :ww, :growth]
    return out


def dense_block3d_forward(x_ncdhw, layer_params):
    # x_ncdhw: (N, C, D, H, W)  ->  returns (N, C + nb_layers*growth, D, H, W)
    x5 = jnp.transpose(x_ncdhw, (0, 2, 3, 4, 1))
    kparams = [prepare_layer_params(p) for p in layer_params]
    features = [x5]
    for kp in kparams:
        inp = jnp.concatenate(features, axis=-1)
        features.append(conv_block3d_forward(inp, kp))
    out = jnp.concatenate(features, axis=-1)
    return jnp.transpose(out, (0, 4, 1, 2, 3))


# ---------------- deterministic parameter init ----------------

def init_params(key, nb_layers, nb_filter, growth_rate):
    params = []
    for i in range(nb_layers):
        cin = nb_filter + i * growth_rate
        cmid = 4 * growth_rate
        k = jax.random.fold_in(key, i)
        k1, k2, k3, k4, k5, k6 = jax.random.split(k, 6)
        s1 = jax.random.uniform(k1, (1, cin), jnp.float32, 0.5, 1.5)
        b1 = jax.random.normal(k2, (1, cin), jnp.float32) * 0.1
        w1 = jax.random.normal(k3, (cin, cmid), jnp.float32) / jnp.sqrt(float(cin))
        s2 = jax.random.uniform(k4, (1, cmid), jnp.float32, 0.5, 1.5)
        b2 = jax.random.normal(k5, (1, cmid), jnp.float32) * 0.1
        w2 = jax.random.normal(k6, (3, 3, 3, cmid, growth_rate), jnp.float32) / jnp.sqrt(27.0 * cmid)
        params.append((s1, b1, w1, s2, b2, w2))
    return params


# ---------------- pure-JAX reference (for verification) ----------------

def _ref_conv_block(x5, p):
    s1, b1, w1, s2, b2, w2 = p
    n, dd, hh, ww, _ = x5.shape
    y = jnp.maximum(x5 * s1[0] + b1[0], 0.0)
    hm = jnp.einsum('ndhwc,cm->ndhwm', y, w1)
    hm = jnp.maximum(hm * s2[0] + b2[0], 0.0)
    hp = jnp.pad(hm, ((0, 0), (1, 1), (1, 1), (1, 1), (0, 0)))
    out = jnp.zeros((n, dd, hh, ww, w2.shape[-1]), jnp.float32)
    for kd in range(3):
        for kh in range(3):
            for kw in range(3):
                out = out + jnp.einsum(
                    'ndhwc,cg->ndhwg',
                    hp[:, kd:kd + dd, kh:kh + hh, kw:kw + ww, :],
                    w2[kd, kh, kw])
    return out


def _ref_dense_block(x_ncdhw, layer_params):
    x5 = jnp.transpose(x_ncdhw, (0, 2, 3, 4, 1))
    features = [x5]
    for p in layer_params:
        inp = jnp.concatenate(features, axis=-1)
        features.append(_ref_conv_block(inp, p))
    out = jnp.concatenate(features, axis=-1)
    return jnp.transpose(out, (0, 4, 1, 2, 3))


# ---------------- main ----------------

if __name__ == "__main__":
    nb_layers, nb_filter, growth_rate = 3, 4, 4
    N, D, H, W = 2, 8, 8, 8

    key = jax.random.PRNGKey(0)
    kx, kp = jax.random.split(key)
    x = jax.random.normal(kx, (N, nb_filter, D, H, W), jnp.float32)
    params = init_params(kp, nb_layers, nb_filter, growth_rate)

    out = jax.jit(dense_block3d_forward)(x, params)
    out = jax.block_until_ready(out)

    expected_c = nb_filter + nb_layers * growth_rate
    assert out.shape == (N, expected_c, D, H, W), out.shape

    ref = _ref_dense_block(x, params)
    max_err = float(jnp.max(jnp.abs(out - ref)))
    # bf16 matmul operands with f32 accumulation -> loose tolerance vs f32 reference.
    assert jnp.allclose(out, ref, rtol=5e-2, atol=5e-2), max_err

    print("KERNEL_OK")
</pallas_src>

<mosaic_0001>
module attributes {stable_mosaic.version = 11 : i64} {
  func.func @_bottleneck_kernel(%arg0: i32, %arg1: memref<512x4xf32, #tpu.memory_space<vmem>>, %arg2: memref<1x4xf32, #tpu.memory_space<vmem>>, %arg3: memref<1x4xf32, #tpu.memory_space<vmem>>, %arg4: memref<4x128xbf16, #tpu.memory_space<vmem>>, %arg5: memref<1x128xf32, #tpu.memory_space<vmem>>, %arg6: memref<512x128xbf16, #tpu.memory_space<vmem>>) attributes {dimension_semantics = [#tpu.dimension_semantics<parallel>], iteration_bounds = array<i64: 2>, scalar_prefetch = 0 : i64, scratch_operands = 0 : i64, tpu.core_type = #tpu.core_type<tc>, window_params = [{transform_indices = @transform_0, window_bounds = array<i64: 512, 4>}, {pipeline_mode = #tpu.pipeline_mode<synchronous>, transform_indices = @transform_1, window_bounds = array<i64: 1, 4>}, {pipeline_mode = #tpu.pipeline_mode<synchronous>, transform_indices = @transform_2, window_bounds = array<i64: 1, 4>}, {pipeline_mode = #tpu.pipeline_mode<synchronous>, transform_indices = @transform_3, window_bounds = array<i64: 4, 128>}, {pipeline_mode = #tpu.pipeline_mode<synchronous>, transform_indices = @transform_4, window_bounds = array<i64: 1, 128>}, {transform_indices = @transform_5, window_bounds = array<i64: 512, 128>}]} {
    %c0 = arith.constant 0 : index
    %c0_0 = arith.constant 0 : index
    %0 = vector.load %arg1[%c0, %c0_0] : memref<512x4xf32, #tpu.memory_space<vmem>>, vector<512x4xf32>
    %c0_1 = arith.constant 0 : index
    %c0_2 = arith.constant 0 : index
    %1 = vector.load %arg2[%c0_1, %c0_2] : memref<1x4xf32, #tpu.memory_space<vmem>>, vector<1x4xf32>
    %2 = vector.broadcast %1 : vector<1x4xf32> to vector<512x4xf32>
    %3 = arith.mulf %0, %2 : vector<512x4xf32>
    %c0_3 = arith.constant 0 : index
    %c0_4 = arith.constant 0 : index
    %4 = vector.load %arg3[%c0_3, %c0_4] : memref<1x4xf32, #tpu.memory_space<vmem>>, vector<1x4xf32>
    %5 = vector.broadcast %4 : vector<1x4xf32> to vector<512x4xf32>
    %6 = arith.addf %3, %5 : vector<512x4xf32>
    %cst = arith.constant 0.000000e+00 : f32
    %7 = vector.broadcast %cst : f32 to vector<512x4xf32>
    %8 = arith.maximumf %6, %7 : vector<512x4xf32>
    %9 = arith.truncf %8 : vector<512x4xf32> to vector<512x4xbf16>
    %c0_5 = arith.constant 0 : index
    %c0_6 = arith.constant 0 : index
    %10 = vector.load %arg4[%c0_5, %c0_6] : memref<4x128xbf16, #tpu.memory_space<vmem>>, vector<4x128xbf16>
    %cst_7 = arith.constant dense<0.000000e+00> : vector<512x128xf32>
    %11 = tpu.matmul %9, %10, %cst_7 {dimension_numbers = #tpu.dot_dimension_numbers<[1], [0], [0], [1], [0, 0, 1, 1], [], []>} : vector<512x4xbf16>, vector<4x128xbf16>, vector<512x128xf32> -> vector<512x128xf32>
    %c0_8 = arith.constant 0 : index
    %c0_9 = arith.constant 0 : index
    %12 = vector.load %arg5[%c0_8, %c0_9] : memref<1x128xf32, #tpu.memory_space<vmem>>, vector<1x128xf32>
    %13 = vector.broadcast %12 : vector<1x128xf32> to vector<512x128xf32>
    %14 = arith.addf %11, %13 : vector<512x128xf32>
    %cst_10 = arith.constant 0.000000e+00 : f32
    %15 = vector.broadcast %cst_10 : f32 to vector<512x128xf32>
    %16 = arith.maximumf %14, %15 : vector<512x128xf32>
    %17 = arith.truncf %16 : vector<512x128xf32> to vector<512x128xbf16>
    %c0_11 = arith.constant 0 : index
    %c0_12 = arith.constant 0 : index
    %18 = vector.load %arg6[%c0_11, %c0_12] : memref<512x128xbf16, #tpu.memory_space<vmem>>, vector<512x128xbf16>
    tpu.vector_store %arg6[%c0_11, %c0_12], %17 {strides = array<i32>} : memref<512x128xbf16, #tpu.memory_space<vmem>>, vector<512x128xbf16>,
    return
  }
  func.func @transform_0(%arg0: i32) -> (i32, i32) {
    %c0_i32 = arith.constant 0 : i32
    %c0_i32_0 = arith.constant 0 : i32
    return %arg0, %c0_i32 : i32, i32
  }
  func.func @transform_1(%arg0: i32) -> (i32, i32) {
    %c0_i32 = arith.constant 0 : i32
    %c0_i32_0 = arith.constant 0 : i32
    %c0_i32_1 = arith.constant 0 : i32
    return %c0_i32, %c0_i32_0 : i32, i32
  }
  func.func @transform_2(%arg0: i32) -> (i32, i32) {
    %c0_i32 = arith.constant 0 : i32
    %c0_i32_0 = arith.constant 0 : i32
    %c0_i32_1 = arith.constant 0 : i32
    return %c0_i32, %c0_i32_0 : i32, i32
  }
  func.func @transform_3(%arg0: i32) -> (i32, i32) {
    %c0_i32 = arith.constant 0 : i32
    %c0_i32_0 = arith.constant 0 : i32
    %c0_i32_1 = arith.constant 0 : i32
    return %c0_i32, %c0_i32_0 : i32, i32
  }
  func.func @transform_4(%arg0: i32) -> (i32, i32) {
    %c0_i32 = arith.constant 0 : i32
    %c0_i32_0 = arith.constant 0 : i32
    %c0_i32_1 = arith.constant 0 : i32
    return %c0_i32, %c0_i32_0 : i32, i32
  }
  func.func @transform_5(%arg0: i32) -> (i32, i32) {
    %c0_i32 = arith.constant 0 : i32
    %c0_i32_0 = arith.constant 0 : i32
    return %arg0, %c0_i32 : i32, i32
  }
}

module attributes {stable_mosaic.version = 11 : i64} {
  func.func @kernel(%arg0: i32, %arg1: i32, %arg2: memref<1x1x110x128xbf16, #tpu.memory_space<vmem>>, %arg3: memref<1x1x110x128xbf16, #tpu.memory_space<vmem>>, %arg4: memref<1x1x110x128xbf16, #tpu.memory_space<vmem>>, %arg5: memref<27x128x128xbf16, #tpu.memory_space<vmem>>, %arg6: memref<1x1x80x128xf32, #tpu.memory_space<vmem>>) attributes {dimension_semantics = [#tpu.dimension_semantics<parallel>, #tpu.dimension_semantics<parallel>], iteration_bounds = array<i64: 2, 8>, scalar_prefetch = 0 : i64, scratch_operands = 0 : i64, tpu.core_type = #tpu.core_type<tc>, window_params = [{transform_indices = @transform_0, window_bounds = array<i64: 1, 1, 110, 128>}, {transform_indices = @transform_1, window_bounds = array<i64: 1, 1, 110, 128>}, {transform_indices = @transform_2, window_bounds = array<i64: 1, 1, 110, 128>}, {pipeline_mode = #tpu.pipeline_mode<synchronous>, transform_indices = @transform_3, window_bounds = array<i64: 27, 128, 128>}, {transform_indices = @transform_4, window_bounds = array<i64: 1, 1, 80, 128>}]} {
    %cst = arith.constant 0.000000e+00 : f32
    %0 = vector.broadcast %cst : f32 to vector<80x128xf32>
    %c0 = arith.constant 0 : index
    %c0_0 = arith.constant 0 : index
    %c0_1 = arith.constant 0 : index
    %c0_2 = arith.constant 0 : index
    %1 = vector.load %arg2[%c0, %c0_0, %c0_1, %c0_2] : memref<1x1x110x128xbf16, #tpu.memory_space<vmem>>, vector<1x1x110x128xbf16>
    %2 = vector.shape_cast %1 : vector<1x1x110x128xbf16> to vector<110x128xbf16>
    %3 = arith.extf %2 : vector<110x128xbf16> to vector<110x128xf32>
    %4 = vector.extract_strided_slice %3 {offsets = [0, 0], sizes = [80, 128], strides = [1, 1]} : vector<110x128xf32> to vector<80x128xf32>
    %5 = arith.truncf %4 : vector<80x128xf32> to vector<80x128xbf16>
    %c0_3 = arith.constant 0 : index
    %c0_4 = arith.constant 0 : index
    %c0_5 = arith.constant 0 : index
    %6 = vector.load %arg5[%c0_3, %c0_4, %c0_5] : memref<27x128x128xbf16, #tpu.memory_space<vmem>>, vector<1x128x128xbf16>
    %7 = vector.shape_cast %6 : vector<1x128x128xbf16> to vector<128x128xbf16>
    %cst_6 = arith.constant dense<0.000000e+00> : vector<80x128xf32>
    %8 = tpu.matmul %5, %7, %cst_6 {dimension_numbers = #tpu.dot_dimension_numbers<[1], [0], [0], [1], [0, 0, 1, 1], [], []>} : vector<80x128xbf16>, vector<128x128xbf16>, vector<80x128xf32> -> vector<80x128xf32>
    %9 = arith.addf %0, %8 : vector<80x128xf32>
    %10 = vector.extract_strided_slice %3 {offsets = [1, 0], sizes = [80, 128], strides = [1, 1]} : vector<110x128xf32> to vector<80x128xf32>
    %11 = arith.truncf %10 : vector<80x128xf32> to vector<80x128xbf16>
    %c1 = arith.constant 1 : index
    %c0_7 = arith.constant 0 : index
    %c0_8 = arith.constant 0 : index
    %12 = vector.load %arg5[%c1, %c0_7, %c0_8] : memref<27x128x128xbf16, #tpu.memory_space<vmem>>, vector<1x128x128xbf16>
    %13 = vector.shape_cast %12 : vector<1x128x128xbf16> to vector<128x128xbf16>
    %cst_9 = arith.constant dense<0.000000e+00> : vector<80x128xf32>
    %14 = tpu.matmul %11, %13, %cst_9 {dimension_numbers = #tpu.dot_dimension_numbers<[1], [0], [0], [1], [0, 0, 1, 1], [], []>} : vector<80x128xbf16>, vector<128x128xbf16>, vector<80x128xf32> -> vector<80x128xf32>
    %15 = arith.addf %9, %14 : vector<80x128xf32>
    %16 = vector.extract_strided_slice %3 {offsets = [2, 0], sizes = [80, 128], strides = [1, 1]} : vector<110x128xf32> to vector<80x128xf32>
    %17 = arith.truncf %16 : vector<80x128xf32> to vector<80x128xbf16>
    %c2 = arith.constant 2 : index
    %c0_10 = arith.constant 0 : index
    %c0_11 = arith.constant 0 : index
    %18 = vector.load %arg5[%c2, %c0_10, %c0_11] : memref<27x128x128xbf16, #tpu.memory_space<vmem>>, vector<1x128x128xbf16>
    %19 = vector.shape_cast %18 : vector<1x128x128xbf16> to vector<128x128xbf16>
    %cst_12 = arith.constant dense<0.000000e+00> : vector<80x128xf32>
    %20 = tpu.matmul %17, %19, %cst_12 {dimension_numbers = #tpu.dot_dimension_numbers<[1], [0], [0], [1], [0, 0, 1, 1], [], []>} : vector<80x128xbf16>, vector<128x128xbf16>, vector<80x128xf32> -> vector<80x128xf32>
    %21 = arith.addf %15, %20 : vector<80x128xf32>
    %22 = vector.extract_strided_slice %3 {offsets = [10, 0], sizes = [80, 128], strides = [1, 1]} : vector<110x128xf32> to vector<80x128xf32>
    %23 = arith.truncf %22 : vector<80x128xf32> to vector<80x128xbf16>
    %c3 = arith.constant 3 : index
    %c0_13 = arith.constant 0 : index
    %c0_14 = arith.constant 0 : index
    %24 = vector.load %arg5[%c3, %c0_13, %c0_14] : memref<27x128x128xbf16, #tpu.memory_space<vmem>>, vector<1x128x128xbf16>
    %25 = vector.shape_cast %24 : vector<1x128x128xbf16> to vector<128x128xbf16>
    %cst_15 = arith.constant dense<0.000000e+00> : vector<80x128xf32>
    %26 = tpu.matmul %23, %25, %cst_15 {dimension_numbers = #tpu.dot_dimension_numbers<[1], [0], [0], [1], [0, 0, 1, 1], [], []>} : vector<80x128xbf16>, vector<128x128xbf16>, vector<80x128xf32> -> vector<80x128xf32>
    %27 = arith.addf %21, %26 : vector<80x128xf32>
    %28 = vector.extract_strided_slice %3 {offsets = [11, 0], sizes = [80, 128], strides = [1, 1]} : vector<110x128xf32> to vector<80x128xf32>
    %29 = arith.truncf %28 : vector<80x128xf32> to vector<80x128xbf16>
    %c4 = arith.constant 4 : index
    %c0_16 = arith.constant 0 : index
    %c0_17 = arith.constant 0 : index
    %30 = vector.load %arg5[%c4, %c0_16, %c0_17] : memref<27x128x128xbf16, #tpu.memory_space<vmem>>, vector<1x128x128xbf16>
    %31 = vector.shape_cast %30 : vector<1x128x128xbf16> to vector<128x128xbf16>
    %cst_18 = arith.constant dense<0.000000e+00> : vector<80x128xf32>
    %32 = tpu.matmul %29, %31, %cst_18 {dimension_numbers = #tpu.dot_dimension_numbers<[1], [0], [0], [1], [0, 0, 1, 1], [], []>} : vector<80x128xbf16>, vector<128x128xbf16>, vector<80x128xf32> -> vector<80x128xf32>
    %33 = arith.addf %27, %32 : vector<80x128xf32>
    %34 = vector.extract_strided_slice %3 {offsets = [12, 0], sizes = [80, 128], strides = [1, 1]} : vector<110x128xf32> to vector<80x128xf32>
    %35 = arith.truncf %34 : vector<80x128xf32> to vector<80x128xbf16>
    %c5 = arith.constant 5 : index
    %c0_19 = arith.constant 0 : index
    %c0_20 = arith.constant 0 : index
    %36 = vector.load %arg5[%c5, %c0_19, %c0_20] : memref<27x128x128xbf16, #tpu.memory_space<vmem>>, vector<1x128x128xbf16>
    %37 = vector.shape_cast %36 : vector<1x128x128xbf16> to vector<128x128xbf16>
    %cst_21 = arith.constant dense<0.000000e+00> : vector<80x128xf32>
    %38 = tpu.matmul %35, %37, %cst_21 {dimension_numbers = #tpu.dot_dimension_numbers<[1], [0], [0], [1], [0, 0, 1, 1], [], []>} : vector<80x128xbf16>, vector<128x128xbf16>, vector<80x128xf32> -> vector<80x128xf32>
    %39 = arith.addf %33, %38 : vector<80x128xf32>
    %40 = vector.extract_strided_slice %3 {offsets = [20, 0], sizes = [80, 128], strides = [1, 1]} : vector<110x128xf32> to vector<80x128xf32>
    %41 = arith.truncf %40 : vector<80x128xf32> to vector<80x128xbf16>
    %c6 = arith.constant 6 : index
    %c0_22 = arith.constant 0 : index
    %c0_23 = arith.constant 0 : index
    %42 = vector.load %arg5[%c6, %c0_22, %c0_23] : memref<27x128x128xbf16, #tpu.memory_space<vmem>>, vector<1x128x128xbf16>
    %43 = vector.shape_cast %42 : vector<1x128x128xbf16> to vector<128x128xbf16>
    %cst_24 = arith.constant dense<0.000000e+00> : vector<80x128xf32>
    %44 = tpu.matmul %41, %43, %cst_24 {dimension_numbers = #tpu.dot_dimension_numbers<[1], [0], [0], [1], [0, 0, 1, 1], [], []>} : vector<80x128xbf16>, vector<128x128xbf16>, vector<80x128xf32> -> vector<80x128xf32>
    %45 = arith.addf %39, %44 : vector<80x128xf32>
    %46 = vector.extract_strided_slice %3 {offsets = [21, 0], sizes = [80, 128], strides = [1, 1]} : vector<110x128xf32> to vector<80x128xf32>
    %47 = arith.truncf %46 : vector<80x128xf32> to vector<80x128xbf16>
    %c7 = arith.constant 7 : index
    %c0_25 = arith.constant 0 : index
    %c0_26 = arith.constant 0 : index
    %48 = vector.load %arg5[%c7, %c0_25, %c0_26] : memref<27x128x128xbf16, #tpu.memory_space<vmem>>, vector<1x128x128xbf16>
    %49 = vector.shape_cast %48 : vector<1x128x128xbf16> to vector<128x128xbf16>
    %cst_27 = arith.constant dense<0.000000e+00> : vector<80x128xf32>
    %50 = tpu.matmul %47, %49, %cst_27 {dimension_numbers = #tpu.dot_dimension_numbers<[1], [0], [0], [1], [0, 0, 1, 1], [], []>} : vector<80x128xbf16>, vector<128x128xbf16>, vector<80x128xf32> -> vector<80x128xf32>
    %51 = arith.addf %45, %50 : vector<80x128xf32>
    %52 = vector.extract_strided_slice %3 {offsets = [22, 0], sizes = [80, 128], strides = [1, 1]} : vector<110x128xf32> to vector<80x128xf32>
    %53 = arith.truncf %52 : vector<80x128xf32> to vector<80x128xbf16>
    %c8 = arith.constant 8 : index
    %c0_28 = arith.constant 0 : index
    %c0_29 = arith.constant 0 : index
    %54 = vector.load %arg5[%c8, %c0_28, %c0_29] : memref<27x128x128xbf16, #tpu.memory_space<vmem>>, vector<1x128x128xbf16>
    %55 = vector.shape_cast %54 : vector<1x128x128xbf16> to vector<128x128xbf16>
    %cst_30 = arith.constant dense<0.000000e+00> : vector<80x128xf32>
    %56 = tpu.matmul %53, %55, %cst_30 {dimension_numbers = #tpu.dot_dimension_numbers<[1], [0], [0], [1], [0, 0, 1, 1], [], []>} : vector<80x128xbf16>, vector<128x128xbf16>, vector<80x128xf32> -> vector<80x128xf32>
    %57 = arith.addf %51, %56 : vector<80x128xf32>
    %c0_31 = arith.constant 0 : index
    %c0_32 = arith.constant 0 : index
    %c0_33 = arith.constant 0 : index
    %c0_34 = arith.constant 0 : index
    %58 = vector.load %arg3[%c0_31, %c0_32, %c0_33, %c0_34] : memref<1x1x110x128xbf16, #tpu.memory_space<vmem>>, vector<1x1x110x128xbf16>
    %59 = vector.shape_cast %58 : vector<1x1x110x128xbf16> to vector<110x128xbf16>
    %60 = arith.extf %59 : vector<110x128xbf16> to vector<110x128xf32>
    %61 = vector.extract_strided_slice %60 {offsets = [0, 0], sizes = [80, 128], strides = [1, 1]} : vector<110x128xf32> to vector<80x128xf32>
    %62 = arith.truncf %61 : vector<80x128xf32> to vector<80x128xbf16>
    %c9 = arith.constant 9 : index
    %c0_35 = arith.constant 0 : index
    %c0_36 = arith.constant 0 : index
    %63 = vector.load %arg5[%c9, %c0_35, %c0_36] : memref<27x128x128xbf16, #tpu.memory_space<vmem>>, vector<1x128x128xbf16>
    %64 = vector.shape_cast %63 : vector<1x128x128xbf16> to vector<128x128xbf16>
    %cst_37 = arith.constant dense<0.000000e+00> : vector<80x128xf32>
    %65 = tpu.matmul %62, %64, %cst_37 {dimension_numbers = #tpu.dot_dimension_numbers<[1], [0], [0], [1], [0, 0, 1, 1], [], []>} : vector<80x128xbf16>, vector<128x128xbf16>, vector<80x128xf32> -> vector<80x128xf32>
    %66 = arith.addf %57, %65 : vector<80x128xf32>
    %67 = vector.extract_strided_slice %60 {offsets = [1, 0], sizes = [80, 128], strides = [1, 1]} : vector<110x128xf32> to vector<80x128xf32>
    %68 = arith.truncf %67 : vector<80x128xf32> to vector<80x128xbf16>
    %c10 = arith.constant 10 : index
    %c0_38 = arith.constant 0 : index
    %c0_39 = arith.constant 0 : index
    %69 = vector.load %arg5[%c10, %c0_38, %c0_39] : memref<27x128x128xbf16, #tpu.memory_space<vmem>>, vector<1x128x128xbf16>
    %70 = vector.shape_cast %69 : vector<1x128x128xbf16> to vector<128x128xbf16>
    %cst_40 = arith.constant dense<0.000000e+00> : vector<80x128xf32>
    %71 = tpu.matmul %68, %70, %cst_40 {dimension_numbers = #tpu.dot_dimension_numbers<[1], [0], [0], [1], [0, 0, 1, 1], [], []>} : vector<80x128xbf16>, vector<128x128xbf16>, vector<80x128xf32> -> vector<80x128xf32>
    %72 = arith.addf %66, %71 : vector<80x128xf32>
    %73 = vector.extract_strided_slice %60 {offsets = [2, 0], sizes = [80, 128], strides = [1, 1]} : vector<110x128xf32> to vector<80x128xf32>
    %74 = arith.truncf %73 : vector<80x128xf32> to vector<80x128xbf16>
    %c11 = arith.constant 11 : index
    %c0_41 = arith.constant 0 : index
    %c0_42 = arith.constant 0 : index
    %75 = vector.load %arg5[%c11, %c0_41, %c0_42] : memref<27x128x128xbf16, #tpu.memory_space<vmem>>, vector<1x128x128xbf16>
    %76 = vector.shape_cast %75 : vector<1x128x128xbf16> to vector<128x128xbf16>
    %cst_43 = arith.constant dense<0.000000e+00> : vector<80x128xf32>
    %77 = tpu.matmul %74, %76, %cst_43 {dimension_numbers = #tpu.dot_dimension_numbers<[1], [0], [0], [1], [0, 0, 1, 1], [], []>} : vector<80x128xbf16>, vector<128x128xbf16>, vector<80x128xf32> -> vector<80x128xf32>
    %78 = arith.addf %72, %77 : vector<80x128xf32>
    %79 = vector.extract_strided_slice %60 {offsets = [10, 0], sizes = [80, 128], strides = [1, 1]} : vector<110x128xf32> to vector<80x128xf32>
    %80 = arith.truncf %79 : vector<80x128xf32> to vector<80x128xbf16>
    %c12 = arith.constant 12 : index
    %c0_44 = arith.constant 0 : index
    %c0_45 = arith.constant 0 : index
    %81 = vector.load %arg5[%c12, %c0_44, %c0_45] : memref<27x128x128xbf16, #tpu.memory_space<vmem>>, vector<1x128x128xbf16>
    %82 = vector.shape_cast %81 : vector<1x128x128xbf16> to vector<128x128xbf16>
    %cst_46 = arith.constant dense<0.000000e+00> : vector<80x128xf32>
    %83 = tpu.matmul %80, %82, %cst_46 {dimension_numbers = #tpu.dot_dimension_numbers<[1], [0], [0], [1], [0, 0, 1, 1], [], []>} : vector<80x128xbf16>, vector<128x128xbf16>, vector<80x128xf32> -> vector<80x128xf32>
    %84 = arith.addf %78, %83 : vector<80x128xf32>
    %85 = vector.extract_strided_slice %60 {offsets = [11, 0], sizes = [80, 128], strides = [1, 1]} : vector<110x128xf32> to vector<80x128xf32>
    %86 = arith.truncf %85 : vector<80x128xf32> to vector<80x128xbf16>
    %c13 = arith.constant 13 : index
    %c0_47 = arith.constant 0 : index
    %c0_48 = arith.constant 0 : index
    %87 = vector.load %arg5[%c13, %c0_47, %c0_48] : memref<27x128x128xbf16, #tpu.memory_space<vmem>>, vector<1x128x128xbf16>
    %88 = vector.shape_cast %87 : vector<1x128x128xbf16> to vector<128x128xbf16>
    %cst_49 = arith.constant dense<0.000000e+00> : vector<80x128xf32>
    %89 = tpu.matmul %86, %88, %cst_49 {dimension_numbers = #tpu.dot_dimension_numbers<[1], [0], [0], [1], [0, 0, 1, 1], [], []>} : vector<80x128xbf16>, vector<128x128xbf16>, vector<80x128xf32> -> vector<80x128xf32>
    %90 = arith.addf %84, %89 : vector<80x128xf32>
    %91 = vector.extract_strided_slice %60 {offsets = [12, 0], sizes = [80, 128], strides = [1, 1]} : vector<110x128xf32> to vector<80x128xf32>
    %92 = arith.truncf %91 : vector<80x128xf32> to vector<80x128xbf16>
    %c14 = arith.constant 14 : index
    %c0_50 = arith.constant 0 : index
    %c0_51 = arith.constant 0 : index
    %93 = vector.load %arg5[%c14, %c0_50, %c0_51] : memref<27x128x128xbf16, #tpu.memory_space<vmem>>, vector<1x128x128xbf16>
    %94 = vector.shape_cast %93 : vector<1x128x128xbf16> to vector<128x128xbf16>
    %cst_52 = arith.constant dense<0.000000e+00> : vector<80x128xf32>
    %95 = tpu.matmul %92, %94, %cst_52 {dimension_numbers = #tpu.dot_dimension_numbers<[1], [0], [0], [1], [0, 0, 1, 1], [], []>} : vector<80x128xbf16>, vector<128x128xbf16>, vector<80x128xf32> -> vector<80x128xf32>
    %96 = arith.addf %90, %95 : vector<80x128xf32>
    %97 = vector.extract_strided_slice %60 {offsets = [20, 0], sizes = [80, 128], strides = [1, 1]} : vector<110x128xf32> to vector<80x128xf32>
    %98 = arith.truncf %97 : vector<80x128xf32> to vector<80x128xbf16>
    %c15 = arith.constant 15 : index
    %c0_53 = arith.constant 0 : index
    %c0_54 = arith.constant 0 : index
    %99 = vector.load %arg5[%c15, %c0_53, %c0_54] : memref<27x128x128xbf16, #tpu.memory_space<vmem>>, vector<1x128x128xbf16>
    %100 = vector.shape_cast %99 : vector<1x128x128xbf16> to vector<128x128xbf16>
    %cst_55 = arith.constant dense<0.000000e+00> : vector<80x128xf32>
    %101 = tpu.matmul %98, %100, %cst_55 {dimension_numbers = #tpu.dot_dimension_numbers<[1], [0], [0], [1], [0, 0, 1, 1], [], []>} : vector<80x128xbf16>, vector<128x128xbf16>, vector<80x128xf32> -> vector<80x128xf32>
    %102 = arith.addf %96, %101 : vector<80x128xf32>
    %103 = vector.extract_strided_slice %60 {offsets = [21, 0], sizes = [80, 128], strides = [1, 1]} : vector<110x128xf32> to vector<80x128xf32>
    %104 = arith.truncf %103 : vector<80x128xf32> to vector<80x128xbf16>
    %c16 = arith.constant 16 : index
    %c0_56 = arith.constant 0 : index
    %c0_57 = arith.constant 0 : index
    %105 = vector.load %arg5[%c16, %c0_56, %c0_57] : memref<27x128x128xbf16, #tpu.memory_space<vmem>>, vector<1x128x128xbf16>
    %106 = vector.shape_cast %105 : vector<1x128x128xbf16> to vector<128x128xbf16>
    %cst_58 = arith.constant dense<0.000000e+00> : vector<80x128xf32>
    %107 = tpu.matmul %104, %106, %cst_58 {dimension_numbers = #tpu.dot_dimension_numbers<[1], [0], [0], [1], [0, 0, 1, 1], [], []>} : vector<80x128xbf16>, vector<128x128xbf16>, vector<80x128xf32> -> vector<80x128xf32>
    %108 = arith.addf %102, %107 : vector<80x128xf32>
    %109 = vector.extract_strided_slice %60 {offsets = [22, 0], sizes = [80, 128], strides = [1, 1]} : vector<110x128xf32> to vector<80x128xf32>
    %110 = arith.truncf %109 : vector<80x128xf32> to vector<80x128xbf16>
    %c17 = arith.constant 17 : index
    %c0_59 = arith.constant 0 : index
    %c0_60 = arith.constant 0 : index
    %111 = vector.load %arg5[%c17, %c0_59, %c0_60] : memref<27x128x128xbf16, #tpu.memory_space<vmem>>, vector<1x128x128xbf16>
    %112 = vector.shape_cast %111 : vector<1x128x128xbf16> to vector<128x128xbf16>
    %cst_61 = arith.constant dense<0.000000e+00> : vector<80x128xf32>
    %113 = tpu.matmul %110, %112, %cst_61 {dimension_numbers = #tpu.dot_dimension_numbers<[1], [0], [0], [1], [0, 0, 1, 1], [], []>} : vector<80x128xbf16>, vector<128x128xbf16>, vector<80x128xf32> -> vector<80x128xf32>
    %114 = arith.addf %108, %113 : vector<80x128xf32>
    %c0_62 = arith.constant 0 : index
    %c0_63 = arith.constant 0 : index
    %c0_64 = arith.constant 0 : index
    %c0_65 = arith.constant 0 : index
    %115 = vector.load %arg4[%c0_62, %c0_63, %c0_64, %c0_65] : memref<1x1x110x128xbf16, #tpu.memory_space<vmem>>, vector<1x1x110x128xbf16>
    %116 = vector.shape_cast %115 : vector<1x1x110x128xbf16> to vector<110x128xbf16>
    %117 = arith.extf %116 : vector<110x128xbf16> to vector<110x128xf32>
    %118 = vector.extract_strided_slice %117 {offsets = [0, 0], sizes = [80, 128], strides = [1, 1]} : vector<110x128xf32> to vector<80x128xf32>
    %119 = arith.truncf %118 : vector<80x128xf32> to vector<80x128xbf16>
    %c18 = arith.constant 18 : index
    %c0_66 = arith.constant 0 : index
    %c0_67 = arith.constant 0 : index
    %120 = vector.load %arg5[%c18, %c0_66, %c0_67] : memref<27x128x128xbf16, #tpu.memory_space<vmem>>, vector<1x128x128xbf16>
    %121 = vector.shape_cast %120 : vector<1x128x128xbf16> to vector<128x128xbf16>
    %cst_68 = arith.constant dense<0.000000e+00> : vector<80x128xf32>
    %122 = tpu.matmul %119, %121, %cst_68 {dimension_numbers = #tpu.dot_dimension_numbers<[1], [0], [0], [1], [0, 0, 1, 1], [], []>} : vector<80x128xbf16>, vector<128x128xbf16>, vector<80x128xf32> -> vector<80x128xf32>
    %123 = arith.addf %114, %122 : vector<80x128xf32>
    %124 = vector.extract_strided_slice %117 {offsets = [1, 0], sizes = [80, 128], strides = [1, 1]} : vector<110x128xf32> to vector<80x128xf32>
    %125 = arith.truncf %124 : vector<80x128xf32> to vector<80x128xbf16>
    %c19 = arith.constant 19 : index
    %c0_69 = arith.constant 0 : index
    %c0_70 = arith.constant 0 : index
    %126 = vector.load %arg5[%c19, %c0_69, %c0_70] : memref<27x128x128xbf16, #tpu.memory_space<vmem>>, vector<1x128x128xbf16>
    %127 = vector.shape_cast %126 : vector<1x128x128xbf16> to vector<128x128xbf16>
    %cst_71 = arith.constant dense<0.000000e+00> : vector<80x128xf32>
    %128 = tpu.matmul %125, %127, %cst_71 {dimension_numbers = #tpu.dot_dimension_numbers<[1], [0], [0], [1], [0, 0, 1, 1], [], []>} : vector<80x128xbf16>, vector<128x128xbf16>, vector<80x128xf32> -> vector<80x128xf32>
    %129 = arith.addf %123, %128 : vector<80x128xf32>
    %130 = vector.extract_strided_slice %117 {offsets = [2, 0], sizes = [80, 128], strides = [1, 1]} : vector<110x128xf32> to vector<80x128xf32>
    %131 = arith.truncf %130 : vector<80x128xf32> to vector<80x128xbf16>
    %c20 = arith.constant 20 : index
    %c0_72 = arith.constant 0 : index
    %c0_73 = arith.constant 0 : index
    %132 = vector.load %arg5[%c20, %c0_72, %c0_73] : memref<27x128x128xbf16, #tpu.memory_space<vmem>>, vector<1x128x128xbf16>
    %133 = vector.shape_cast %132 : vector<1x128x128xbf16> to vector<128x128xbf16>
    %cst_74 = arith.constant dense<0.000000e+00> : vector<80x128xf32>
    %134 = tpu.matmul %131, %133, %cst_74 {dimension_numbers = #tpu.dot_dimension_numbers<[1], [0], [0], [1], [0, 0, 1, 1], [], []>} : vector<80x128xbf16>, vector<128x128xbf16>, vector<80x128xf32> -> vector<80x128xf32>
    %135 = arith.addf %129, %134 : vector<80x128xf32>
    %136 = vector.extract_strided_slice %117 {offsets = [10, 0], sizes = [80, 128], strides = [1, 1]} : vector<110x128xf32> to vector<80x128xf32>
    %137 = arith.truncf %136 : vector<80x128xf32> to vector<80x128xbf16>
    %c21 = arith.constant 21 : index
    %c0_75 = arith.constant 0 : index
    %c0_76 = arith.constant 0 : index
    %138 = vector.load %arg5[%c21, %c0_75, %c0_76] : memref<27x128x128xbf16, #tpu.memory_space<vmem>>, vector<1x128x128xbf16>
    %139 = vector.shape_cast %138 : vector<1x128x128xbf16> to vector<128x128xbf16>
    %cst_77 = arith.constant dense<0.000000e+00> : vector<80x128xf32>
    %140 = tpu.matmul %137, %139, %cst_77 {dimension_numbers = #tpu.dot_dimension_numbers<[1], [0], [0], [1], [0, 0, 1, 1], [], []>} : vector<80x128xbf16>, vector<128x128xbf16>, vector<80x128xf32> -> vector<80x128xf32>
    %141 = arith.addf %135, %140 : vector<80x128xf32>
    %142 = vector.extract_strided_slice %117 {offsets = [11, 0], sizes = [80, 128], strides = [1, 1]} : vector<110x128xf32> to vector<80x128xf32>
    %143 = arith.truncf %142 : vector<80x128xf32> to vector<80x128xbf16>
    %c22 = arith.constant 22 : index
    %c0_78 = arith.constant 0 : index
    %c0_79 = arith.constant 0 : index
    %144 = vector.load %arg5[%c22, %c0_78, %c0_79] : memref<27x128x128xbf16, #tpu.memory_space<vmem>>, vector<1x128x128xbf16>
    %145 = vector.shape_cast %144 : vector<1x128x128xbf16> to vector<128x128xbf16>
    %cst_80 = arith.constant dense<0.000000e+00> : vector<80x128xf32>
    %146 = tpu.matmul %143, %145, %cst_80 {dimension_numbers = #tpu.dot_dimension_numbers<[1], [0], [0], [1], [0, 0, 1, 1], [], []>} : vector<80x128xbf16>, vector<128x128xbf16>, vector<80x128xf32> -> vector<80x128xf32>
    %147 = arith.addf %141, %146 : vector<80x128xf32>
    %148 = vector.extract_strided_slice %117 {offsets = [12, 0], sizes = [80, 128], strides = [1, 1]} : vector<110x128xf32> to vector<80x128xf32>
    %149 = arith.truncf %148 : vector<80x128xf32> to vector<80x128xbf16>
    %c23 = arith.constant 23 : index
    %c0_81 = arith.constant 0 : index
    %c0_82 = arith.constant 0 : index
    %150 = vector.load %arg5[%c23, %c0_81, %c0_82] : memref<27x128x128xbf16, #tpu.memory_space<vmem>>, vector<1x128x128xbf16>
    %151 = vector.shape_cast %150 : vector<1x128x128xbf16> to vector<128x128xbf16>
    %cst_83 = arith.constant dense<0.000000e+00> : vector<80x128xf32>
    %152 = tpu.matmul %149, %151, %cst_83 {dimension_numbers = #tpu.dot_dimension_numbers<[1], [0], [0], [1], [0, 0, 1, 1], [], []>} : vector<80x128xbf16>, vector<128x128xbf16>, vector<80x128xf32> -> vector<80x128xf32>
    %153 = arith.addf %147, %152 : vector<80x128xf32>
    %154 = vector.extract_strided_slice %117 {offsets = [20, 0], sizes = [80, 128], strides = [1, 1]} : vector<110x128xf32> to vector<80x128xf32>
    %155 = arith.truncf %154 : vector<80x128xf32> to vector<80x128xbf16>
    %c24 = arith.constant 24 : index
    %c0_84 = arith.constant 0 : index
    %c0_85 = arith.constant 0 : index
    %156 = vector.load %arg5[%c24, %c0_84, %c0_85] : memref<27x128x128xbf16, #tpu.memory_space<vmem>>, vector<1x128x128xbf16>
    %157 = vector.shape_cast %156 : vector<1x128x128xbf16> to vector<128x128xbf16>
    %cst_86 = arith.constant dense<0.000000e+00> : vector<80x128xf32>
    %158 = tpu.matmul %155, %157, %cst_86 {dimension_numbers = #tpu.dot_dimension_numbers<[1], [0], [0], [1], [0, 0, 1, 1], [], []>} : vector<80x128xbf16>, vector<128x128xbf16>, vector<80x128xf32> -> vector<80x128xf32>
    %159 = arith.addf %153, %158 : vector<80x128xf32>
    %160 = vector.extract_strided_slice %117 {offsets = [21, 0], sizes = [80, 128], strides = [1, 1]} : vector<110x128xf32> to vector<80x128xf32>
    %161 = arith.truncf %160 : vector<80x128xf32> to vector<80x128xbf16>
    %c25 = arith.constant 25 : index
    %c0_87 = arith.constant 0 : index
    %c0_88 = arith.constant 0 : index
    %162 = vector.load %arg5[%c25, %c0_87, %c0_88] : memref<27x128x128xbf16, #tpu.memory_space<vmem>>, vector<1x128x128xbf16>
    %163 = vector.shape_cast %162 : vector<1x128x128xbf16> to vector<128x128xbf16>
    %cst_89 = arith.constant dense<0.000000e+00> : vector<80x128xf32>
    %164 = tpu.matmul %161, %163, %cst_89 {dimension_numbers = #tpu.dot_dimension_numbers<[1], [0], [0], [1], [0, 0, 1, 1], [], []>} : vector<80x128xbf16>, vector<128x128xbf16>, vector<80x128xf32> -> vector<80x128xf32>
    %165 = arith.addf %159, %164 : vector<80x128xf32>
    %166 = vector.extract_strided_slice %117 {offsets = [22, 0], sizes = [80, 128], strides = [1, 1]} : vector<110x128xf32> to vector<80x128xf32>
    %167 = arith.truncf %166 : vector<80x128xf32> to vector<80x128xbf16>
    %c26 = arith.constant 26 : index
    %c0_90 = arith.constant 0 : index
    %c0_91 = arith.constant 0 : index
    %168 = vector.load %arg5[%c26, %c0_90, %c0_91] : memref<27x128x128xbf16, #tpu.memory_space<vmem>>, vector<1x128x128xbf16>
    %169 = vector.shape_cast %168 : vector<1x128x128xbf16> to vector<128x128xbf16>
    %cst_92 = arith.constant dense<0.000000e+00> : vector<80x128xf32>
    %170 = tpu.matmul %167, %169, %cst_92 {dimension_numbers = #tpu.dot_dimension_numbers<[1], [0], [0], [1], [0, 0, 1, 1], [], []>} : vector<80x128xbf16>, vector<128x128xbf16>, vector<80x128xf32> -> vector<80x128xf32>
    %171 = arith.addf %165, %170 : vector<80x128xf32>
    %c0_93 = arith.constant 0 : index
    %c0_94 = arith.constant 0 : index
    %c0_95 = arith.constant 0 : index
    %c0_96 = arith.constant 0 : index
    %172 = vector.load %arg6[%c0_93, %c0_94, %c0_95, %c0_96] : memref<1x1x80x128xf32, #tpu.memory_space<vmem>>, vector<1x1x80x128xf32>
    %173 = vector.shape_cast %172 : vector<1x1x80x128xf32> to vector<80x128xf32>
    %174 = vector.shape_cast %171 : vector<80x128xf32> to vector<1x1x80x128xf32>
    tpu.vector_store %arg6[%c0_93, %c0_94, %c0_95, %c0_96], %174 {strides = array<i32>} : memref<1x1x80x128xf32, #tpu.memory_space<vmem>>, vector<1x1x80x128xf32>,
    return
  }
  func.func @transform_0(%arg0: i32, %arg1: i32) -> (i32, i32, i32, i32) {
    %c0_i32 = arith.constant 0 : i32
    %0 = arith.addi %arg1, %c0_i32 : i32
    %c0_i32_0 = arith.constant 0 : i32
    %c0_i32_1 = arith.constant 0 : i32
    %c0_i32_2 = arith.constant 0 : i32
    return %arg0, %0, %c0_i32_0, %c0_i32_1 : i32, i32, i32, i32
  }
  func.func @transform_1(%arg0: i32, %arg1: i32) -> (i32, i32, i32, i32) {
    %c1_i32 = arith.constant 1 : i32
    %0 = arith.addi %arg1, %c1_i32 : i32
    %c0_i32 = arith.constant 0 : i32
    %c0_i32_0 = arith.constant 0 : i32
    %c0_i32_1 = arith.constant 0 : i32
    return %arg0, %0, %c0_i32, %c0_i32_0 : i32, i32, i32, i32
  }
  func.func @transform_2(%arg0: i32, %arg1: i32) -> (i32, i32, i32, i32) {
    %c2_i32 = arith.constant 2 : i32
    %0 = arith.addi %arg1, %c2_i32 : i32
    %c0_i32 = arith.constant 0 : i32
    %c0_i32_0 = arith.constant 0 : i32
    %c0_i32_1 = arith.constant 0 : i32
    return %arg0, %0, %c0_i32, %c0_i32_0 : i32, i32, i32, i32
  }
  func.func @transform_3(%arg0: i32, %arg1: i32) -> (i32, i32, i32) {
    %c0_i32 = arith.constant 0 : i32
    %c0_i32_0 = arith.constant 0 : i32
    %c0_i32_1 = arith.constant 0 : i32
    %c0_i32_2 = arith.constant 0 : i32
    return %c0_i32, %c0_i32_0, %c0_i32_1 : i32, i32, i32
  }
  func.func @transform_4(%arg0: i32, %arg1: i32) -> (i32, i32, i32, i32) {
    %c0_i32 = arith.constant 0 : i32
    %c0_i32_0 = arith.constant 0 : i32
    %c0_i32_1 = arith.constant 0 : i32
    return %arg0, %arg1, %c0_i32, %c0_i32_0 : i32, i32, i32, i32
  }
}

module attributes {stable_mosaic.version = 11 : i64} {
  func.func @_bottleneck_kernel(%arg0: i32, %arg1: memref<512x8xf32, #tpu.memory_space<vmem>>, %arg2: memref<1x8xf32, #tpu.memory_space<vmem>>, %arg3: memref<1x8xf32, #tpu.memory_space<vmem>>, %arg4: memref<8x128xbf16, #tpu.memory_space<vmem>>, %arg5: memref<1x128xf32, #tpu.memory_space<vmem>>, %arg6: memref<512x128xbf16, #tpu.memory_space<vmem>>) attributes {dimension_semantics = [#tpu.dimension_semantics<parallel>], iteration_bounds = array<i64: 2>, scalar_prefetch = 0 : i64, scratch_operands = 0 : i64, tpu.core_type = #tpu.core_type<tc>, window_params = [{transform_indices = @transform_0, window_bounds = array<i64: 512, 8>}, {pipeline_mode = #tpu.pipeline_mode<synchronous>, transform_indices = @transform_1, window_bounds = array<i64: 1, 8>}, {pipeline_mode = #tpu.pipeline_mode<synchronous>, transform_indices = @transform_2, window_bounds = array<i64: 1, 8>}, {pipeline_mode = #tpu.pipeline_mode<synchronous>, transform_indices = @transform_3, window_bounds = array<i64: 8, 128>}, {pipeline_mode = #tpu.pipeline_mode<synchronous>, transform_indices = @transform_4, window_bounds = array<i64: 1, 128>}, {transform_indices = @transform_5, window_bounds = array<i64: 512, 128>}]} {
    %c0 = arith.constant 0 : index
    %c0_0 = arith.constant 0 : index
    %0 = vector.load %arg1[%c0, %c0_0] : memref<512x8xf32, #tpu.memory_space<vmem>>, vector<512x8xf32>
    %c0_1 = arith.constant 0 : index
    %c0_2 = arith.constant 0 : index
    %1 = vector.load %arg2[%c0_1, %c0_2] : memref<1x8xf32, #tpu.memory_space<vmem>>, vector<1x8xf32>
    %2 = vector.broadcast %1 : vector<1x8xf32> to vector<512x8xf32>
    %3 = arith.mulf %0, %2 : vector<512x8xf32>
    %c0_3 = arith.constant 0 : index
    %c0_4 = arith.constant 0 : index
    %4 = vector.load %arg3[%c0_3, %c0_4] : memref<1x8xf32, #tpu.memory_space<vmem>>, vector<1x8xf32>
    %5 = vector.broadcast %4 : vector<1x8xf32> to vector<512x8xf32>
    %6 = arith.addf %3, %5 : vector<512x8xf32>
    %cst = arith.constant 0.000000e+00 : f32
    %7 = vector.broadcast %cst : f32 to vector<512x8xf32>
    %8 = arith.maximumf %6, %7 : vector<512x8xf32>
    %9 = arith.truncf %8 : vector<512x8xf32> to vector<512x8xbf16>
    %c0_5 = arith.constant 0 : index
    %c0_6 = arith.constant 0 : index
    %10 = vector.load %arg4[%c0_5, %c0_6] : memref<8x128xbf16, #tpu.memory_space<vmem>>, vector<8x128xbf16>
    %cst_7 = arith.constant dense<0.000000e+00> : vector<512x128xf32>
    %11 = tpu.matmul %9, %10, %cst_7 {dimension_numbers = #tpu.dot_dimension_numbers<[1], [0], [0], [1], [0, 0, 1, 1], [], []>} : vector<512x8xbf16>, vector<8x128xbf16>, vector<512x128xf32> -> vector<512x128xf32>
    %c0_8 = arith.constant 0 : index
    %c0_9 = arith.constant 0 : index
    %12 = vector.load %arg5[%c0_8, %c0_9] : memref<1x128xf32, #tpu.memory_space<vmem>>, vector<1x128xf32>
    %13 = vector.broadcast %12 : vector<1x128xf32> to vector<512x128xf32>
    %14 = arith.addf %11, %13 : vector<512x128xf32>
    %cst_10 = arith.constant 0.000000e+00 : f32
    %15 = vector.broadcast %cst_10 : f32 to vector<512x128xf32>
    %16 = arith.maximumf %14, %15 : vector<512x128xf32>
    %17 = arith.truncf %16 : vector<512x128xf32> to vector<512x128xbf16>
    %c0_11 = arith.constant 0 : index
    %c0_12 = arith.constant 0 : index
    %18 = vector.load %arg6[%c0_11, %c0_12] : memref<512x128xbf16, #tpu.memory_space<vmem>>, vector<512x128xbf16>
    tpu.vector_store %arg6[%c0_11, %c0_12], %17 {strides = array<i32>} : memref<512x128xbf16, #tpu.memory_space<vmem>>, vector<512x128xbf16>,
    return
  }
  func.func @transform_0(%arg0: i32) -> (i32, i32) {
    %c0_i32 = arith.constant 0 : i32
    %c0_i32_0 = arith.constant 0 : i32
    return %arg0, %c0_i32 : i32, i32
  }
  func.func @transform_1(%arg0: i32) -> (i32, i32) {
    %c0_i32 = arith.constant 0 : i32
    %c0_i32_0 = arith.constant 0 : i32
    %c0_i32_1 = arith.constant 0 : i32
    return %c0_i32, %c0_i32_0 : i32, i32
  }
  func.func @transform_2(%arg0: i32) -> (i32, i32) {
    %c0_i32 = arith.constant 0 : i32
    %c0_i32_0 = arith.constant 0 : i32
    %c0_i32_1 = arith.constant 0 : i32
    return %c0_i32, %c0_i32_0 : i32, i32
  }
  func.func @transform_3(%arg0: i32) -> (i32, i32) {
    %c0_i32 = arith.constant 0 : i32
    %c0_i32_0 = arith.constant 0 : i32
    %c0_i32_1 = arith.constant 0 : i32
    return %c0_i32, %c0_i32_0 : i32, i32
  }
  func.func @transform_4(%arg0: i32) -> (i32, i32) {
    %c0_i32 = arith.constant 0 : i32
    %c0_i32_0 = arith.constant 0 : i32
    %c0_i32_1 = arith.constant 0 : i32
    return %c0_i32, %c0_i32_0 : i32, i32
  }
  func.func @transform_5(%arg0: i32) -> (i32, i32) {
    %c0_i32 = arith.constant 0 : i32
    %c0_i32_0 = arith.constant 0 : i32
    return %arg0, %c0_i32 : i32, i32
  }
}

module attributes {stable_mosaic.version = 11 : i64} {
  func.func @_bottleneck_kernel(%arg0: i32, %arg1: memref<512x12xf32, #tpu.memory_space<vmem>>, %arg2: memref<1x12xf32, #tpu.memory_space<vmem>>, %arg3: memref<1x12xf32, #tpu.memory_space<vmem>>, %arg4: memref<12x128xbf16, #tpu.memory_space<vmem>>, %arg5: memref<1x128xf32, #tpu.memory_space<vmem>>, %arg6: memref<512x128xbf16, #tpu.memory_space<vmem>>) attributes {dimension_semantics = [#tpu.dimension_semantics<parallel>], iteration_bounds = array<i64: 2>, scalar_prefetch = 0 : i64, scratch_operands = 0 : i64, tpu.core_type = #tpu.core_type<tc>, window_params = [{transform_indices = @transform_0, window_bounds = array<i64: 512, 12>}, {pipeline_mode = #tpu.pipeline_mode<synchronous>, transform_indices = @transform_1, window_bounds = array<i64: 1, 12>}, {pipeline_mode = #tpu.pipeline_mode<synchronous>, transform_indices = @transform_2, window_bounds = array<i64: 1, 12>}, {pipeline_mode = #tpu.pipeline_mode<synchronous>, transform_indices = @transform_3, window_bounds = array<i64: 12, 128>}, {pipeline_mode = #tpu.pipeline_mode<synchronous>, transform_indices = @transform_4, window_bounds = array<i64: 1, 128>}, {transform_indices = @transform_5, window_bounds = array<i64: 512, 128>}]} {
    %c0 = arith.constant 0 : index
    %c0_0 = arith.constant 0 : index
    %0 = vector.load %arg1[%c0, %c0_0] : memref<512x12xf32, #tpu.memory_space<vmem>>, vector<512x12xf32>
    %c0_1 = arith.constant 0 : index
    %c0_2 = arith.constant 0 : index
    %1 = vector.load %arg2[%c0_1, %c0_2] : memref<1x12xf32, #tpu.memory_space<vmem>>, vector<1x12xf32>
    %2 = vector.broadcast %1 : vector<1x12xf32> to vector<512x12xf32>
    %3 = arith.mulf %0, %2 : vector<512x12xf32>
    %c0_3 = arith.constant 0 : index
    %c0_4 = arith.constant 0 : index
    %4 = vector.load %arg3[%c0_3, %c0_4] : memref<1x12xf32, #tpu.memory_space<vmem>>, vector<1x12xf32>
    %5 = vector.broadcast %4 : vector<1x12xf32> to vector<512x12xf32>
    %6 = arith.addf %3, %5 : vector<512x12xf32>
    %cst = arith.constant 0.000000e+00 : f32
    %7 = vector.broadcast %cst : f32 to vector<512x12xf32>
    %8 = arith.maximumf %6, %7 : vector<512x12xf32>
    %9 = arith.truncf %8 : vector<512x12xf32> to vector<512x12xbf16>
    %c0_5 = arith.constant 0 : index
    %c0_6 = arith.constant 0 : index
    %10 = vector.load %arg4[%c0_5, %c0_6] : memref<12x128xbf16, #tpu.memory_space<vmem>>, vector<12x128xbf16>
    %cst_7 = arith.constant dense<0.000000e+00> : vector<512x128xf32>
    %11 = tpu.matmul %9, %10, %cst_7 {dimension_numbers = #tpu.dot_dimension_numbers<[1], [0], [0], [1], [0, 0, 1, 1], [], []>} : vector<512x12xbf16>, vector<12x128xbf16>, vector<512x128xf32> -> vector<512x128xf32>
    %c0_8 = arith.constant 0 : index
    %c0_9 = arith.constant 0 : index
    %12 = vector.load %arg5[%c0_8, %c0_9] : memref<1x128xf32, #tpu.memory_space<vmem>>, vector<1x128xf32>
    %13 = vector.broadcast %12 : vector<1x128xf32> to vector<512x128xf32>
    %14 = arith.addf %11, %13 : vector<512x128xf32>
    %cst_10 = arith.constant 0.000000e+00 : f32
    %15 = vector.broadcast %cst_10 : f32 to vector<512x128xf32>
    %16 = arith.maximumf %14, %15 : vector<512x128xf32>
    %17 = arith.truncf %16 : vector<512x128xf32> to vector<512x128xbf16>
    %c0_11 = arith.constant 0 : index
    %c0_12 = arith.constant 0 : index
    %18 = vector.load %arg6[%c0_11, %c0_12] : memref<512x128xbf16, #tpu.memory_space<vmem>>, vector<512x128xbf16>
    tpu.vector_store %arg6[%c0_11, %c0_12], %17 {strides = array<i32>} : memref<512x128xbf16, #tpu.memory_space<vmem>>, vector<512x128xbf16>,
    return
  }
  func.func @transform_0(%arg0: i32) -> (i32, i32) {
    %c0_i32 = arith.constant 0 : i32
    %c0_i32_0 = arith.constant 0 : i32
    return %arg0, %c0_i32 : i32, i32
  }
  func.func @transform_1(%arg0: i32) -> (i32, i32) {
    %c0_i32 = arith.constant 0 : i32
    %c0_i32_0 = arith.constant 0 : i32
    %c0_i32_1 = arith.constant 0 : i32
    return %c0_i32, %c0_i32_0 : i32, i32
  }
  func.func @transform_2(%arg0: i32) -> (i32, i32) {
    %c0_i32 = arith.constant 0 : i32
    %c0_i32_0 = arith.constant 0 : i32
    %c0_i32_1 = arith.constant 0 : i32
    return %c0_i32, %c0_i32_0 : i32, i32
  }
  func.func @transform_3(%arg0: i32) -> (i32, i32) {
    %c0_i32 = arith.constant 0 : i32
    %c0_i32_0 = arith.constant 0 : i32
    %c0_i32_1 = arith.constant 0 : i32
    return %c0_i32, %c0_i32_0 : i32, i32
  }
  func.func @transform_4(%arg0: i32) -> (i32, i32) {
    %c0_i32 = arith.constant 0 : i32
    %c0_i32_0 = arith.constant 0 : i32
    %c0_i32_1 = arith.constant 0 : i32
    return %c0_i32, %c0_i32_0 : i32, i32
  }
  func.func @transform_5(%arg0: i32) -> (i32, i32) {
    %c0_i32 = arith.constant 0 : i32
    %c0_i32_0 = arith.constant 0 : i32
    return %arg0, %c0_i32 : i32, i32
  }
}

</mosaic_0001>

<bundles_post_ra>
// kernel: dense_block3d_forward.6
= control target key start
LH: loop header
LB: loop body
LE: loop exit
PB: predicated region body
PF: predicated region fallthrough
CT: control target
= control target key end

     0   :  { %s1334_s18 = smov 0   ;;  %s1697_s0 = inlined_call_operand.vmem [shape: f32[1024,4], index: 0, kind: input, shape index: {}]   ;;  %s1698_s1 = inlined_call_operand.vmem [shape: f32[1,4], index: 1, kind: input, shape index: {}]   ;;  %s1699_s2 = inlined_call_operand.vmem [shape: f32[1,4], index: 2, kind: input, shape index: {}]   ;;  %s1700_s3 = inlined_call_operand.vmem [shape: bf16[4,128], index: 3, kind: input, shape index: {}]   ;;  %s1701_s4 = inlined_call_operand.vmem [shape: f32[1,128], index: 4, kind: input, shape index: {}]   ;;  %s1702_s5 = inlined_call_operand.vmem [shape: bf16[1024,128], index: 5, kind: output, shape index: {}]  }
   0x1 LB: > { %s1048_s19 = sadd.s32 4294967295, %s1302_s18   ;;  %p1052_p0 = scmp.ge.s32.totalorder %s1302_s18, 1  ;;  %s1302_s18 = sphi %s1334_s18, %s15_s18  }
   0x2   : > { %p188_p1 = scmp.lt.s32.totalorder %s1302_s18, 3 }
   0x4   : > { %p189_p2 = pnand %p1052_p0, %p188_p1 }
   0x5   : > { %s1053_s22 = sshll.u32 (!%p189_p2), %s1048_s19, 6 }
   0x6   : > { %192 = sbr.rel (%p189_p2) target bundleno = 285 (0x11d), region = 40  ;;  %p217_p3 = scmp.lt.s32.totalorder (!%p189_p2), %s1053_s22, 127 }
   0xb   : > { %v525_v0 = vld [vmem:[%s1700_s3] sm:$0x3]  ;;  %vm627_vm0 = vcmask 1041408   ;;  %s1704_s22 = smov (!%p217_p3, %s1053_s22), 127  ;;  %vm530_vm1 = vcmask 31744  }
   0xc   : > { %v629_v1 = vsel %vm627_vm0, %v525_v0, 0  ;;  %v1350_v2 = vld [vmem:[%s1698_s1] ss:$0 sm:$0xff]  ;;  %s1054_s25 = sshll.u32 %s1704_s22, 3  ;;  %s1056_s8 = sshll.u32 %s1704_s22, 2 }
   0xd   : > { %638 = vmatpush.bf16.msra.mxu0 %v629_v1  ;;  %1282 = vmatpush.bf16.msra.mxu1 %v629_v1  ;;  %s1356_s28 = scalar_lea.vmem %s1697_s0, %s1054_s25  ;;  %v1361_v3 = vld [vmem:[%s1699_s2] ss:$0 sm:$0xff]  ;;  %s1600_s11 = scalar_lea.vmem %s1702_s5, %s1056_s8 }
   0xe   : > { %1283 = vmatpush.bf16.msra.mxu2 %v629_v1  ;;  %1284 = vmatpush.bf16.msra.mxu3 %v629_v1  ;;  %v229_v4 = vld [vmem:[%s1356_s28] sm:$0xff]  ;;  %v230_v5 = vld [vmem:[%s1356_s28 + $0x8] sm:$0xff]  ;;  %v231_v30 = vld [vmem:[%s1356_s28 + $0x10] sm:$0xff] }
   0xf   : > { %v245_v6 = vld [vmem:[%s1356_s28 + $0x80] sm:$0xff]  ;;  %v297_v7 = vmul.f32 %v1350_v2, %v229_v4  ;;  %v298_v8 = vmul.f32 %v1350_v2, %v230_v5  ;;  %v246_v9 = vld [vmem:[%s1356_s28 + $0x88] sm:$0xff]  ;;  %v232_v35 = vld [vmem:[%s1356_s28 + $0x18] sm:$0xff]  ;;  %v299_v45 = vmul.f32 %v1350_v2, %v231_v30 }
  0x10   : > { %v313_v10 = vmul.f32 %v1350_v2, %v245_v6  ;;  %v261_v11 = vld [vmem:[%s1356_s28 + $0x100] sm:$0xff]  ;;  %v262_v12 = vld [vmem:[%s1356_s28 + $0x108] sm:$0xff]  ;;  %v314_v13 = vmul.f32 %v1350_v2, %v246_v9  ;;  %v247_v36 = vld [vmem:[%s1356_s28 + $0x90] sm:$0xff]  ;;  %v300_v46 = vmul.f32 %v1350_v2, %v232_v35 }
  0x11   : > { %v329_v14 = vmul.f32 %v1350_v2, %v261_v11  ;;  %v330_v15 = vmul.f32 %v1350_v2, %v262_v12  ;;  %v277_v16 = vld [vmem:[%s1356_s28 + $0x180] sm:$0xff]  ;;  %v278_v17 = vld [vmem:[%s1356_s28 + $0x188] sm:$0xff]  ;;  %v365_v18 = vadd.f32 %v1361_v3, %v297_v7  ;;  %v366_v19 = vadd.f32 %v1361_v3, %v298_v8  ;;  %v248_v37 = vld [vmem:[%s1356_s28 + $0x98] sm:$0xff] }
  0x12   : > { %v381_v20 = vadd.f32 %v1361_v3, %v313_v10  ;;  %v345_v21 = vmul.f32 %v1350_v2, %v277_v16  ;;  %v382_v22 = vadd.f32 %v1361_v3, %v314_v13  ;;  %v346_v25 = vmul.f32 %v1350_v2, %v278_v17  ;;  %v263_v40 = vld [vmem:[%s1356_s28 + $0x110] sm:$0xff]  ;;  %v264_v41 = vld [vmem:[%s1356_s28 + $0x118] sm:$0xff]  ;;  %v233_v13 = vld [vmem:[%s1356_s28 + $0x20] sm:$0xff] }
  0x13   : > { %v397_v23 = vadd.f32 %v1361_v3, %v329_v14  ;;  %v398_v24 = vadd.f32 %v1361_v3, %v330_v15  ;;  %v429_v26 = vmax.f32 %v365_v18, 0.0  ;;  %v430_v27 = vmax.f32 %v366_v19, 0.0  ;;  %v279_v49 = vld [vmem:[%s1356_s28 + $0x190] sm:$0xff]  ;;  %v280_v50 = vld [vmem:[%s1356_s28 + $0x198] sm:$0xff]  ;;  %v234_v14 = vld [vmem:[%s1356_s28 + $0x28] sm:$0xff] }
  0x14   : > { %v445_v28 = vmax.f32 %v381_v20, 0.0  ;;  %v413_v29 = vadd.f32 %v1361_v3, %v345_v21  ;;  %v446_v31 = vmax.f32 %v382_v22, 0.0  ;;  %v414_v34 = vadd.f32 %v1361_v3, %v346_v25  ;;  %v249_v15 = vld [vmem:[%s1356_s28 + $0xa0] sm:$0xff]  ;;  %v250_v16 = vld [vmem:[%s1356_s28 + $0xa8] sm:$0xff] }
  0x15   : > { %v461_v32 = vmax.f32 %v397_v23, 0.0  ;;  %v462_v33 = vmax.f32 %v398_v24, 0.0  ;;  %v493_v38 = vpack.c.bf16 %v430_v27, %v429_v26  ;;  %v315_v47 = vmul.f32 %v1350_v2, %v247_v36  ;;  %v265_v17 = vld [vmem:[%s1356_s28 + $0x120] sm:$0xff]  ;;  %v266_v18 = vld [vmem:[%s1356_s28 + $0x128] sm:$0xff] }
  0x16   : > { %v477_v39 = vmax.f32 %v413_v29, 0.0  ;;  %v501_v42 = vpack.c.bf16 %v446_v31, %v445_v28  ;;  %v478_v44 = vmax.f32 %v414_v34, 0.0  ;;  %v316_v48 = vmul.f32 %v1350_v2, %v248_v37  ;;  %v281_v23 = vld [vmem:[%s1356_s28 + $0x1a0] sm:$0xff]  ;;  %v282_v24 = vld [vmem:[%s1356_s28 + $0x1a8] sm:$0xff] }
  0x17   : > { %v509_v43 = vpack.c.bf16 %v462_v33, %v461_v32  ;;  %1057 = vmatmul.msk.bf16.vlgmr.msra.gmra.mxu0 %vm530_vm1, %v493_v38  ;;  %v331_v52 = vmul.f32 %v1350_v2, %v263_v40  ;;  %v332_v53 = vmul.f32 %v1350_v2, %v264_v41  ;;  %v347_v54 = vmul.f32 %v1350_v2, %v279_v49  ;;  %v235_v49 = vld [vmem:[%s1356_s28 + $0x30] sm:$0xff] }
  0x18   : > { %1065 = vmatmul.msk.bf16.vlgmr.msra.gmra.mxu1 %vm530_vm1, %v501_v42  ;;  %v517_v51 = vpack.c.bf16 %v478_v44, %v477_v39  ;;  %v348_v55 = vmul.f32 %v1350_v2, %v280_v50  ;;  %v367_v56 = vadd.f32 %v1361_v3, %v299_v45  ;;  %v368_v57 = vadd.f32 %v1361_v3, %v300_v46  ;;  %v236_v50 = vld [vmem:[%s1356_s28 + $0x38] sm:$0xff] }
  0x19   : > { %1073 = vmatmul.msk.bf16.vlgmr.msra.gmra.mxu2 %vm530_vm1, %v509_v43  ;;  %v383_v58 = vadd.f32 %v1361_v3, %v315_v47  ;;  %v384_v59 = vadd.f32 %v1361_v3, %v316_v48  ;;  %v399_v60 = vadd.f32 %v1361_v3, %v331_v52  ;;  %v400_v61 = vadd.f32 %v1361_v3, %v332_v53  ;;  %v252_v52 = vld [vmem:[%s1356_s28 + $0xb8] sm:$0xff]  ;;  %v267_v53 = vld [vmem:[%s1356_s28 + $0x130] sm:$0xff] }
  0x1a   : > { %1081 = vmatmul.msk.bf16.vlgmr.msra.gmra.mxu3 %vm530_vm1, %v517_v51  ;;  %v415_v62 = vadd.f32 %v1361_v3, %v347_v54  ;;  %v416_v63 = vadd.f32 %v1361_v3, %v348_v55  ;;  %v431_v0 = vmax.f32 %v367_v56, 0.0  ;;  %v432_v1 = vmax.f32 %v368_v57, 0.0  ;;  %v251_v51 = vld [vmem:[%s1356_s28 + $0xb0] sm:$0xff]  ;;  %v268_v54 = vld [vmem:[%s1356_s28 + $0x138] sm:$0xff] }
  0x1b   : > { %v447_v4 = vmax.f32 %v383_v58, 0.0  ;;  %v448_v5 = vmax.f32 %v384_v59, 0.0  ;;  %v463_v6 = vmax.f32 %v399_v60, 0.0  ;;  %v464_v7 = vmax.f32 %v400_v61, 0.0  ;;  %v283_v59 = vld [vmem:[%s1356_s28 + $0x1b0] sm:$0xff]  ;;  %v284_v60 = vld [vmem:[%s1356_s28 + $0x1b8] sm:$0xff] }
  0x1c   : > { %v479_v8 = vmax.f32 %v415_v62, 0.0  ;;  %v480_v9 = vmax.f32 %v416_v63, 0.0  ;;  %v494_v10 = vpack.c.bf16 %v432_v1, %v431_v0  ;;  %v301_v20 = vmul.f32 %v1350_v2, %v233_v13 }
  0x1d   : > { %v502_v11 = vpack.c.bf16 %v448_v5, %v447_v4  ;;  %v510_v12 = vpack.c.bf16 %v464_v7, %v463_v6  ;;  %v302_v21 = vmul.f32 %v1350_v2, %v234_v14  ;;  %v317_v22 = vmul.f32 %v1350_v2, %v249_v15 }
  0x1e   : > { %v518_v19 = vpack.c.bf16 %v480_v9, %v479_v8  ;;  %v318_v25 = vmul.f32 %v1350_v2, %v250_v16  ;;  %v333_v26 = vmul.f32 %v1350_v2, %v265_v17  ;;  %v334_v27 = vmul.f32 %v1350_v2, %v266_v18 }
  0x1f   : > { %v349_v28 = vmul.f32 %v1350_v2, %v281_v23  ;;  %v350_v29 = vmul.f32 %v1350_v2, %v282_v24  ;;  %v369_v30 = vadd.f32 %v1361_v3, %v301_v20  ;;  %v370_v31 = vadd.f32 %v1361_v3, %v302_v21  ;;  %v237_v23 = vld [vmem:[%s1356_s28 + $0x40] sm:$0xff]  ;;  %v238_v24 = vld [vmem:[%s1356_s28 + $0x48] sm:$0xff] }
  0x20   : > { %v385_v32 = vadd.f32 %v1361_v3, %v317_v22  ;;  %v386_v33 = vadd.f32 %v1361_v3, %v318_v25  ;;  %v401_v34 = vadd.f32 %v1361_v3, %v333_v26  ;;  %v402_v35 = vadd.f32 %v1361_v3, %v334_v27  ;;  %v253_v25 = vld [vmem:[%s1356_s28 + $0xc0] sm:$0xff]  ;;  %v254_v26 = vld [vmem:[%s1356_s28 + $0xc8] sm:$0xff] }
  0x21   : > { %v417_v36 = vadd.f32 %v1361_v3, %v349_v28  ;;  %v418_v37 = vadd.f32 %v1361_v3, %v350_v29  ;;  %v433_v38 = vmax.f32 %v369_v30, 0.0  ;;  %v434_v39 = vmax.f32 %v370_v31, 0.0  ;;  %v269_v27 = vld [vmem:[%s1356_s28 + $0x140] sm:$0xff]  ;;  %v270_v28 = vld [vmem:[%s1356_s28 + $0x148] sm:$0xff] }
  0x22   : > { %v449_v40 = vmax.f32 %v385_v32, 0.0  ;;  %v450_v41 = vmax.f32 %v386_v33, 0.0  ;;  %v465_v42 = vmax.f32 %v401_v34, 0.0  ;;  %v466_v43 = vmax.f32 %v402_v35, 0.0  ;;  %v285_v33 = vld [vmem:[%s1356_s28 + $0x1c0] sm:$0xff]  ;;  %v286_v34 = vld [vmem:[%s1356_s28 + $0x1c8] sm:$0xff] }
  0x23   : > { %v481_v44 = vmax.f32 %v417_v36, 0.0  ;;  %v482_v45 = vmax.f32 %v418_v37, 0.0  ;;  %v495_v46 = vpack.c.bf16 %v434_v39, %v433_v38  ;;  %v303_v56 = vmul.f32 %v1350_v2, %v235_v49 }
  0x24   : > { %v503_v47 = vpack.c.bf16 %v450_v41, %v449_v40  ;;  %v511_v48 = vpack.c.bf16 %v466_v43, %v465_v42  ;;  %v304_v57 = vmul.f32 %v1350_v2, %v236_v50  ;;  %v319_v58 = vmul.f32 %v1350_v2, %v251_v51 }
  0x25   : > { %v519_v55 = vpack.c.bf16 %v482_v45, %v481_v44  ;;  %v320_v61 = vmul.f32 %v1350_v2, %v252_v52  ;;  %v335_v62 = vmul.f32 %v1350_v2, %v267_v53  ;;  %v336_v63 = vmul.f32 %v1350_v2, %v268_v54 }
  0x26   : > { %v351_v0 = vmul.f32 %v1350_v2, %v283_v59  ;;  %v352_v1 = vmul.f32 %v1350_v2, %v284_v60  ;;  %v371_v4 = vadd.f32 %v1361_v3, %v303_v56  ;;  %v372_v5 = vadd.f32 %v1361_v3, %v304_v57  ;;  %v239_v59 = vld [vmem:[%s1356_s28 + $0x50] sm:$0xff]  ;;  %v240_v60 = vld [vmem:[%s1356_s28 + $0x58] sm:$0xff] }
  0x27   : > { %1058 = vmatmul.msk.bf16.gmra.mxu0 %vm530_vm1, %v494_v10  ;;  %v387_v6 = vadd.f32 %v1361_v3, %v319_v58  ;;  %v388_v7 = vadd.f32 %v1361_v3, %v320_v61  ;;  %v403_v8 = vadd.f32 %v1361_v3, %v335_v62  ;;  %v404_v9 = vadd.f32 %v1361_v3, %v336_v63  ;;  %v255_v61 = vld [vmem:[%s1356_s28 + $0xd0] sm:$0xff]  ;;  %v256_v62 = vld [vmem:[%s1356_s28 + $0xd8] sm:$0xff] }
  0x28   : > { %1066 = vmatmul.msk.bf16.gmra.mxu1 %vm530_vm1, %v502_v11  ;;  %v419_v10 = vadd.f32 %v1361_v3, %v351_v0  ;;  %v420_v11 = vadd.f32 %v1361_v3, %v352_v1  ;;  %v436_v13 = vmax.f32 %v372_v5, 0.0  ;;  %v305_v30 = vmul.f32 %v1350_v2, %v237_v23  ;;  %v271_v63 = vld [vmem:[%s1356_s28 + $0x150] sm:$0xff]  ;;  %v272_v0 = vld [vmem:[%s1356_s28 + $0x158] sm:$0xff] }
  0x29   : > { %1074 = vmatmul.msk.bf16.gmra.mxu2 %vm530_vm1, %v510_v12  ;;  %v435_v12 = vmax.f32 %v371_v4, 0.0  ;;  %v451_v14 = vmax.f32 %v387_v6, 0.0  ;;  %v452_v15 = vmax.f32 %v388_v7, 0.0  ;;  %v467_v16 = vmax.f32 %v403_v8, 0.0  ;;  %v287_v7 = vld [vmem:[%s1356_s28 + $0x1d0] sm:$0xff]  ;;  %v288_v8 = vld [vmem:[%s1356_s28 + $0x1d8] sm:$0xff] }
  0x2a   : > { %1082 = vmatmul.msk.bf16.gmra.mxu3 %vm530_vm1, %v518_v19  ;;  %v468_v17 = vmax.f32 %v404_v9, 0.0  ;;  %v483_v18 = vmax.f32 %v419_v10, 0.0  ;;  %v484_v19 = vmax.f32 %v420_v11, 0.0  ;;  %v306_v31 = vmul.f32 %v1350_v2, %v238_v24 }
  0x2b   : > { %v496_v20 = vpack.c.bf16 %v436_v13, %v435_v12  ;;  %v504_v21 = vpack.c.bf16 %v452_v15, %v451_v14  ;;  %v321_v32 = vmul.f32 %v1350_v2, %v253_v25  ;;  %v322_v35 = vmul.f32 %v1350_v2, %v254_v26 }
  0x2c   : > { %v512_v22 = vpack.c.bf16 %v468_v17, %v467_v16  ;;  %v520_v29 = vpack.c.bf16 %v484_v19, %v483_v18  ;;  %v337_v36 = vmul.f32 %v1350_v2, %v269_v27  ;;  %v338_v37 = vmul.f32 %v1350_v2, %v270_v28 }
  0x2d   : > { %v353_v38 = vmul.f32 %v1350_v2, %v285_v33  ;;  %v354_v39 = vmul.f32 %v1350_v2, %v286_v34  ;;  %v373_v40 = vadd.f32 %v1361_v3, %v305_v30  ;;  %v374_v41 = vadd.f32 %v1361_v3, %v306_v31  ;;  %v241_v33 = vld [vmem:[%s1356_s28 + $0x60] sm:$0xff]  ;;  %v242_v34 = vld [vmem:[%s1356_s28 + $0x68] sm:$0xff] }
  0x2e   : > { %v389_v42 = vadd.f32 %v1361_v3, %v321_v32  ;;  %v390_v43 = vadd.f32 %v1361_v3, %v322_v35  ;;  %v405_v44 = vadd.f32 %v1361_v3, %v337_v36  ;;  %v406_v45 = vadd.f32 %v1361_v3, %v338_v37  ;;  %v257_v35 = vld [vmem:[%s1356_s28 + $0xe0] sm:$0xff]  ;;  %v258_v36 = vld [vmem:[%s1356_s28 + $0xe8] sm:$0xff] }
  0x2f   : > { %v438_v49 = vmax.f32 %v374_v41, 0.0  ;;  %v307_v4 = vmul.f32 %v1350_v2, %v239_v59  ;;  %v308_v5 = vmul.f32 %v1350_v2, %v240_v60  ;;  %v323_v6 = vmul.f32 %v1350_v2, %v255_v61  ;;  %v273_v37 = vld [vmem:[%s1356_s28 + $0x160] sm:$0xff] }
  0x30   : > { %v453_v50 = vmax.f32 %v389_v42, 0.0  ;;  %v454_v51 = vmax.f32 %v390_v43, 0.0  ;;  %v469_v52 = vmax.f32 %v405_v44, 0.0  ;;  %v470_v53 = vmax.f32 %v406_v45, 0.0  ;;  %v289_v43 = vld [vmem:[%s1356_s28 + $0x1e0] sm:$0xff]  ;;  %v290_v44 = vld [vmem:[%s1356_s28 + $0x1e8] sm:$0xff] }
  0x31   : > { %v324_v9 = vmul.f32 %v1350_v2, %v256_v62  ;;  %v339_v10 = vmul.f32 %v1350_v2, %v271_v63  ;;  %v340_v11 = vmul.f32 %v1350_v2, %v272_v0  ;;  %v355_v12 = vmul.f32 %v1350_v2, %v287_v7  ;;  %v243_v7 = vld [vmem:[%s1356_s28 + $0x70] sm:$0xff] }
  0x32   : > { %v505_v57 = vpack.c.bf16 %v454_v51, %v453_v50  ;;  %v513_v58 = vpack.c.bf16 %v470_v53, %v469_v52  ;;  %v356_v13 = vmul.f32 %v1350_v2, %v288_v8  ;;  %v375_v14 = vadd.f32 %v1361_v3, %v307_v4  ;;  %v244_v8 = vld [vmem:[%s1356_s28 + $0x78] sm:$0xff] }
  0x33   : > { %v376_v15 = vadd.f32 %v1361_v3, %v308_v5  ;;  %v391_v16 = vadd.f32 %v1361_v3, %v323_v6  ;;  %v392_v17 = vadd.f32 %v1361_v3, %v324_v9  ;;  %v407_v18 = vadd.f32 %v1361_v3, %v339_v10  ;;  %v259_v9 = vld [vmem:[%s1356_s28 + $0xf0] sm:$0xff]  ;;  %v260_v10 = vld [vmem:[%s1356_s28 + $0xf8] sm:$0xff] }
  0x34   : > { %v408_v19 = vadd.f32 %v1361_v3, %v340_v11  ;;  %v310_v41 = vmul.f32 %v1350_v2, %v242_v34  ;;  %v325_v42 = vmul.f32 %v1350_v2, %v257_v35  ;;  %v326_v45 = vmul.f32 %v1350_v2, %v258_v36  ;;  %v275_v11 = vld [vmem:[%s1356_s28 + $0x170] sm:$0xff] }
  0x35   : > { %v440_v23 = vmax.f32 %v376_v15, 0.0  ;;  %v455_v24 = vmax.f32 %v391_v16, 0.0  ;;  %v456_v25 = vmax.f32 %v392_v17, 0.0  ;;  %v471_v26 = vmax.f32 %v407_v18, 0.0  ;;  %v291_v17 = vld [vmem:[%s1356_s28 + $0x1f0] sm:$0xff]  ;;  %v292_v18 = vld [vmem:[%s1356_s28 + $0x1f8] sm:$0xff] }
  0x36   : > { %v472_v27 = vmax.f32 %v408_v19, 0.0  ;;  %v378_v51 = vadd.f32 %v1361_v3, %v310_v41  ;;  %v393_v52 = vadd.f32 %v1361_v3, %v325_v42  ;;  %v394_v53 = vadd.f32 %v1361_v3, %v326_v45 }
  0x37   : > { %1059 = vmatmul.msk.bf16.gmra.mxu0 %vm530_vm1, %v495_v46  ;;  %v421_v46 = vadd.f32 %v1361_v3, %v353_v38  ;;  %v506_v31 = vpack.c.bf16 %v456_v25, %v455_v24  ;;  %v274_v38 = vld [vmem:[%s1356_s28 + $0x168] sm:$0xff]  ;;  %v312_v15 = vmul.f32 %v1350_v2, %v244_v8  ;;  %v327_v16 = vmul.f32 %v1350_v2, %v259_v9 }
  0x38   : > { %1067 = vmatmul.msk.bf16.gmra.mxu1 %vm530_vm1, %v503_v47  ;;  %v422_v47 = vadd.f32 %v1361_v3, %v354_v39  ;;  %v514_v32 = vpack.c.bf16 %v472_v27, %v471_v26  ;;  %v442_v59 = vmax.f32 %v378_v51, 0.0  ;;  %v457_v60 = vmax.f32 %v393_v52, 0.0 }
  0x39   : > { %1075 = vmatmul.msk.bf16.gmra.mxu2 %vm530_vm1, %v511_v48  ;;  %v437_v48 = vmax.f32 %v373_v40, 0.0  ;;  %v485_v54 = vmax.f32 %v421_v46, 0.0  ;;  %v309_v40 = vmul.f32 %v1350_v2, %v241_v33  ;;  %v341_v46 = vmul.f32 %v1350_v2, %v273_v37 }
  0x3a   : > { %1083 = vmatmul.msk.bf16.gmra.mxu3 %vm530_vm1, %v519_v55  ;;  %v486_v55 = vmax.f32 %v422_v47, 0.0  ;;  %v342_v47 = vmul.f32 %v1350_v2, %v274_v38  ;;  %v458_v61 = vmax.f32 %v394_v53, 0.0  ;;  %v328_v19 = vmul.f32 %v1350_v2, %v260_v10 }
  0x3b   : > { %v497_v56 = vpack.c.bf16 %v438_v49, %v437_v48  ;;  %v357_v48 = vmul.f32 %v1350_v2, %v289_v43  ;;  %v358_v49 = vmul.f32 %v1350_v2, %v290_v44  ;;  %v377_v50 = vadd.f32 %v1361_v3, %v309_v40  ;;  %v1590_v44 = vld [vmem:[%s1701_s4] ss:$0 sm:$0xff] }
  0x3c   : > { %v521_v1 = vpack.c.bf16 %v486_v55, %v485_v54  ;;  %v409_v54 = vadd.f32 %v1361_v3, %v341_v46  ;;  %v410_v55 = vadd.f32 %v1361_v3, %v342_v47  ;;  %v507_v5 = vpack.c.bf16 %v458_v61, %v457_v60 }
  0x3d   : > { %v380_v25 = vadd.f32 %v1361_v3, %v312_v15  ;;  %v395_v26 = vadd.f32 %v1361_v3, %v327_v16  ;;  %v396_v27 = vadd.f32 %v1361_v3, %v328_v19 }
  0x3e   : > { %v473_v62 = vmax.f32 %v409_v54, 0.0  ;;  %v474_v63 = vmax.f32 %v410_v55, 0.0 }
  0x3f   : > { %v444_v33 = vmax.f32 %v380_v25, 0.0  ;;  %v459_v34 = vmax.f32 %v395_v26, 0.0 }
  0x40   : > { %v515_v6 = vpack.c.bf16 %v474_v63, %v473_v62 }
  0x47   : > { %1060 = vmatmul.msk.bf16.gmra.mxu0 %vm530_vm1, %v496_v20  ;;  %v423_v20 = vadd.f32 %v1361_v3, %v355_v12  ;;  %v276_v12 = vld [vmem:[%s1356_s28 + $0x178] sm:$0xff] }
  0x48   : > { %1068 = vmatmul.msk.bf16.gmra.mxu1 %vm530_vm1, %v504_v21  ;;  %v424_v21 = vadd.f32 %v1361_v3, %v356_v13 }
  0x49   : > { %1076 = vmatmul.msk.bf16.gmra.mxu2 %vm530_vm1, %v512_v22  ;;  %v439_v22 = vmax.f32 %v375_v14, 0.0  ;;  %v487_v28 = vmax.f32 %v423_v20, 0.0  ;;  %v311_v14 = vmul.f32 %v1350_v2, %v243_v7  ;;  %v343_v20 = vmul.f32 %v1350_v2, %v275_v11 }
  0x4a   : > { %1084 = vmatmul.msk.bf16.gmra.mxu3 %vm530_vm1, %v520_v29  ;;  %v488_v29 = vmax.f32 %v424_v21, 0.0  ;;  %v344_v21 = vmul.f32 %v1350_v2, %v276_v12 }
  0x4b   : > { %v498_v30 = vpack.c.bf16 %v440_v23, %v439_v22  ;;  %v359_v22 = vmul.f32 %v1350_v2, %v291_v17  ;;  %v360_v23 = vmul.f32 %v1350_v2, %v292_v18  ;;  %v379_v24 = vadd.f32 %v1361_v3, %v311_v14 }
  0x4c   : > { %v522_v39 = vpack.c.bf16 %v488_v29, %v487_v28  ;;  %v411_v28 = vadd.f32 %v1361_v3, %v343_v20  ;;  %v412_v29 = vadd.f32 %v1361_v3, %v344_v21  ;;  %v460_v2 = vmax.f32 %v396_v27, 0.0 }
  0x4e   : > { %v475_v35 = vmax.f32 %v411_v28, 0.0  ;;  %v476_v36 = vmax.f32 %v412_v29, 0.0  ;;  %v508_v40 = vpack.c.bf16 %v460_v2, %v459_v34 }
  0x50   : > { %v516_v41 = vpack.c.bf16 %v476_v36, %v475_v35 }
  0x57   : > { %1061 = vmatmul.msk.bf16.gmra.mxu0 %vm530_vm1, %v497_v56  ;;  %v425_v56 = vadd.f32 %v1361_v3, %v357_v48 }
  0x58   : > { %1069 = vmatmul.msk.bf16.gmra.mxu1 %vm530_vm1, %v505_v57  ;;  %v426_v57 = vadd.f32 %v1361_v3, %v358_v49 }
  0x59   : > { %1077 = vmatmul.msk.bf16.gmra.mxu2 %vm530_vm1, %v513_v58  ;;  %v441_v58 = vmax.f32 %v377_v50, 0.0  ;;  %v489_v0 = vmax.f32 %v425_v56, 0.0 }
  0x5a   : > { %1085 = vmatmul.msk.bf16.gmra.mxu3 %vm530_vm1, %v521_v1  ;;  %v490_v1 = vmax.f32 %v426_v57, 0.0 }
  0x5b   : > { %v499_v4 = vpack.c.bf16 %v442_v59, %v441_v58 }
  0x5c   : > { %v523_v13 = vpack.c.bf16 %v490_v1, %v489_v0 }
  0x67   : > { %1062 = vmatmul.msk.bf16.gmra.mxu0 %vm530_vm1, %v498_v30  ;;  %v427_v30 = vadd.f32 %v1361_v3, %v359_v22 }
  0x68   : > { %1070 = vmatmul.msk.bf16.gmra.mxu1 %vm530_vm1, %v506_v31  ;;  %v428_v31 = vadd.f32 %v1361_v3, %v360_v23 }
  0x69   : > { %1078 = vmatmul.msk.bf16.gmra.mxu2 %vm530_vm1, %v514_v32  ;;  %v443_v32 = vmax.f32 %v379_v24, 0.0  ;;  %v491_v37 = vmax.f32 %v427_v30, 0.0 }
  0x6a   : > { %1086 = vmatmul.msk.bf16.gmra.mxu3 %vm530_vm1, %v522_v39  ;;  %v492_v38 = vmax.f32 %v428_v31, 0.0 }
  0x6b   : > { %v500_v39 = vpack.c.bf16 %v444_v33, %v443_v32 }
  0x6c   : > { %v524_v42 = vpack.c.bf16 %v492_v38, %v491_v37 }
  0x77   : > { %1063 = vmatmul.msk.bf16.gmra.mxu0 %vm530_vm1, %v499_v4 }
  0x78   : > { %1071 = vmatmul.msk.bf16.gmra.mxu1 %vm530_vm1, %v507_v5 }
  0x79   : > { %1079 = vmatmul.msk.bf16.gmra.mxu2 %vm530_vm1, %v515_v6 }
  0x7a   : > { %1087 = vmatmul.msk.bf16.gmra.mxu3 %vm530_vm1, %v523_v13 }
  0x87   : > { %1064 = vmatmul.msk.bf16.gmra.mxu0 %vm530_vm1, %v500_v39 }
  0x88   : > { %1072 = vmatmul.msk.bf16.gmra.mxu1 %vm530_vm1, %v508_v40 }
  0x89   : > { %1080 = vmatmul.msk.bf16.gmra.mxu2 %vm530_vm1, %v516_v41 }
  0x8a   : > { %1088 = vmatmul.msk.bf16.gmra.mxu3 %vm530_vm1, %v524_v42 }
  0x94   : > { %v640_v3 = vpop.f32.mrf.mxu0 }
  0x95   : > { %v680_v43 = vpop.f32.mrf.mxu1  ;;  %v641_v45 = vadd.f32 %v1590_v44, %v640_v3 }
  0x96   : > { %v681_v47 = vadd.f32 %v1590_v44, %v680_v43 }
  0x97   : > { %v800_v53 = vmax.f32 %v641_v45, 0.0 }
  0x98   : > { %v816_v55 = vmax.f32 %v681_v47, 0.0 }
  0x9c   : > { %v720_v46 = vpop.f32.mrf.mxu2  ;;  %v642_v48 = vpop.f32.mrf.mxu0 }
  0x9d   : > { %v760_v49 = vpop.f32.mrf.mxu3  ;;  %v643_v50 = vadd.f32 %v1590_v44, %v642_v48  ;;  %v682_v51 = vpop.f32.mrf.mxu1  ;;  %v721_v58 = vadd.f32 %v1590_v44, %v720_v46 }
  0x9e   : > { %v683_v52 = vadd.f32 %v1590_v44, %v682_v51  ;;  %v761_v61 = vadd.f32 %v1590_v44, %v760_v49 }
  0x9f   : > { %v801_v54 = vmax.f32 %v643_v50, 0.0  ;;  %v832_v4 = vmax.f32 %v721_v58, 0.0 }
  0xa0   : > { %v817_v56 = vmax.f32 %v683_v52, 0.0  ;;  %v848_v7 = vmax.f32 %v761_v61, 0.0 }
  0xa1   : > { %v1094_v57 = vpack.c.bf16 %v801_v54, %v800_v53 }
  0xa2   : > { %v1134_v59 = vpack.c.bf16 %v817_v56, %v816_v55 }
  0xa3   : > { %1095 = vst [vmem:[%s1600_s11] sm:$0xff] %v1094_v57  }
  0xa4   : > { %v722_v60 = vpop.f32.mrf.mxu2  ;;  %1258 = vst [vmem:[%s1600_s11 + $0x40] sm:$0xff] %v1134_v59   ;;  %v645_v63 = vpop.f32.mrf.mxu0 }
  0xa5   : > { %v723_v62 = vadd.f32 %v1590_v44, %v722_v60  ;;  %v762_v0 = vpop.f32.mrf.mxu3  ;;  %v685_v1 = vpop.f32.mrf.mxu1  ;;  %v646_v11 = vadd.f32 %v1590_v44, %v645_v63 }
  0xa6   : > { %v763_v6 = vadd.f32 %v1590_v44, %v762_v0  ;;  %v686_v13 = vadd.f32 %v1590_v44, %v685_v1 }
  0xa7   : > { %v833_v5 = vmax.f32 %v723_v62, 0.0  ;;  %v802_v19 = vmax.f32 %v646_v11, 0.0 }
  0xa8   : > { %v849_v9 = vmax.f32 %v763_v6, 0.0  ;;  %v818_v21 = vmax.f32 %v686_v13, 0.0 }
  0xa9   : > { %v1174_v8 = vpack.c.bf16 %v833_v5, %v832_v4 }
  0xaa   : > { %v1214_v10 = vpack.c.bf16 %v849_v9, %v848_v7 }
  0xab   : > { %1266 = vst [vmem:[%s1600_s11 + $0x80] sm:$0xff] %v1174_v8  }
  0xac   : > { %v725_v12 = vpop.f32.mrf.mxu2  ;;  %1274 = vst [vmem:[%s1600_s11 + $0xc0] sm:$0xff] %v1214_v10   ;;  %v647_v14 = vpop.f32.mrf.mxu0 }
  0xad   : > { %v765_v15 = vpop.f32.mrf.mxu3  ;;  %v648_v16 = vadd.f32 %v1590_v44, %v647_v14  ;;  %v687_v17 = vpop.f32.mrf.mxu1  ;;  %v726_v24 = vadd.f32 %v1590_v44, %v725_v12 }
  0xae   : > { %v688_v18 = vadd.f32 %v1590_v44, %v687_v17  ;;  %v766_v27 = vadd.f32 %v1590_v44, %v765_v15 }
  0xaf   : > { %v803_v20 = vmax.f32 %v648_v16, 0.0  ;;  %v834_v32 = vmax.f32 %v726_v24, 0.0 }
  0xb0   : > { %v819_v22 = vmax.f32 %v688_v18, 0.0  ;;  %v850_v2 = vmax.f32 %v766_v27, 0.0 }
  0xb1   : > { %v1099_v23 = vpack.c.bf16 %v803_v20, %v802_v19 }
  0xb2   : > { %v1139_v25 = vpack.c.bf16 %v819_v22, %v818_v21 }
  0xb3   : > { %1251 = vst [vmem:[%s1600_s11 + $0x8] sm:$0xff] %v1099_v23  }
  0xb4   : > { %v727_v26 = vpop.f32.mrf.mxu2  ;;  %1259 = vst [vmem:[%s1600_s11 + $0x48] sm:$0xff] %v1139_v25   ;;  %v650_v29 = vpop.f32.mrf.mxu0 }
  0xb5   : > { %v728_v28 = vadd.f32 %v1590_v44, %v727_v26  ;;  %v767_v30 = vpop.f32.mrf.mxu3  ;;  %v690_v31 = vpop.f32.mrf.mxu1  ;;  %v651_v38 = vadd.f32 %v1590_v44, %v650_v29 }
  0xb6   : > { %v768_v34 = vadd.f32 %v1590_v44, %v767_v30  ;;  %v691_v40 = vadd.f32 %v1590_v44, %v690_v31 }
  0xb7   : > { %v835_v33 = vmax.f32 %v728_v28, 0.0  ;;  %v804_v46 = vmax.f32 %v651_v38, 0.0 }
  0xb8   : > { %v851_v36 = vmax.f32 %v768_v34, 0.0  ;;  %v820_v48 = vmax.f32 %v691_v40, 0.0 }
  0xb9   : > { %v1179_v35 = vpack.c.bf16 %v835_v33, %v834_v32 }
  0xba   : > { %v1219_v37 = vpack.c.bf16 %v851_v36, %v850_v2 }
  0xbb   : > { %1267 = vst [vmem:[%s1600_s11 + $0x88] sm:$0xff] %v1179_v35  }
  0xbc   : > { %v730_v39 = vpop.f32.mrf.mxu2  ;;  %1275 = vst [vmem:[%s1600_s11 + $0xc8] sm:$0xff] %v1219_v37   ;;  %v652_v41 = vpop.f32.mrf.mxu0 }
  0xbd   : > { %v770_v42 = vpop.f32.mrf.mxu3  ;;  %v653_v3 = vadd.f32 %v1590_v44, %v652_v41  ;;  %v692_v43 = vpop.f32.mrf.mxu1  ;;  %v731_v51 = vadd.f32 %v1590_v44, %v730_v39 }
  0xbe   : > { %v693_v45 = vadd.f32 %v1590_v44, %v692_v43  ;;  %v771_v54 = vadd.f32 %v1590_v44, %v770_v42 }
  0xbf   : > { %v805_v47 = vmax.f32 %v653_v3, 0.0  ;;  %v836_v59 = vmax.f32 %v731_v51, 0.0 }
  0xc0   : > { %v821_v49 = vmax.f32 %v693_v45, 0.0  ;;  %v852_v62 = vmax.f32 %v771_v54, 0.0 }
  0xc1   : > { %v1104_v50 = vpack.c.bf16 %v805_v47, %v804_v46 }
  0xc2   : > { %v1144_v52 = vpack.c.bf16 %v821_v49, %v820_v48 }
  0xc3   : > { %1252 = vst [vmem:[%s1600_s11 + $0x10] sm:$0xff] %v1104_v50  }
  0xc4   : > { %v732_v53 = vpop.f32.mrf.mxu2  ;;  %1260 = vst [vmem:[%s1600_s11 + $0x50] sm:$0xff] %v1144_v52   ;;  %v655_v56 = vpop.f32.mrf.mxu0 }
  0xc5   : > { %v733_v55 = vadd.f32 %v1590_v44, %v732_v53  ;;  %v772_v57 = vpop.f32.mrf.mxu3  ;;  %v695_v58 = vpop.f32.mrf.mxu1  ;;  %v656_v4 = vadd.f32 %v1590_v44, %v655_v56 }
  0xc6   : > { %v773_v61 = vadd.f32 %v1590_v44, %v772_v57  ;;  %v696_v6 = vadd.f32 %v1590_v44, %v695_v58 }
  0xc7   : > { %v837_v60 = vmax.f32 %v733_v55, 0.0  ;;  %v806_v12 = vmax.f32 %v656_v4, 0.0 }
  0xc8   : > { %v853_v0 = vmax.f32 %v773_v61, 0.0  ;;  %v822_v14 = vmax.f32 %v696_v6, 0.0 }
  0xc9   : > { %v1184_v63 = vpack.c.bf16 %v837_v60, %v836_v59 }
  0xca   : > { %v1224_v1 = vpack.c.bf16 %v853_v0, %v852_v62 }
  0xcb   : > { %1268 = vst [vmem:[%s1600_s11 + $0x90] sm:$0xff] %v1184_v63  }
  0xcc   : > { %v735_v5 = vpop.f32.mrf.mxu2  ;;  %1276 = vst [vmem:[%s1600_s11 + $0xd0] sm:$0xff] %v1224_v1   ;;  %v657_v7 = vpop.f32.mrf.mxu0 }
  0xcd   : > { %v775_v8 = vpop.f32.mrf.mxu3  ;;  %v658_v9 = vadd.f32 %v1590_v44, %v657_v7  ;;  %v697_v10 = vpop.f32.mrf.mxu1  ;;  %v736_v17 = vadd.f32 %v1590_v44, %v735_v5 }
  0xce   : > { %v698_v11 = vadd.f32 %v1590_v44, %v697_v10  ;;  %v776_v20 = vadd.f32 %v1590_v44, %v775_v8 }
  0xcf   : > { %v807_v13 = vmax.f32 %v658_v9, 0.0  ;;  %v838_v25 = vmax.f32 %v736_v17, 0.0 }
  0xd0   : > { %v823_v15 = vmax.f32 %v698_v11, 0.0  ;;  %v854_v28 = vmax.f32 %v776_v20, 0.0 }
  0xd1   : > { %v1109_v16 = vpack.c.bf16 %v807_v13, %v806_v12 }
  0xd2   : > { %v1149_v18 = vpack.c.bf16 %v823_v15, %v822_v14 }
  0xd3   : > { %1253 = vst [vmem:[%s1600_s11 + $0x18] sm:$0xff] %v1109_v16  }
  0xd4   : > { %v737_v19 = vpop.f32.mrf.mxu2  ;;  %1261 = vst [vmem:[%s1600_s11 + $0x58] sm:$0xff] %v1149_v18   ;;  %v660_v22 = vpop.f32.mrf.mxu0 }
  0xd5   : > { %v738_v21 = vadd.f32 %v1590_v44, %v737_v19  ;;  %v777_v23 = vpop.f32.mrf.mxu3  ;;  %v700_v24 = vpop.f32.mrf.mxu1  ;;  %v661_v32 = vadd.f32 %v1590_v44, %v660_v22 }
  0xd6   : > { %v778_v27 = vadd.f32 %v1590_v44, %v777_v23  ;;  %v701_v34 = vadd.f32 %v1590_v44, %v700_v24 }
  0xd7   : > { %v839_v26 = vmax.f32 %v738_v21, 0.0  ;;  %v808_v39 = vmax.f32 %v661_v32, 0.0 }
  0xd8   : > { %v855_v30 = vmax.f32 %v778_v27, 0.0  ;;  %v824_v41 = vmax.f32 %v701_v34, 0.0 }
  0xd9   : > { %v1189_v29 = vpack.c.bf16 %v839_v26, %v838_v25 }
  0xda   : > { %v1229_v31 = vpack.c.bf16 %v855_v30, %v854_v28 }
  0xdb   : > { %1269 = vst [vmem:[%s1600_s11 + $0x98] sm:$0xff] %v1189_v29  }
  0xdc   : > { %v740_v33 = vpop.f32.mrf.mxu2  ;;  %1277 = vst [vmem:[%s1600_s11 + $0xd8] sm:$0xff] %v1229_v31   ;;  %v662_v2 = vpop.f32.mrf.mxu0 }
  0xdd   : > { %v780_v35 = vpop.f32.mrf.mxu3  ;;  %v663_v36 = vadd.f32 %v1590_v44, %v662_v2  ;;  %v702_v37 = vpop.f32.mrf.mxu1  ;;  %v741_v43 = vadd.f32 %v1590_v44, %v740_v33 }
  0xde   : > { %v703_v38 = vadd.f32 %v1590_v44, %v702_v37  ;;  %v781_v47 = vadd.f32 %v1590_v44, %v780_v35 }
  0xdf   : > { %v809_v40 = vmax.f32 %v663_v36, 0.0  ;;  %v840_v52 = vmax.f32 %v741_v43, 0.0 }
  0xe0   : > { %v825_v42 = vmax.f32 %v703_v38, 0.0  ;;  %v856_v55 = vmax.f32 %v781_v47, 0.0 }
  0xe1   : > { %v1114_v3 = vpack.c.bf16 %v809_v40, %v808_v39 }
  0xe2   : > { %v1154_v45 = vpack.c.bf16 %v825_v42, %v824_v41 }
  0xe3   : > { %1254 = vst [vmem:[%s1600_s11 + $0x20] sm:$0xff] %v1114_v3  }
  0xe4   : > { %v742_v46 = vpop.f32.mrf.mxu2  ;;  %1262 = vst [vmem:[%s1600_s11 + $0x60] sm:$0xff] %v1154_v45   ;;  %v665_v49 = vpop.f32.mrf.mxu0 }
  0xe5   : > { %v743_v48 = vadd.f32 %v1590_v44, %v742_v46  ;;  %v782_v50 = vpop.f32.mrf.mxu3  ;;  %v705_v51 = vpop.f32.mrf.mxu1  ;;  %v666_v59 = vadd.f32 %v1590_v44, %v665_v49 }
  0xe6   : > { %v783_v54 = vadd.f32 %v1590_v44, %v782_v50  ;;  %v706_v61 = vadd.f32 %v1590_v44, %v705_v51 }
  0xe7   : > { %v841_v53 = vmax.f32 %v743_v48, 0.0  ;;  %v810_v5 = vmax.f32 %v666_v59, 0.0 }
  0xe8   : > { %v857_v57 = vmax.f32 %v783_v54, 0.0  ;;  %v826_v7 = vmax.f32 %v706_v61, 0.0 }
  0xe9   : > { %v1194_v56 = vpack.c.bf16 %v841_v53, %v840_v52 }
  0xea   : > { %v1234_v58 = vpack.c.bf16 %v857_v57, %v856_v55 }
  0xeb   : > { %1270 = vst [vmem:[%s1600_s11 + $0xa0] sm:$0xff] %v1194_v56  }
  0xec   : > { %v745_v60 = vpop.f32.mrf.mxu2  ;;  %1278 = vst [vmem:[%s1600_s11 + $0xe0] sm:$0xff] %v1234_v58   ;;  %v667_v62 = vpop.f32.mrf.mxu0 }
  0xed   : > { %v785_v63 = vpop.f32.mrf.mxu3  ;;  %v668_v0 = vadd.f32 %v1590_v44, %v667_v62  ;;  %v707_v1 = vpop.f32.mrf.mxu1  ;;  %v746_v10 = vadd.f32 %v1590_v44, %v745_v60 }
  0xee   : > { %v708_v4 = vadd.f32 %v1590_v44, %v707_v1  ;;  %v786_v13 = vadd.f32 %v1590_v44, %v785_v63 }
  0xef   : > { %v811_v6 = vmax.f32 %v668_v0, 0.0  ;;  %v842_v18 = vmax.f32 %v746_v10, 0.0 }
  0xf0   : > { %v827_v8 = vmax.f32 %v708_v4, 0.0  ;;  %v858_v21 = vmax.f32 %v786_v13, 0.0 }
  0xf1   : > { %v1119_v9 = vpack.c.bf16 %v811_v6, %v810_v5 }
  0xf2   : > { %v1159_v11 = vpack.c.bf16 %v827_v8, %v826_v7 }
  0xf3   : > { %1255 = vst [vmem:[%s1600_s11 + $0x28] sm:$0xff] %v1119_v9  }
  0xf4   : > { %v747_v12 = vpop.f32.mrf.mxu2  ;;  %1263 = vst [vmem:[%s1600_s11 + $0x68] sm:$0xff] %v1159_v11   ;;  %v670_v15 = vpop.f32.mrf.mxu0 }
  0xf5   : > { %v748_v14 = vadd.f32 %v1590_v44, %v747_v12  ;;  %v787_v16 = vpop.f32.mrf.mxu3  ;;  %v710_v17 = vpop.f32.mrf.mxu1  ;;  %v671_v25 = vadd.f32 %v1590_v44, %v670_v15 }
  0xf6   : > { %v788_v20 = vadd.f32 %v1590_v44, %v787_v16  ;;  %v711_v27 = vadd.f32 %v1590_v44, %v710_v17 }
  0xf7   : > { %v843_v19 = vmax.f32 %v748_v14, 0.0  ;;  %v812_v33 = vmax.f32 %v671_v25, 0.0 }
  0xf8   : > { %v859_v23 = vmax.f32 %v788_v20, 0.0  ;;  %v828_v2 = vmax.f32 %v711_v27, 0.0 }
  0xf9   : > { %v1199_v22 = vpack.c.bf16 %v843_v19, %v842_v18 }
  0xfa   : > { %v1239_v24 = vpack.c.bf16 %v859_v23, %v858_v21 }
  0xfb   : > { %1271 = vst [vmem:[%s1600_s11 + $0xa8] sm:$0xff] %v1199_v22  }
  0xfc   : > { %v750_v26 = vpop.f32.mrf.mxu2  ;;  %1279 = vst [vmem:[%s1600_s11 + $0xe8] sm:$0xff] %v1239_v24   ;;  %v672_v28 = vpop.f32.mrf.mxu0 }
  0xfd   : > { %v790_v29 = vpop.f32.mrf.mxu3  ;;  %v673_v30 = vadd.f32 %v1590_v44, %v672_v28  ;;  %v712_v31 = vpop.f32.mrf.mxu1  ;;  %v751_v37 = vadd.f32 %v1590_v44, %v750_v26 }
  0xfe   : > { %v713_v32 = vadd.f32 %v1590_v44, %v712_v31  ;;  %v791_v40 = vadd.f32 %v1590_v44, %v790_v29 }
  0xff   : > { %v813_v34 = vmax.f32 %v673_v30, 0.0  ;;  %v844_v45 = vmax.f32 %v751_v37, 0.0 }
 0x100   : > { %v829_v35 = vmax.f32 %v713_v32, 0.0  ;;  %v860_v48 = vmax.f32 %v791_v40, 0.0 }
 0x101   : > { %v1124_v36 = vpack.c.bf16 %v813_v34, %v812_v33 }
 0x102   : > { %v1164_v38 = vpack.c.bf16 %v829_v35, %v828_v2 }
 0x103   : > { %1256 = vst [vmem:[%s1600_s11 + $0x30] sm:$0xff] %v1124_v36  }
 0x104   : > { %v752_v39 = vpop.f32.mrf.mxu2  ;;  %1264 = vst [vmem:[%s1600_s11 + $0x70] sm:$0xff] %v1164_v38   ;;  %v675_v42 = vpop.f32.mrf.mxu0 }
 0x105   : > { %v753_v41 = vadd.f32 %v1590_v44, %v752_v39  ;;  %v792_v3 = vpop.f32.mrf.mxu3  ;;  %v715_v43 = vpop.f32.mrf.mxu1  ;;  %v676_v52 = vadd.f32 %v1590_v44, %v675_v42 }
 0x106   : > { %v793_v47 = vadd.f32 %v1590_v44, %v792_v3  ;;  %v716_v54 = vadd.f32 %v1590_v44, %v715_v43 }
 0x107   : > { %v845_v46 = vmax.f32 %v753_v41, 0.0  ;;  %v814_v60 = vmax.f32 %v676_v52, 0.0 }
 0x108   : > { %v861_v50 = vmax.f32 %v793_v47, 0.0  ;;  %v830_v62 = vmax.f32 %v716_v54, 0.0 }
 0x109   : > { %v1204_v49 = vpack.c.bf16 %v845_v46, %v844_v45 }
 0x10a   : > { %v1244_v51 = vpack.c.bf16 %v861_v50, %v860_v48 }
 0x10b   : > { %1272 = vst [vmem:[%s1600_s11 + $0xb0] sm:$0xff] %v1204_v49  }
 0x10c   : > { %v755_v53 = vpop.f32.mrf.mxu2  ;;  %1280 = vst [vmem:[%s1600_s11 + $0xf0] sm:$0xff] %v1244_v51   ;;  %v677_v55 = vpop.f32.mrf.mxu0 }
 0x10d   : > { %v795_v56 = vpop.f32.mrf.mxu3  ;;  %v678_v57 = vadd.f32 %v1590_v44, %v677_v55  ;;  %v717_v58 = vpop.f32.mrf.mxu1  ;;  %v756_v1 = vadd.f32 %v1590_v44, %v755_v53 }
 0x10e   : > { %v718_v59 = vadd.f32 %v1590_v44, %v717_v58  ;;  %v796_v6 = vadd.f32 %v1590_v44, %v795_v56 }
 0x10f   : > { %v815_v61 = vmax.f32 %v678_v57, 0.0  ;;  %v846_v9 = vmax.f32 %v756_v1, 0.0 }
 0x110   : > { %v831_v63 = vmax.f32 %v718_v59, 0.0  ;;  %v862_v12 = vmax.f32 %v796_v6, 0.0 }
 0x111   : > { %v1129_v0 = vpack.c.bf16 %v815_v61, %v814_v60 }
 0x112   : > { %v1169_v4 = vpack.c.bf16 %v831_v63, %v830_v62 }
 0x113   : > { %1257 = vst [vmem:[%s1600_s11 + $0x38] sm:$0xff] %v1129_v0  }
 0x114   : > { %v757_v5 = vpop.f32.mrf.mxu2  ;;  %1265 = vst [vmem:[%s1600_s11 + $0x78] sm:$0xff] %v1169_v4  }
 0x115   : > { %v758_v7 = vadd.f32 %v1590_v44, %v757_v5  ;;  %v797_v8 = vpop.f32.mrf.mxu3 }
 0x116   : > { %v798_v11 = vadd.f32 %v1590_v44, %v797_v8 }
 0x117   : > { %v847_v10 = vmax.f32 %v758_v7, 0.0 }
 0x118   : > { %v863_v14 = vmax.f32 %v798_v11, 0.0 }
 0x119   : > { %v1209_v13 = vpack.c.bf16 %v847_v10, %v846_v9 }
 0x11a   : > { %v1249_v15 = vpack.c.bf16 %v863_v14, %v862_v12 }
 0x11b   : > { %1273 = vst [vmem:[%s1600_s11 + $0xb8] sm:$0xff] %v1209_v13  }
 0x11c   : > { %1281 = vst [vmem:[%s1600_s11 + $0xf8] sm:$0xff] %v1249_v15  }
 0x11d PF: > { %s15_s18 = sadd.s32 1, %s1302_s18  }
 0x11e   : > { %p12_p4 = scmp.ge.s32.totalorder %s15_s18, 4  }
 0x120   :  { %14 = sbr.rel (!%p12_p4) target bundleno = 1 (0x1), region = 70 }

// kernel: dense_block3d_forward.8
= control target key start
LH: loop header
LB: loop body
LE: loop exit
PB: predicated region body
PF: predicated region fallthrough
CT: control target
= control target key end

     0   :  { %s1334_s18 = smov 0   ;;  %s1697_s0 = inlined_call_operand.vmem [shape: f32[1024,8], index: 0, kind: input, shape index: {}]   ;;  %s1698_s1 = inlined_call_operand.vmem [shape: f32[1,8], index: 1, kind: input, shape index: {}]   ;;  %s1699_s2 = inlined_call_operand.vmem [shape: f32[1,8], index: 2, kind: input, shape index: {}]   ;;  %s1700_s3 = inlined_call_operand.vmem [shape: bf16[8,128], index: 3, kind: input, shape index: {}]   ;;  %s1701_s4 = inlined_call_operand.vmem [shape: f32[1,128], index: 4, kind: input, shape index: {}]   ;;  %s1702_s5 = inlined_call_operand.vmem [shape: bf16[1024,128], index: 5, kind: output, shape index: {}]  }
   0x1 LB: > { %s1048_s19 = sadd.s32 4294967295, %s1302_s18   ;;  %p1052_p0 = scmp.ge.s32.totalorder %s1302_s18, 1  ;;  %s1302_s18 = sphi %s1334_s18, %s15_s18  }
   0x2   : > { %p188_p1 = scmp.lt.s32.totalorder %s1302_s18, 3 }
   0x4   : > { %p189_p2 = pnand %p1052_p0, %p188_p1 }
   0x5   : > { %s1053_s22 = sshll.u32 (!%p189_p2), %s1048_s19, 6 }
   0x6   : > { %192 = sbr.rel (%p189_p2) target bundleno = 285 (0x11d), region = 40  ;;  %p217_p3 = scmp.lt.s32.totalorder (!%p189_p2), %s1053_s22, 127 }
   0xb   : > { %v525_v0 = vld [vmem:[%s1700_s3] sm:$0xf]  ;;  %vm627_vm0 = vcmask 1043456   ;;  %s1704_s22 = smov (!%p217_p3, %s1053_s22), 127  ;;  %vm530_vm1 = vcmask 64512  }
   0xc   : > { %v629_v1 = vsel %vm627_vm0, %v525_v0, 0  ;;  %v1350_v2 = vld [vmem:[%s1698_s1] ss:$0 sm:$0xff]  ;;  %s1054_s25 = sshll.u32 %s1704_s22, 3  ;;  %s1056_s8 = sshll.u32 %s1704_s22, 2 }
   0xd   : > { %638 = vmatpush.bf16.msra.mxu0 %v629_v1  ;;  %1282 = vmatpush.bf16.msra.mxu1 %v629_v1  ;;  %s1356_s28 = scalar_lea.vmem %s1697_s0, %s1054_s25  ;;  %v1361_v3 = vld [vmem:[%s1699_s2] ss:$0 sm:$0xff]  ;;  %s1600_s11 = scalar_lea.vmem %s1702_s5, %s1056_s8 }
   0xe   : > { %1283 = vmatpush.bf16.msra.mxu2 %v629_v1  ;;  %1284 = vmatpush.bf16.msra.mxu3 %v629_v1  ;;  %v229_v4 = vld [vmem:[%s1356_s28] sm:$0xff]  ;;  %v230_v5 = vld [vmem:[%s1356_s28 + $0x8] sm:$0xff]  ;;  %v231_v30 = vld [vmem:[%s1356_s28 + $0x10] sm:$0xff] }
   0xf   : > { %v245_v6 = vld [vmem:[%s1356_s28 + $0x80] sm:$0xff]  ;;  %v297_v7 = vmul.f32 %v1350_v2, %v229_v4  ;;  %v298_v8 = vmul.f32 %v1350_v2, %v230_v5  ;;  %v246_v9 = vld [vmem:[%s1356_s28 + $0x88] sm:$0xff]  ;;  %v232_v35 = vld [vmem:[%s1356_s28 + $0x18] sm:$0xff]  ;;  %v299_v45 = vmul.f32 %v1350_v2, %v231_v30 }
  0x10   : > { %v313_v10 = vmul.f32 %v1350_v2, %v245_v6  ;;  %v261_v11 = vld [vmem:[%s1356_s28 + $0x100] sm:$0xff]  ;;  %v262_v12 = vld [vmem:[%s1356_s28 + $0x108] sm:$0xff]  ;;  %v314_v13 = vmul.f32 %v1350_v2, %v246_v9  ;;  %v247_v36 = vld [vmem:[%s1356_s28 + $0x90] sm:$0xff]  ;;  %v300_v46 = vmul.f32 %v1350_v2, %v232_v35 }
  0x11   : > { %v329_v14 = vmul.f32 %v1350_v2, %v261_v11  ;;  %v330_v15 = vmul.f32 %v1350_v2, %v262_v12  ;;  %v277_v16 = vld [vmem:[%s1356_s28 + $0x180] sm:$0xff]  ;;  %v278_v17 = vld [vmem:[%s1356_s28 + $0x188] sm:$0xff]  ;;  %v365_v18 = vadd.f32 %v1361_v3, %v297_v7  ;;  %v366_v19 = vadd.f32 %v1361_v3, %v298_v8  ;;  %v248_v37 = vld [vmem:[%s1356_s28 + $0x98] sm:$0xff] }
  0x12   : > { %v381_v20 = vadd.f32 %v1361_v3, %v313_v10  ;;  %v345_v21 = vmul.f32 %v1350_v2, %v277_v16  ;;  %v382_v22 = vadd.f32 %v1361_v3, %v314_v13  ;;  %v346_v25 = vmul.f32 %v1350_v2, %v278_v17  ;;  %v263_v40 = vld [vmem:[%s1356_s28 + $0x110] sm:$0xff]  ;;  %v264_v41 = vld [vmem:[%s1356_s28 + $0x118] sm:$0xff]  ;;  %v233_v13 = vld [vmem:[%s1356_s28 + $0x20] sm:$0xff] }
  0x13   : > { %v397_v23 = vadd.f32 %v1361_v3, %v329_v14  ;;  %v398_v24 = vadd.f32 %v1361_v3, %v330_v15  ;;  %v429_v26 = vmax.f32 %v365_v18, 0.0  ;;  %v430_v27 = vmax.f32 %v366_v19, 0.0  ;;  %v279_v49 = vld [vmem:[%s1356_s28 + $0x190] sm:$0xff]  ;;  %v280_v50 = vld [vmem:[%s1356_s28 + $0x198] sm:$0xff]  ;;  %v234_v14 = vld [vmem:[%s1356_s28 + $0x28] sm:$0xff] }
  0x14   : > { %v445_v28 = vmax.f32 %v381_v20, 0.0  ;;  %v413_v29 = vadd.f32 %v1361_v3, %v345_v21  ;;  %v446_v31 = vmax.f32 %v382_v22, 0.0  ;;  %v414_v34 = vadd.f32 %v1361_v3, %v346_v25  ;;  %v249_v15 = vld [vmem:[%s1356_s28 + $0xa0] sm:$0xff]  ;;  %v250_v16 = vld [vmem:[%s1356_s28 + $0xa8] sm:$0xff] }
  0x15   : > { %v461_v32 = vmax.f32 %v397_v23, 0.0  ;;  %v462_v33 = vmax.f32 %v398_v24, 0.0  ;;  %v493_v38 = vpack.c.bf16 %v430_v27, %v429_v26  ;;  %v315_v47 = vmul.f32 %v1350_v2, %v247_v36  ;;  %v265_v17 = vld [vmem:[%s1356_s28 + $0x120] sm:$0xff]  ;;  %v266_v18 = vld [vmem:[%s1356_s28 + $0x128] sm:$0xff] }
  0x16   : > { %v477_v39 = vmax.f32 %v413_v29, 0.0  ;;  %v501_v42 = vpack.c.bf16 %v446_v31, %v445_v28  ;;  %v478_v44 = vmax.f32 %v414_v34, 0.0  ;;  %v316_v48 = vmul.f32 %v1350_v2, %v248_v37  ;;  %v281_v23 = vld [vmem:[%s1356_s28 + $0x1a0] sm:$0xff]  ;;  %v282_v24 = vld [vmem:[%s1356_s28 + $0x1a8] sm:$0xff] }
  0x17   : > { %v509_v43 = vpack.c.bf16 %v462_v33, %v461_v32  ;;  %1057 = vmatmul.msk.bf16.vlgmr.msra.gmra.mxu0 %vm530_vm1, %v493_v38  ;;  %v331_v52 = vmul.f32 %v1350_v2, %v263_v40  ;;  %v332_v53 = vmul.f32 %v1350_v2, %v264_v41  ;;  %v347_v54 = vmul.f32 %v1350_v2, %v279_v49  ;;  %v235_v49 = vld [vmem:[%s1356_s28 + $0x30] sm:$0xff] }
  0x18   : > { %1065 = vmatmul.msk.bf16.vlgmr.msra.gmra.mxu1 %vm530_vm1, %v501_v42  ;;  %v517_v51 = vpack.c.bf16 %v478_v44, %v477_v39  ;;  %v348_v55 = vmul.f32 %v1350_v2, %v280_v50  ;;  %v367_v56 = vadd.f32 %v1361_v3, %v299_v45  ;;  %v368_v57 = vadd.f32 %v1361_v3, %v300_v46  ;;  %v236_v50 = vld [vmem:[%s1356_s28 + $0x38] sm:$0xff] }
  0x19   : > { %1073 = vmatmul.msk.bf16.vlgmr.msra.gmra.mxu2 %vm530_vm1, %v509_v43  ;;  %v383_v58 = vadd.f32 %v1361_v3, %v315_v47  ;;  %v384_v59 = vadd.f32 %v1361_v3, %v316_v48  ;;  %v399_v60 = vadd.f32 %v1361_v3, %v331_v52  ;;  %v400_v61 = vadd.f32 %v1361_v3, %v332_v53  ;;  %v252_v52 = vld [vmem:[%s1356_s28 + $0xb8] sm:$0xff]  ;;  %v267_v53 = vld [vmem:[%s1356_s28 + $0x130] sm:$0xff] }
  0x1a   : > { %1081 = vmatmul.msk.bf16.vlgmr.msra.gmra.mxu3 %vm530_vm1, %v517_v51  ;;  %v415_v62 = vadd.f32 %v1361_v3, %v347_v54  ;;  %v416_v63 = vadd.f32 %v1361_v3, %v348_v55  ;;  %v431_v0 = vmax.f32 %v367_v56, 0.0  ;;  %v432_v1 = vmax.f32 %v368_v57, 0.0  ;;  %v251_v51 = vld [vmem:[%s1356_s28 + $0xb0] sm:$0xff]  ;;  %v268_v54 = vld [vmem:[%s1356_s28 + $0x138] sm:$0xff] }
  0x1b   : > { %v447_v4 = vmax.f32 %v383_v58, 0.0  ;;  %v448_v5 = vmax.f32 %v384_v59, 0.0  ;;  %v463_v6 = vmax.f32 %v399_v60, 0.0  ;;  %v464_v7 = vmax.f32 %v400_v61, 0.0  ;;  %v283_v59 = vld [vmem:[%s1356_s28 + $0x1b0] sm:$0xff]  ;;  %v284_v60 = vld [vmem:[%s1356_s28 + $0x1b8] sm:$0xff] }
  0x1c   : > { %v479_v8 = vmax.f32 %v415_v62, 0.0  ;;  %v480_v9 = vmax.f32 %v416_v63, 0.0  ;;  %v494_v10 = vpack.c.bf16 %v432_v1, %v431_v0  ;;  %v301_v20 = vmul.f32 %v1350_v2, %v233_v13 }
  0x1d   : > { %v502_v11 = vpack.c.bf16 %v448_v5, %v447_v4  ;;  %v510_v12 = vpack.c.bf16 %v464_v7, %v463_v6  ;;  %v302_v21 = vmul.f32 %v1350_v2, %v234_v14  ;;  %v317_v22 = vmul.f32 %v1350_v2, %v249_v15 }
  0x1e   : > { %v518_v19 = vpack.c.bf16 %v480_v9, %v479_v8  ;;  %v318_v25 = vmul.f32 %v1350_v2, %v250_v16  ;;  %v333_v26 = vmul.f32 %v1350_v2, %v265_v17  ;;  %v334_v27 = vmul.f32 %v1350_v2, %v266_v18 }
  0x1f   : > { %v349_v28 = vmul.f32 %v1350_v2, %v281_v23  ;;  %v350_v29 = vmul.f32 %v1350_v2, %v282_v24  ;;  %v369_v30 = vadd.f32 %v1361_v3, %v301_v20  ;;  %v370_v31 = vadd.f32 %v1361_v3, %v302_v21  ;;  %v237_v23 = vld [vmem:[%s1356_s28 + $0x40] sm:$0xff]  ;;  %v238_v24 = vld [vmem:[%s1356_s28 + $0x48] sm:$0xff] }
  0x20   : > { %v385_v32 = vadd.f32 %v1361_v3, %v317_v22  ;;  %v386_v33 = vadd.f32 %v1361_v3, %v318_v25  ;;  %v401_v34 = vadd.f32 %v1361_v3, %v333_v26  ;;  %v402_v35 = vadd.f32 %v1361_v3, %v334_v27  ;;  %v253_v25 = vld [vmem:[%s1356_s28 + $0xc0] sm:$0xff]  ;;  %v254_v26 = vld [vmem:[%s1356_s28 + $0xc8] sm:$0xff] }
  0x21   : > { %v417_v36 = vadd.f32 %v1361_v3, %v349_v28  ;;  %v418_v37 = vadd.f32 %v1361_v3, %v350_v29  ;;  %v433_v38 = vmax.f32 %v369_v30, 0.0  ;;  %v434_v39 = vmax.f32 %v370_v31, 0.0  ;;  %v269_v27 = vld [vmem:[%s1356_s28 + $0x140] sm:$0xff]  ;;  %v270_v28 = vld [vmem:[%s1356_s28 + $0x148] sm:$0xff] }
  0x22   : > { %v449_v40 = vmax.f32 %v385_v32, 0.0  ;;  %v450_v41 = vmax.f32 %v386_v33, 0.0  ;;  %v465_v42 = vmax.f32 %v401_v34, 0.0  ;;  %v466_v43 = vmax.f32 %v402_v35, 0.0  ;;  %v285_v33 = vld [vmem:[%s1356_s28 + $0x1c0] sm:$0xff]  ;;  %v286_v34 = vld [vmem:[%s1356_s28 + $0x1c8] sm:$0xff] }
  0x23   : > { %v481_v44 = vmax.f32 %v417_v36, 0.0  ;;  %v482_v45 = vmax.f32 %v418_v37, 0.0  ;;  %v495_v46 = vpack.c.bf16 %v434_v39, %v433_v38  ;;  %v303_v56 = vmul.f32 %v1350_v2, %v235_v49 }
  0x24   : > { %v503_v47 = vpack.c.bf16 %v450_v41, %v449_v40  ;;  %v511_v48 = vpack.c.bf16 %v466_v43, %v465_v42  ;;  %v304_v57 = vmul.f32 %v1350_v2, %v236_v50  ;;  %v319_v58 = vmul.f32 %v1350_v2, %v251_v51 }
  0x25   : > { %v519_v55 = vpack.c.bf16 %v482_v45, %v481_v44  ;;  %v320_v61 = vmul.f32 %v1350_v2, %v252_v52  ;;  %v335_v62 = vmul.f32 %v1350_v2, %v267_v53  ;;  %v336_v63 = vmul.f32 %v1350_v2, %v268_v54 }
  0x26   : > { %v351_v0 = vmul.f32 %v1350_v2, %v283_v59  ;;  %v352_v1 = vmul.f32 %v1350_v2, %v284_v60  ;;  %v371_v4 = vadd.f32 %v1361_v3, %v303_v56  ;;  %v372_v5 = vadd.f32 %v1361_v3, %v304_v57  ;;  %v239_v59 = vld [vmem:[%s1356_s28 + $0x50] sm:$0xff]  ;;  %v240_v60 = vld [vmem:[%s1356_s28 + $0x58] sm:$0xff] }
  0x27   : > { %1058 = vmatmul.msk.bf16.gmra.mxu0 %vm530_vm1, %v494_v10  ;;  %v387_v6 = vadd.f32 %v1361_v3, %v319_v58  ;;  %v388_v7 = vadd.f32 %v1361_v3, %v320_v61  ;;  %v403_v8 = vadd.f32 %v1361_v3, %v335_v62  ;;  %v404_v9 = vadd.f32 %v1361_v3, %v336_v63  ;;  %v255_v61 = vld [vmem:[%s1356_s28 + $0xd0] sm:$0xff]  ;;  %v256_v62 = vld [vmem:[%s1356_s28 + $0xd8] sm:$0xff] }
  0x28   : > { %1066 = vmatmul.msk.bf16.gmra.mxu1 %vm530_vm1, %v502_v11  ;;  %v419_v10 = vadd.f32 %v1361_v3, %v351_v0  ;;  %v420_v11 = vadd.f32 %v1361_v3, %v352_v1  ;;  %v436_v13 = vmax.f32 %v372_v5, 0.0  ;;  %v305_v30 = vmul.f32 %v1350_v2, %v237_v23  ;;  %v271_v63 = vld [vmem:[%s1356_s28 + $0x150] sm:$0xff]  ;;  %v272_v0 = vld [vmem:[%s1356_s28 + $0x158] sm:$0xff] }
  0x29   : > { %1074 = vmatmul.msk.bf16.gmra.mxu2 %vm530_vm1, %v510_v12  ;;  %v435_v12 = vmax.f32 %v371_v4, 0.0  ;;  %v451_v14 = vmax.f32 %v387_v6, 0.0  ;;  %v452_v15 = vmax.f32 %v388_v7, 0.0  ;;  %v467_v16 = vmax.f32 %v403_v8, 0.0  ;;  %v287_v7 = vld [vmem:[%s1356_s28 + $0x1d0] sm:$0xff]  ;;  %v288_v8 = vld [vmem:[%s1356_s28 + $0x1d8] sm:$0xff] }
  0x2a   : > { %1082 = vmatmul.msk.bf16.gmra.mxu3 %vm530_vm1, %v518_v19  ;;  %v468_v17 = vmax.f32 %v404_v9, 0.0  ;;  %v483_v18 = vmax.f32 %v419_v10, 0.0  ;;  %v484_v19 = vmax.f32 %v420_v11, 0.0  ;;  %v306_v31 = vmul.f32 %v1350_v2, %v238_v24 }
  0x2b   : > { %v496_v20 = vpack.c.bf16 %v436_v13, %v435_v12  ;;  %v504_v21 = vpack.c.bf16 %v452_v15, %v451_v14  ;;  %v321_v32 = vmul.f32 %v1350_v2, %v253_v25  ;;  %v322_v35 = vmul.f32 %v1350_v2, %v254_v26 }
  0x2c   : > { %v512_v22 = vpack.c.bf16 %v468_v17, %v467_v16  ;;  %v520_v29 = vpack.c.bf16 %v484_v19, %v483_v18  ;;  %v337_v36 = vmul.f32 %v1350_v2, %v269_v27  ;;  %v338_v37 = vmul.f32 %v1350_v2, %v270_v28 }
  0x2d   : > { %v353_v38 = vmul.f32 %v1350_v2, %v285_v33  ;;  %v354_v39 = vmul.f32 %v1350_v2, %v286_v34  ;;  %v373_v40 = vadd.f32 %v1361_v3, %v305_v30  ;;  %v374_v41 = vadd.f32 %v1361_v3, %v306_v31  ;;  %v241_v33 = vld [vmem:[%s1356_s28 + $0x60] sm:$0xff]  ;;  %v242_v34 = vld [vmem:[%s1356_s28 + $0x68] sm:$0xff] }
  0x2e   : > { %v389_v42 = vadd.f32 %v1361_v3, %v321_v32  ;;  %v390_v43 = vadd.f32 %v1361_v3, %v322_v35  ;;  %v405_v44 = vadd.f32 %v1361_v3, %v337_v36  ;;  %v406_v45 = vadd.f32 %v1361_v3, %v338_v37  ;;  %v257_v35 = vld [vmem:[%s1356_s28 + $0xe0] sm:$0xff]  ;;  %v258_v36 = vld [vmem:[%s1356_s28 + $0xe8] sm:$0xff] }
  0x2f   : > { %v438_v49 = vmax.f32 %v374_v41, 0.0  ;;  %v307_v4 = vmul.f32 %v1350_v2, %v239_v59  ;;  %v308_v5 = vmul.f32 %v1350_v2, %v240_v60  ;;  %v323_v6 = vmul.f32 %v1350_v2, %v255_v61  ;;  %v273_v37 = vld [vmem:[%s1356_s28 + $0x160] sm:$0xff] }
  0x30   : > { %v453_v50 = vmax.f32 %v389_v42, 0.0  ;;  %v454_v51 = vmax.f32 %v390_v43, 0.0  ;;  %v469_v52 = vmax.f32 %v405_v44, 0.0  ;;  %v470_v53 = vmax.f32 %v406_v45, 0.0  ;;  %v289_v43 = vld [vmem:[%s1356_s28 + $0x1e0] sm:$0xff]  ;;  %v290_v44 = vld [vmem:[%s1356_s28 + $0x1e8] sm:$0xff] }
  0x31   : > { %v324_v9 = vmul.f32 %v1350_v2, %v256_v62  ;;  %v339_v10 = vmul.f32 %v1350_v2, %v271_v63  ;;  %v340_v11 = vmul.f32 %v1350_v2, %v272_v0  ;;  %v355_v12 = vmul.f32 %v1350_v2, %v287_v7  ;;  %v243_v7 = vld [vmem:[%s1356_s28 + $0x70] sm:$0xff] }
  0x32   : > { %v505_v57 = vpack.c.bf16 %v454_v51, %v453_v50  ;;  %v513_v58 = vpack.c.bf16 %v470_v53, %v469_v52  ;;  %v356_v13 = vmul.f32 %v1350_v2, %v288_v8  ;;  %v375_v14 = vadd.f32 %v1361_v3, %v307_v4  ;;  %v244_v8 = vld [vmem:[%s1356_s28 + $0x78] sm:$0xff] }
  0x33   : > { %v376_v15 = vadd.f32 %v1361_v3, %v308_v5  ;;  %v391_v16 = vadd.f32 %v1361_v3, %v323_v6  ;;  %v392_v17 = vadd.f32 %v1361_v3, %v324_v9  ;;  %v407_v18 = vadd.f32 %v1361_v3, %v339_v10  ;;  %v259_v9 = vld [vmem:[%s1356_s28 + $0xf0] sm:$0xff]  ;;  %v260_v10 = vld [vmem:[%s1356_s28 + $0xf8] sm:$0xff] }
  0x34   : > { %v408_v19 = vadd.f32 %v1361_v3, %v340_v11  ;;  %v310_v41 = vmul.f32 %v1350_v2, %v242_v34  ;;  %v325_v42 = vmul.f32 %v1350_v2, %v257_v35  ;;  %v326_v45 = vmul.f32 %v1350_v2, %v258_v36  ;;  %v275_v11 = vld [vmem:[%s1356_s28 + $0x170] sm:$0xff] }
  0x35   : > { %v440_v23 = vmax.f32 %v376_v15, 0.0  ;;  %v455_v24 = vmax.f32 %v391_v16, 0.0  ;;  %v456_v25 = vmax.f32 %v392_v17, 0.0  ;;  %v471_v26 = vmax.f32 %v407_v18, 0.0  ;;  %v291_v17 = vld [vmem:[%s1356_s28 + $0x1f0] sm:$0xff]  ;;  %v292_v18 = vld [vmem:[%s1356_s28 + $0x1f8] sm:$0xff] }
  0x36   : > { %v472_v27 = vmax.f32 %v408_v19, 0.0  ;;  %v378_v51 = vadd.f32 %v1361_v3, %v310_v41  ;;  %v393_v52 = vadd.f32 %v1361_v3, %v325_v42  ;;  %v394_v53 = vadd.f32 %v1361_v3, %v326_v45 }
  0x37   : > { %1059 = vmatmul.msk.bf16.gmra.mxu0 %vm530_vm1, %v495_v46  ;;  %v421_v46 = vadd.f32 %v1361_v3, %v353_v38  ;;  %v506_v31 = vpack.c.bf16 %v456_v25, %v455_v24  ;;  %v274_v38 = vld [vmem:[%s1356_s28 + $0x168] sm:$0xff]  ;;  %v312_v15 = vmul.f32 %v1350_v2, %v244_v8  ;;  %v327_v16 = vmul.f32 %v1350_v2, %v259_v9 }
  0x38   : > { %1067 = vmatmul.msk.bf16.gmra.mxu1 %vm530_vm1, %v503_v47  ;;  %v422_v47 = vadd.f32 %v1361_v3, %v354_v39  ;;  %v514_v32 = vpack.c.bf16 %v472_v27, %v471_v26  ;;  %v442_v59 = vmax.f32 %v378_v51, 0.0  ;;  %v457_v60 = vmax.f32 %v393_v52, 0.0 }
  0x39   : > { %1075 = vmatmul.msk.bf16.gmra.mxu2 %vm530_vm1, %v511_v48  ;;  %v437_v48 = vmax.f32 %v373_v40, 0.0  ;;  %v485_v54 = vmax.f32 %v421_v46, 0.0  ;;  %v309_v40 = vmul.f32 %v1350_v2, %v241_v33  ;;  %v341_v46 = vmul.f32 %v1350_v2, %v273_v37 }
  0x3a   : > { %1083 = vmatmul.msk.bf16.gmra.mxu3 %vm530_vm1, %v519_v55  ;;  %v486_v55 = vmax.f32 %v422_v47, 0.0  ;;  %v342_v47 = vmul.f32 %v1350_v2, %v274_v38  ;;  %v458_v61 = vmax.f32 %v394_v53, 0.0  ;;  %v328_v19 = vmul.f32 %v1350_v2, %v260_v10 }
  0x3b   : > { %v497_v56 = vpack.c.bf16 %v438_v49, %v437_v48  ;;  %v357_v48 = vmul.f32 %v1350_v2, %v289_v43  ;;  %v358_v49 = vmul.f32 %v1350_v2, %v290_v44  ;;  %v377_v50 = vadd.f32 %v1361_v3, %v309_v40  ;;  %v1590_v44 = vld [vmem:[%s1701_s4] ss:$0 sm:$0xff] }
  0x3c   : > { %v521_v1 = vpack.c.bf16 %v486_v55, %v485_v54  ;;  %v409_v54 = vadd.f32 %v1361_v3, %v341_v46  ;;  %v410_v55 = vadd.f32 %v1361_v3, %v342_v47  ;;  %v507_v5 = vpack.c.bf16 %v458_v61, %v457_v60 }
  0x3d   : > { %v380_v25 = vadd.f32 %v1361_v3, %v312_v15  ;;  %v395_v26 = vadd.f32 %v1361_v3, %v327_v16  ;;  %v396_v27 = vadd.f32 %v1361_v3, %v328_v19 }
  0x3e   : > { %v473_v62 = vmax.f32 %v409_v54, 0.0  ;;  %v474_v63 = vmax.f32 %v410_v55, 0.0 }
  0x3f   : > { %v444_v33 = vmax.f32 %v380_v25, 0.0  ;;  %v459_v34 = vmax.f32 %v395_v26, 0.0 }
  0x40   : > { %v515_v6 = vpack.c.bf16 %v474_v63, %v473_v62 }
  0x47   : > { %1060 = vmatmul.msk.bf16.gmra.mxu0 %vm530_vm1, %v496_v20  ;;  %v423_v20 = vadd.f32 %v1361_v3, %v355_v12  ;;  %v276_v12 = vld [vmem:[%s1356_s28 + $0x178] sm:$0xff] }
  0x48   : > { %1068 = vmatmul.msk.bf16.gmra.mxu1 %vm530_vm1, %v504_v21  ;;  %v424_v21 = vadd.f32 %v1361_v3, %v356_v13 }
  0x49   : > { %1076 = vmatmul.msk.bf16.gmra.mxu2 %vm530_vm1, %v512_v22  ;;  %v439_v22 = vmax.f32 %v375_v14, 0.0  ;;  %v487_v28 = vmax.f32 %v423_v20, 0.0  ;;  %v311_v14 = vmul.f32 %v1350_v2, %v243_v7  ;;  %v343_v20 = vmul.f32 %v1350_v2, %v275_v11 }
  0x4a   : > { %1084 = vmatmul.msk.bf16.gmra.mxu3 %vm530_vm1, %v520_v29  ;;  %v488_v29 = vmax.f32 %v424_v21, 0.0  ;;  %v344_v21 = vmul.f32 %v1350_v2, %v276_v12 }
  0x4b   : > { %v498_v30 = vpack.c.bf16 %v440_v23, %v439_v22  ;;  %v359_v22 = vmul.f32 %v1350_v2, %v291_v17  ;;  %v360_v23 = vmul.f32 %v1350_v2, %v292_v18  ;;  %v379_v24 = vadd.f32 %v1361_v3, %v311_v14 }
  0x4c   : > { %v522_v39 = vpack.c.bf16 %v488_v29, %v487_v28  ;;  %v411_v28 = vadd.f32 %v1361_v3, %v343_v20  ;;  %v412_v29 = vadd.f32 %v1361_v3, %v344_v21  ;;  %v460_v2 = vmax.f32 %v396_v27, 0.0 }
  0x4e   : > { %v475_v35 = vmax.f32 %v411_v28, 0.0  ;;  %v476_v36 = vmax.f32 %v412_v29, 0.0  ;;  %v508_v40 = vpack.c.bf16 %v460_v2, %v459_v34 }
  0x50   : > { %v516_v41 = vpack.c.bf16 %v476_v36, %v475_v35 }
  0x57   : > { %1061 = vmatmul.msk.bf16.gmra.mxu0 %vm530_vm1, %v497_v56  ;;  %v425_v56 = vadd.f32 %v1361_v3, %v357_v48 }
  0x58   : > { %1069 = vmatmul.msk.bf16.gmra.mxu1 %vm530_vm1, %v505_v57  ;;  %v426_v57 = vadd.f32 %v1361_v3, %v358_v49 }
  0x59   : > { %1077 = vmatmul.msk.bf16.gmra.mxu2 %vm530_vm1, %v513_v58  ;;  %v441_v58 = vmax.f32 %v377_v50, 0.0  ;;  %v489_v0 = vmax.f32 %v425_v56, 0.0 }
  0x5a   : > { %1085 = vmatmul.msk.bf16.gmra.mxu3 %vm530_vm1, %v521_v1  ;;  %v490_v1 = vmax.f32 %v426_v57, 0.0 }
  0x5b   : > { %v499_v4 = vpack.c.bf16 %v442_v59, %v441_v58 }
  0x5c   : > { %v523_v13 = vpack.c.bf16 %v490_v1, %v489_v0 }
  0x67   : > { %1062 = vmatmul.msk.bf16.gmra.mxu0 %vm530_vm1, %v498_v30  ;;  %v427_v30 = vadd.f32 %v1361_v3, %v359_v22 }
  0x68   : > { %1070 = vmatmul.msk.bf16.gmra.mxu1 %vm530_vm1, %v506_v31  ;;  %v428_v31 = vadd.f32 %v1361_v3, %v360_v23 }
  0x69   : > { %1078 = vmatmul.msk.bf16.gmra.mxu2 %vm530_vm1, %v514_v32  ;;  %v443_v32 = vmax.f32 %v379_v24, 0.0  ;;  %v491_v37 = vmax.f32 %v427_v30, 0.0 }
  0x6a   : > { %1086 = vmatmul.msk.bf16.gmra.mxu3 %vm530_vm1, %v522_v39  ;;  %v492_v38 = vmax.f32 %v428_v31, 0.0 }
  0x6b   : > { %v500_v39 = vpack.c.bf16 %v444_v33, %v443_v32 }
  0x6c   : > { %v524_v42 = vpack.c.bf16 %v492_v38, %v491_v37 }
  0x77   : > { %1063 = vmatmul.msk.bf16.gmra.mxu0 %vm530_vm1, %v499_v4 }
  0x78   : > { %1071 = vmatmul.msk.bf16.gmra.mxu1 %vm530_vm1, %v507_v5 }
  0x79   : > { %1079 = vmatmul.msk.bf16.gmra.mxu2 %vm530_vm1, %v515_v6 }
  0x7a   : > { %1087 = vmatmul.msk.bf16.gmra.mxu3 %vm530_vm1, %v523_v13 }
  0x87   : > { %1064 = vmatmul.msk.bf16.gmra.mxu0 %vm530_vm1, %v500_v39 }
  0x88   : > { %1072 = vmatmul.msk.bf16.gmra.mxu1 %vm530_vm1, %v508_v40 }
  0x89   : > { %1080 = vmatmul.msk.bf16.gmra.mxu2 %vm530_vm1, %v516_v41 }
  0x8a   : > { %1088 = vmatmul.msk.bf16.gmra.mxu3 %vm530_vm1, %v524_v42 }
  0x94   : > { %v640_v3 = vpop.f32.mrf.mxu0 }
  0x95   : > { %v680_v43 = vpop.f32.mrf.mxu1  ;;  %v641_v45 = vadd.f32 %v1590_v44, %v640_v3 }
  0x96   : > { %v681_v47 = vadd.f32 %v1590_v44, %v680_v43 }
  0x97   : > { %v800_v53 = vmax.f32 %v641_v45, 0.0 }
  0x98   : > { %v816_v55 = vmax.f32 %v681_v47, 0.0 }
  0x9c   : > { %v720_v46 = vpop.f32.mrf.mxu2  ;;  %v642_v48 = vpop.f32.mrf.mxu0 }
  0x9d   : > { %v760_v49 = vpop.f32.mrf.mxu3  ;;  %v643_v50 = vadd.f32 %v1590_v44, %v642_v48  ;;  %v682_v51 = vpop.f32.mrf.mxu1  ;;  %v721_v58 = vadd.f32 %v1590_v44, %v720_v46 }
  0x9e   : > { %v683_v52 = vadd.f32 %v1590_v44, %v682_v51  ;;  %v761_v61 = vadd.f32 %v1590_v44, %v760_v49 }
  0x9f   : > { %v801_v54 = vmax.f32 %v643_v50, 0.0  ;;  %v832_v4 = vmax.f32 %v721_v58, 0.0 }
  0xa0   : > { %v817_v56 = vmax.f32 %v683_v52, 0.0  ;;  %v848_v7 = vmax.f32 %v761_v61, 0.0 }
  0xa1   : > { %v1094_v57 = vpack.c.bf16 %v801_v54, %v800_v53 }
  0xa2   : > { %v1134_v59 = vpack.c.bf16 %v817_v56, %v816_v55 }
  0xa3   : > { %1095 = vst [vmem:[%s1600_s11] sm:$0xff] %v1094_v57  }
  0xa4   : > { %v722_v60 = vpop.f32.mrf.mxu2  ;;  %1258 = vst [vmem:[%s1600_s11 + $0x40] sm:$0xff] %v1134_v59   ;;  %v645_v63 = vpop.f32.mrf.mxu0 }
  0xa5   : > { %v723_v62 = vadd.f32 %v1590_v44, %v722_v60  ;;  %v762_v0 = vpop.f32.mrf.mxu3  ;;  %v685_v1 = vpop.f32.mrf.mxu1  ;;  %v646_v11 = vadd.f32 %v1590_v44, %v645_v63 }
  0xa6   : > { %v763_v6 = vadd.f32 %v1590_v44, %v762_v0  ;;  %v686_v13 = vadd.f32 %v1590_v44, %v685_v1 }
  0xa7   : > { %v833_v5 = vmax.f32 %v723_v62, 0.0  ;;  %v802_v19 = vmax.f32 %v646_v11, 0.0 }
  0xa8   : > { %v849_v9 = vmax.f32 %v763_v6, 0.0  ;;  %v818_v21 = vmax.f32 %v686_v13, 0.0 }
  0xa9   : > { %v1174_v8 = vpack.c.bf16 %v833_v5, %v832_v4 }
  0xaa   : > { %v1214_v10 = vpack.c.bf16 %v849_v9, %v848_v7 }
  0xab   : > { %1266 = vst [vmem:[%s1600_s11 + $0x80] sm:$0xff] %v1174_v8  }
  0xac   : > { %v725_v12 = vpop.f32.mrf.mxu2  ;;  %1274 = vst [vmem:[%s1600_s11 + $0xc0] sm:$0xff] %v1214_v10   ;;  %v647_v14 = vpop.f32.mrf.mxu0 }
  0xad   : > { %v765_v15 = vpop.f32.mrf.mxu3  ;;  %v648_v16 = vadd.f32 %v1590_v44, %v647_v14  ;;  %v687_v17 = vpop.f32.mrf.mxu1  ;;  %v726_v24 = vadd.f32 %v1590_v44, %v725_v12 }
  0xae   : > { %v688_v18 = vadd.f32 %v1590_v44, %v687_v17  ;;  %v766_v27 = vadd.f32 %v1590_v44, %v765_v15 }
  0xaf   : > { %v803_v20 = vmax.f32 %v648_v16, 0.0  ;;  %v834_v32 = vmax.f32 %v726_v24, 0.0 }
  0xb0   : > { %v819_v22 = vmax.f32 %v688_v18, 0.0  ;;  %v850_v2 = vmax.f32 %v766_v27, 0.0 }
  0xb1   : > { %v1099_v23 = vpack.c.bf16 %v803_v20, %v802_v19 }
  0xb2   : > { %v1139_v25 = vpack.c.bf16 %v819_v22, %v818_v21 }
  0xb3   : > { %1251 = vst [vmem:[%s1600_s11 + $0x8] sm:$0xff] %v1099_v23  }
  0xb4   : > { %v727_v26 = vpop.f32.mrf.mxu2  ;;  %1259 = vst [vmem:[%s1600_s11 + $0x48] sm:$0xff] %v1139_v25   ;;  %v650_v29 = vpop.f32.mrf.mxu0 }
  0xb5   : > { %v728_v28 = vadd.f32 %v1590_v44, %v727_v26  ;;  %v767_v30 = vpop.f32.mrf.mxu3  ;;  %v690_v31 = vpop.f32.mrf.mxu1  ;;  %v651_v38 = vadd.f32 %v1590_v44, %v650_v29 }
  0xb6   : > { %v768_v34 = vadd.f32 %v1590_v44, %v767_v30  ;;  %v691_v40 = vadd.f32 %v1590_v44, %v690_v31 }
  0xb7   : > { %v835_v33 = vmax.f32 %v728_v28, 0.0  ;;  %v804_v46 = vmax.f32 %v651_v38, 0.0 }
  0xb8   : > { %v851_v36 = vmax.f32 %v768_v34, 0.0  ;;  %v820_v48 = vmax.f32 %v691_v40, 0.0 }
  0xb9   : > { %v1179_v35 = vpack.c.bf16 %v835_v33, %v834_v32 }
  0xba   : > { %v1219_v37 = vpack.c.bf16 %v851_v36, %v850_v2 }
  0xbb   : > { %1267 = vst [vmem:[%s1600_s11 + $0x88] sm:$0xff] %v1179_v35  }
  0xbc   : > { %v730_v39 = vpop.f32.mrf.mxu2  ;;  %1275 = vst [vmem:[%s1600_s11 + $0xc8] sm:$0xff] %v1219_v37   ;;  %v652_v41 = vpop.f32.mrf.mxu0 }
  0xbd   : > { %v770_v42 = vpop.f32.mrf.mxu3  ;;  %v653_v3 = vadd.f32 %v1590_v44, %v652_v41  ;;  %v692_v43 = vpop.f32.mrf.mxu1  ;;  %v731_v51 = vadd.f32 %v1590_v44, %v730_v39 }
  0xbe   : > { %v693_v45 = vadd.f32 %v1590_v44, %v692_v43  ;;  %v771_v54 = vadd.f32 %v1590_v44, %v770_v42 }
  0xbf   : > { %v805_v47 = vmax.f32 %v653_v3, 0.0  ;;  %v836_v59 = vmax.f32 %v731_v51, 0.0 }
  0xc0   : > { %v821_v49 = vmax.f32 %v693_v45, 0.0  ;;  %v852_v62 = vmax.f32 %v771_v54, 0.0 }
  0xc1   : > { %v1104_v50 = vpack.c.bf16 %v805_v47, %v804_v46 }
  0xc2   : > { %v1144_v52 = vpack.c.bf16 %v821_v49, %v820_v48 }
  0xc3   : > { %1252 = vst [vmem:[%s1600_s11 + $0x10] sm:$0xff] %v1104_v50  }
  0xc4   : > { %v732_v53 = vpop.f32.mrf.mxu2  ;;  %1260 = vst [vmem:[%s1600_s11 + $0x50] sm:$0xff] %v1144_v52   ;;  %v655_v56 = vpop.f32.mrf.mxu0 }
  0xc5   : > { %v733_v55 = vadd.f32 %v1590_v44, %v732_v53  ;;  %v772_v57 = vpop.f32.mrf.mxu3  ;;  %v695_v58 = vpop.f32.mrf.mxu1  ;;  %v656_v4 = vadd.f32 %v1590_v44, %v655_v56 }
  0xc6   : > { %v773_v61 = vadd.f32 %v1590_v44, %v772_v57  ;;  %v696_v6 = vadd.f32 %v1590_v44, %v695_v58 }
  0xc7   : > { %v837_v60 = vmax.f32 %v733_v55, 0.0  ;;  %v806_v12 = vmax.f32 %v656_v4, 0.0 }
  0xc8   : > { %v853_v0 = vmax.f32 %v773_v61, 0.0  ;;  %v822_v14 = vmax.f32 %v696_v6, 0.0 }
  0xc9   : > { %v1184_v63 = vpack.c.bf16 %v837_v60, %v836_v59 }
  0xca   : > { %v1224_v1 = vpack.c.bf16 %v853_v0, %v852_v62 }
  0xcb   : > { %1268 = vst [vmem:[%s1600_s11 + $0x90] sm:$0xff] %v1184_v63  }
  0xcc   : > { %v735_v5 = vpop.f32.mrf.mxu2  ;;  %1276 = vst [vmem:[%s1600_s11 + $0xd0] sm:$0xff] %v1224_v1   ;;  %v657_v7 = vpop.f32.mrf.mxu0 }
  0xcd   : > { %v775_v8 = vpop.f32.mrf.mxu3  ;;  %v658_v9 = vadd.f32 %v1590_v44, %v657_v7  ;;  %v697_v10 = vpop.f32.mrf.mxu1  ;;  %v736_v17 = vadd.f32 %v1590_v44, %v735_v5 }
  0xce   : > { %v698_v11 = vadd.f32 %v1590_v44, %v697_v10  ;;  %v776_v20 = vadd.f32 %v1590_v44, %v775_v8 }
  0xcf   : > { %v807_v13 = vmax.f32 %v658_v9, 0.0  ;;  %v838_v25 = vmax.f32 %v736_v17, 0.0 }
  0xd0   : > { %v823_v15 = vmax.f32 %v698_v11, 0.0  ;;  %v854_v28 = vmax.f32 %v776_v20, 0.0 }
  0xd1   : > { %v1109_v16 = vpack.c.bf16 %v807_v13, %v806_v12 }
  0xd2   : > { %v1149_v18 = vpack.c.bf16 %v823_v15, %v822_v14 }
  0xd3   : > { %1253 = vst [vmem:[%s1600_s11 + $0x18] sm:$0xff] %v1109_v16  }
  0xd4   : > { %v737_v19 = vpop.f32.mrf.mxu2  ;;  %1261 = vst [vmem:[%s1600_s11 + $0x58] sm:$0xff] %v1149_v18   ;;  %v660_v22 = vpop.f32.mrf.mxu0 }
  0xd5   : > { %v738_v21 = vadd.f32 %v1590_v44, %v737_v19  ;;  %v777_v23 = vpop.f32.mrf.mxu3  ;;  %v700_v24 = vpop.f32.mrf.mxu1  ;;  %v661_v32 = vadd.f32 %v1590_v44, %v660_v22 }
  0xd6   : > { %v778_v27 = vadd.f32 %v1590_v44, %v777_v23  ;;  %v701_v34 = vadd.f32 %v1590_v44, %v700_v24 }
  0xd7   : > { %v839_v26 = vmax.f32 %v738_v21, 0.0  ;;  %v808_v39 = vmax.f32 %v661_v32, 0.0 }
  0xd8   : > { %v855_v30 = vmax.f32 %v778_v27, 0.0  ;;  %v824_v41 = vmax.f32 %v701_v34, 0.0 }
  0xd9   : > { %v1189_v29 = vpack.c.bf16 %v839_v26, %v838_v25 }
  0xda   : > { %v1229_v31 = vpack.c.bf16 %v855_v30, %v854_v28 }
  0xdb   : > { %1269 = vst [vmem:[%s1600_s11 + $0x98] sm:$0xff] %v1189_v29  }
  0xdc   : > { %v740_v33 = vpop.f32.mrf.mxu2  ;;  %1277 = vst [vmem:[%s1600_s11 + $0xd8] sm:$0xff] %v1229_v31   ;;  %v662_v2 = vpop.f32.mrf.mxu0 }
  0xdd   : > { %v780_v35 = vpop.f32.mrf.mxu3  ;;  %v663_v36 = vadd.f32 %v1590_v44, %v662_v2  ;;  %v702_v37 = vpop.f32.mrf.mxu1  ;;  %v741_v43 = vadd.f32 %v1590_v44, %v740_v33 }
  0xde   : > { %v703_v38 = vadd.f32 %v1590_v44, %v702_v37  ;;  %v781_v47 = vadd.f32 %v1590_v44, %v780_v35 }
  0xdf   : > { %v809_v40 = vmax.f32 %v663_v36, 0.0  ;;  %v840_v52 = vmax.f32 %v741_v43, 0.0 }
  0xe0   : > { %v825_v42 = vmax.f32 %v703_v38, 0.0  ;;  %v856_v55 = vmax.f32 %v781_v47, 0.0 }
  0xe1   : > { %v1114_v3 = vpack.c.bf16 %v809_v40, %v808_v39 }
  0xe2   : > { %v1154_v45 = vpack.c.bf16 %v825_v42, %v824_v41 }
  0xe3   : > { %1254 = vst [vmem:[%s1600_s11 + $0x20] sm:$0xff] %v1114_v3  }
  0xe4   : > { %v742_v46 = vpop.f32.mrf.mxu2  ;;  %1262 = vst [vmem:[%s1600_s11 + $0x60] sm:$0xff] %v1154_v45   ;;  %v665_v49 = vpop.f32.mrf.mxu0 }
  0xe5   : > { %v743_v48 = vadd.f32 %v1590_v44, %v742_v46  ;;  %v782_v50 = vpop.f32.mrf.mxu3  ;;  %v705_v51 = vpop.f32.mrf.mxu1  ;;  %v666_v59 = vadd.f32 %v1590_v44, %v665_v49 }
  0xe6   : > { %v783_v54 = vadd.f32 %v1590_v44, %v782_v50  ;;  %v706_v61 = vadd.f32 %v1590_v44, %v705_v51 }
  0xe7   : > { %v841_v53 = vmax.f32 %v743_v48, 0.0  ;;  %v810_v5 = vmax.f32 %v666_v59, 0.0 }
  0xe8   : > { %v857_v57 = vmax.f32 %v783_v54, 0.0  ;;  %v826_v7 = vmax.f32 %v706_v61, 0.0 }
  0xe9   : > { %v1194_v56 = vpack.c.bf16 %v841_v53, %v840_v52 }
  0xea   : > { %v1234_v58 = vpack.c.bf16 %v857_v57, %v856_v55 }
  0xeb   : > { %1270 = vst [vmem:[%s1600_s11 + $0xa0] sm:$0xff] %v1194_v56  }
  0xec   : > { %v745_v60 = vpop.f32.mrf.mxu2  ;;  %1278 = vst [vmem:[%s1600_s11 + $0xe0] sm:$0xff] %v1234_v58   ;;  %v667_v62 = vpop.f32.mrf.mxu0 }
  0xed   : > { %v785_v63 = vpop.f32.mrf.mxu3  ;;  %v668_v0 = vadd.f32 %v1590_v44, %v667_v62  ;;  %v707_v1 = vpop.f32.mrf.mxu1  ;;  %v746_v10 = vadd.f32 %v1590_v44, %v745_v60 }
  0xee   : > { %v708_v4 = vadd.f32 %v1590_v44, %v707_v1  ;;  %v786_v13 = vadd.f32 %v1590_v44, %v785_v63 }
  0xef   : > { %v811_v6 = vmax.f32 %v668_v0, 0.0  ;;  %v842_v18 = vmax.f32 %v746_v10, 0.0 }
  0xf0   : > { %v827_v8 = vmax.f32 %v708_v4, 0.0  ;;  %v858_v21 = vmax.f32 %v786_v13, 0.0 }
  0xf1   : > { %v1119_v9 = vpack.c.bf16 %v811_v6, %v810_v5 }
  0xf2   : > { %v1159_v11 = vpack.c.bf16 %v827_v8, %v826_v7 }
  0xf3   : > { %1255 = vst [vmem:[%s1600_s11 + $0x28] sm:$0xff] %v1119_v9  }
  0xf4   : > { %v747_v12 = vpop.f32.mrf.mxu2  ;;  %1263 = vst [vmem:[%s1600_s11 + $0x68] sm:$0xff] %v1159_v11   ;;  %v670_v15 = vpop.f32.mrf.mxu0 }
  0xf5   : > { %v748_v14 = vadd.f32 %v1590_v44, %v747_v12  ;;  %v787_v16 = vpop.f32.mrf.mxu3  ;;  %v710_v17 = vpop.f32.mrf.mxu1  ;;  %v671_v25 = vadd.f32 %v1590_v44, %v670_v15 }
  0xf6   : > { %v788_v20 = vadd.f32 %v1590_v44, %v787_v16  ;;  %v711_v27 = vadd.f32 %v1590_v44, %v710_v17 }
  0xf7   : > { %v843_v19 = vmax.f32 %v748_v14, 0.0  ;;  %v812_v33 = vmax.f32 %v671_v25, 0.0 }
  0xf8   : > { %v859_v23 = vmax.f32 %v788_v20, 0.0  ;;  %v828_v2 = vmax.f32 %v711_v27, 0.0 }
  0xf9   : > { %v1199_v22 = vpack.c.bf16 %v843_v19, %v842_v18 }
  0xfa   : > { %v1239_v24 = vpack.c.bf16 %v859_v23, %v858_v21 }
  0xfb   : > { %1271 = vst [vmem:[%s1600_s11 + $0xa8] sm:$0xff] %v1199_v22  }
  0xfc   : > { %v750_v26 = vpop.f32.mrf.mxu2  ;;  %1279 = vst [vmem:[%s1600_s11 + $0xe8] sm:$0xff] %v1239_v24   ;;  %v672_v28 = vpop.f32.mrf.mxu0 }
  0xfd   : > { %v790_v29 = vpop.f32.mrf.mxu3  ;;  %v673_v30 = vadd.f32 %v1590_v44, %v672_v28  ;;  %v712_v31 = vpop.f32.mrf.mxu1  ;;  %v751_v37 = vadd.f32 %v1590_v44, %v750_v26 }
  0xfe   : > { %v713_v32 = vadd.f32 %v1590_v44, %v712_v31  ;;  %v791_v40 = vadd.f32 %v1590_v44, %v790_v29 }
  0xff   : > { %v813_v34 = vmax.f32 %v673_v30, 0.0  ;;  %v844_v45 = vmax.f32 %v751_v37, 0.0 }
 0x100   : > { %v829_v35 = vmax.f32 %v713_v32, 0.0  ;;  %v860_v48 = vmax.f32 %v791_v40, 0.0 }
 0x101   : > { %v1124_v36 = vpack.c.bf16 %v813_v34, %v812_v33 }
 0x102   : > { %v1164_v38 = vpack.c.bf16 %v829_v35, %v828_v2 }
 0x103   : > { %1256 = vst [vmem:[%s1600_s11 + $0x30] sm:$0xff] %v1124_v36  }
 0x104   : > { %v752_v39 = vpop.f32.mrf.mxu2  ;;  %1264 = vst [vmem:[%s1600_s11 + $0x70] sm:$0xff] %v1164_v38   ;;  %v675_v42 = vpop.f32.mrf.mxu0 }
 0x105   : > { %v753_v41 = vadd.f32 %v1590_v44, %v752_v39  ;;  %v792_v3 = vpop.f32.mrf.mxu3  ;;  %v715_v43 = vpop.f32.mrf.mxu1  ;;  %v676_v52 = vadd.f32 %v1590_v44, %v675_v42 }
 0x106   : > { %v793_v47 = vadd.f32 %v1590_v44, %v792_v3  ;;  %v716_v54 = vadd.f32 %v1590_v44, %v715_v43 }
 0x107   : > { %v845_v46 = vmax.f32 %v753_v41, 0.0  ;;  %v814_v60 = vmax.f32 %v676_v52, 0.0 }
 0x108   : > { %v861_v50 = vmax.f32 %v793_v47, 0.0  ;;  %v830_v62 = vmax.f32 %v716_v54, 0.0 }
 0x109   : > { %v1204_v49 = vpack.c.bf16 %v845_v46, %v844_v45 }
 0x10a   : > { %v1244_v51 = vpack.c.bf16 %v861_v50, %v860_v48 }
 0x10b   : > { %1272 = vst [vmem:[%s1600_s11 + $0xb0] sm:$0xff] %v1204_v49  }
 0x10c   : > { %v755_v53 = vpop.f32.mrf.mxu2  ;;  %1280 = vst [vmem:[%s1600_s11 + $0xf0] sm:$0xff] %v1244_v51   ;;  %v677_v55 = vpop.f32.mrf.mxu0 }
 0x10d   : > { %v795_v56 = vpop.f32.mrf.mxu3  ;;  %v678_v57 = vadd.f32 %v1590_v44, %v677_v55  ;;  %v717_v58 = vpop.f32.mrf.mxu1  ;;  %v756_v1 = vadd.f32 %v1590_v44, %v755_v53 }
 0x10e   : > { %v718_v59 = vadd.f32 %v1590_v44, %v717_v58  ;;  %v796_v6 = vadd.f32 %v1590_v44, %v795_v56 }
 0x10f   : > { %v815_v61 = vmax.f32 %v678_v57, 0.0  ;;  %v846_v9 = vmax.f32 %v756_v1, 0.0 }
 0x110   : > { %v831_v63 = vmax.f32 %v718_v59, 0.0  ;;  %v862_v12 = vmax.f32 %v796_v6, 0.0 }
 0x111   : > { %v1129_v0 = vpack.c.bf16 %v815_v61, %v814_v60 }
 0x112   : > { %v1169_v4 = vpack.c.bf16 %v831_v63, %v830_v62 }
 0x113   : > { %1257 = vst [vmem:[%s1600_s11 + $0x38] sm:$0xff] %v1129_v0  }
 0x114   : > { %v757_v5 = vpop.f32.mrf.mxu2  ;;  %1265 = vst [vmem:[%s1600_s11 + $0x78] sm:$0xff] %v1169_v4  }
 0x115   : > { %v758_v7 = vadd.f32 %v1590_v44, %v757_v5  ;;  %v797_v8 = vpop.f32.mrf.mxu3 }
 0x116   : > { %v798_v11 = vadd.f32 %v1590_v44, %v797_v8 }
 0x117   : > { %v847_v10 = vmax.f32 %v758_v7, 0.0 }
 0x118   : > { %v863_v14 = vmax.f32 %v798_v11, 0.0 }
 0x119   : > { %v1209_v13 = vpack.c.bf16 %v847_v10, %v846_v9 }
 0x11a   : > { %v1249_v15 = vpack.c.bf16 %v863_v14, %v862_v12 }
 0x11b   : > { %1273 = vst [vmem:[%s1600_s11 + $0xb8] sm:$0xff] %v1209_v13  }
 0x11c   : > { %1281 = vst [vmem:[%s1600_s11 + $0xf8] sm:$0xff] %v1249_v15  }
 0x11d PF: > { %s15_s18 = sadd.s32 1, %s1302_s18  }
 0x11e   : > { %p12_p4 = scmp.ge.s32.totalorder %s15_s18, 4  }
 0x120   :  { %14 = sbr.rel (!%p12_p4) target bundleno = 1 (0x1), region = 70 }

// kernel: dense_block3d_forward.7
= control target key start
LH: loop header
LB: loop body
LE: loop exit
PB: predicated region body
PF: predicated region fallthrough
CT: control target
= control target key end

     0   :  { %s6033_s15 = smov 0   ;;  %s6035_s16 = smov 0   ;;  %s7779_s0 = inlined_call_operand.vmem [shape: bf16[2,10,110,128], index: 0, kind: input, shape index: {}, may-alias: {0,1,2}]   ;;  %s7780_s1 = inlined_call_operand.vmem [shape: bf16[2,10,110,128], index: 1, kind: input, shape index: {}, may-alias: {0,1,2}]   ;;  %s7781_s2 = inlined_call_operand.vmem [shape: bf16[2,10,110,128], index: 2, kind: input, shape index: {}, may-alias: {0,1,2}]   ;;  %s7782_s3 = inlined_call_operand.vmem [shape: bf16[27,128,128], index: 3, kind: input, shape index: {}]   ;;  %s7783_s4 = inlined_call_operand.vmem [shape: f32[2,8,80,128], index: 4, kind: output, shape index: {}]  }
   0x1   :  { %s6037_s17 = smov 0   ;;  %s6039_s18 = smov 0  }
   0x2   :  { %s6041_s19 = smov 0  }
   0x3 LB: > { %s23_s20 = sadd.s32 1, %s5998_s17  ;;  %s26_s21 = sadd.s32 1, %s6002_s18  ;;  %s6006_s19 = sphi %s6041_s19, %s14_s19   ;;  %s6002_s18 = sphi %s6039_s18, %s7787_s18   ;;  %s5998_s17 = sphi %s6037_s17, %s7786_s17   ;;  %s5994_s16 = sphi %s6035_s16, %s7785_s16   ;;  %s5990_s15 = sphi %s6033_s15, %s7784_s15  }
   0x4   : > { %p24_p0 = scmp.ge.s32.totalorder %s23_s20, 8  ;;  %p4232_p1 = scmp.ge.s32.totalorder %s6006_s19, 1 }
   0x5   : > { %p222_p2 = scmp.lt.s32.totalorder %s6006_s19, 17 }
   0x6   : > { %s7789_s20 = smov (%p24_p0, %s23_s20), 0  ;;  %s7791_s21 = smov (!%p24_p0, %s26_s21), %s6002_s18 }
   0x7   : > { %p223_p3 = pnand %p4232_p1, %p222_p2  ;;  %p28_p4 = scmp.ge.s32.totalorder %s7791_s21, 2 }
   0x8   : > { %p276_p5 = scmp.lt.s32.totalorder (!%p223_p3), %s5994_s16, 1  ;;  %p278_p6 = scmp.lt.s32.totalorder (!%p223_p3), %s5990_s15, 9 }
   0x9   : > { %s7793_s21 = smov (%p28_p4, %s7791_s21), 0  ;;  %226 = sbr.rel (%p223_p3) target bundleno = 735 (0x2df), region = 36 }
   0xa   : > { %s285_s11 = sadd.s32 (!%p223_p3), 1, %s5990_s15  ;;  %p309_p9 = scmp.lt.s32.totalorder (!%p223_p3), %s5990_s15, 7 }
   0xb   : > { %p288_p7 = scmp.lt.s32.totalorder (!%p223_p3), %s285_s11, 9 }
   0xe   : > { %v5534_v0 = vld [vmem:[%s7782_s3 + $0x78] sm:$0xff]  ;;  %v5533_v3 = vld [vmem:[%s7782_s3 + $0x70] sm:$0xff]  ;;  %s7795_s16 = smov (!%p276_p5, %s5994_s16), 1  ;;  %v5532_v6 = vld [vmem:[%s7782_s3 + $0x68] sm:$0xff]  ;;  %vm381_vm0 = vsmask.f32 7424 }
   0xf   : > { %v5526_v1 = vld [vmem:[%s7782_s3 + $0x38] sm:$0xff]  ;;  %479 = vmatpush.bf16.msra.mxu0 %v5534_v0  ;;  %5906 = vmatpush.bf16.msra.mxu3 %v5534_v0  ;;  %v5525_v4 = vld [vmem:[%s7782_s3 + $0x30] sm:$0xff]  ;;  %s279_s8 = scalar_select %p278_p6, %s5990_s15, 9  ;;  %v5524_v7 = vld [vmem:[%s7782_s3 + $0x28] sm:$0xff]  ;;  %vm618_vm1 = vcmask 1046528   ;;  %vm1049_vm3 = vcmask 1045504  }
  0x10   : > { %v5542_v2 = vld [vmem:[%s7782_s3 + $0xb8] sm:$0xff]  ;;  %561 = vmatpush.bf16.msra.mxu1 %v5526_v1  ;;  %v5541_v5 = vld [vmem:[%s7782_s3 + $0xb0] sm:$0xff]  ;;  %s6088_s9 = smul.u32 140, %s7795_s16  ;;  %v5540_v8 = vld [vmem:[%s7782_s3 + $0xa8] sm:$0xff]  ;;  %vm881_vm2 = vsmask.f32 6400 }
  0x11   : > { %683 = vmatpush.bf16.msra.mxu2 %v5542_v2  ;;  %s5922_s10 = smul.u32 14, %s279_s8  ;;  %v5531_v9 = vld [vmem:[%s7782_s3 + $0x60] sm:$0xff]  ;;  %v5530_v12 = vld [vmem:[%s7782_s3 + $0x58] sm:$0xff]  ;;  %v5529_v17 = vld [vmem:[%s7782_s3 + $0x50] sm:$0xff]  ;;  %vm1304_vm4 = vsmask.f32 5376 }
  0x12   : > { %v5523_v10 = vld [vmem:[%s7782_s3 + $0x20] sm:$0xff]  ;;  %v5522_v13 = vld [vmem:[%s7782_s3 + $0x18] sm:$0xff]  ;;  %v5521_v21 = vld [vmem:[%s7782_s3 + $0x10] sm:$0xff]  ;;  %vm1452_vm5 = vcmask 1044480   ;;  %s7797_s11 = smov (!%p288_p7, %s285_s11), 9  ;;  %s5927_s23 = smul.u32 80, %s7795_s16 }
  0x13   : > { %480 = vmatpush.bf16.msra.mxu0 %v5533_v3  ;;  %5907 = vmatpush.bf16.msra.mxu3 %v5533_v3  ;;  %s282_s24 = sadd.s32 %s6088_s9, %s5922_s10  ;;  %v5539_v11 = vld [vmem:[%s7782_s3 + $0xa0] sm:$0xff]  ;;  %v5538_v14 = vld [vmem:[%s7782_s3 + $0x98] sm:$0xff]  ;;  %v5537_v22 = vld [vmem:[%s7782_s3 + $0x90] sm:$0xff] }
  0x14   : > { %562 = vmatpush.bf16.msra.mxu1 %v5525_v4  ;;  %s4233_s25 = sshll.u32 %s282_s24, 2  ;;  %v5528_v26 = vld [vmem:[%s7782_s3 + $0x48] sm:$0xff]  ;;  %v5527_v33 = vld [vmem:[%s7782_s3 + $0x40] sm:$0xff]  ;;  %v5574_v42 = vld [vmem:[%s7782_s3 + $0x1b8] sm:$0xff]  ;;  %s296_s24 = sadd.s32 2, %s5990_s15 }
  0x15   : > { %684 = vmatpush.bf16.msra.mxu2 %v5541_v5  ;;  %s6112_s8 = scalar_lea.vmem %s7779_s0, %s4233_s25  ;;  %v5520_v31 = vld [vmem:[%s7782_s3 + $0x8] sm:$0xff]  ;;  %v5519_v38 = vld [vmem:[%s7782_s3] sm:$0xff]  ;;  %v5558_v43 = vld [vmem:[%s7782_s3 + $0x138] sm:$0xff]  ;;  %s5924_s25 = smul.u32 14, %s7797_s11 }
  0x16   : > { %v5736_v15 = vld [vmem:[%s6112_s8] sm:$0xff]   ;;  %v6125_v16 = vld [vmem:[%s6112_s8 + $0x10] sm:$0xff]   ;;  %v6131_v18 = vld [vmem:[%s6112_s8 + $0x8] sm:$0xff]   ;;  %p299_p8 = scmp.lt.s32.totalorder %s296_s24, 9  ;;  %s7801_s15 = smov (!%p309_p9, %s5990_s15), 7 }
  0x17   : > { %481 = vmatpush.bf16.msra.mxu0 %v5532_v6  ;;  %5908 = vmatpush.bf16.msra.mxu3 %v5532_v6  ;;  %v385_v19 = vshll.u32 %v5736_v15, 16  ;;  %v398_v20 = vshll.u32 %v6125_v16, 16  ;;  %v6141_v23 = vld [vmem:[%s6112_s8 + $0x18] sm:$0xff]   ;;  %v383_v24 = vshrl.u32 %v5736_v15, 16  ;;  %v390_v25 = vshll.u32 %v6131_v18, 16  ;;  %v5536_v32 = vld [vmem:[%s7782_s3 + $0x88] sm:$0xff]  ;;  %s292_s27 = sadd.s32 %s5924_s25, %s6088_s9 }
  0x18   : > { %563 = vmatpush.bf16.msra.mxu1 %v5524_v7  ;;  %v402_v29 = vshrl.u32 %v6125_v16, 16  ;;  %v406_v30 = vshll.u32 %v6141_v23, 16  ;;  %v5535_v39 = vld [vmem:[%s7782_s3 + $0x80] sm:$0xff]  ;;  %v619_v40 = vrot.slane %v5736_v15, 1  ;;  %v620_v41 = vrot.slane %v6131_v18, 1  ;;  %v5550_v47 = vld [vmem:[%s7782_s3 + $0xf8] sm:$0xff] }
  0x19   : > { %685 = vmatpush.bf16.msra.mxu2 %v5540_v8  ;;  %v387_v27 = vrot.slane %v385_v19, 1  ;;  %v6149_v28 = vrot.slane %v398_v20, 1  ;;  %v392_v35 = vrot.slane %v390_v25, 1  ;;  %v5566_v48 = vld [vmem:[%s7782_s3 + $0x178] sm:$0xff]  ;;  %v5557_v49 = vld [vmem:[%s7782_s3 + $0x130] sm:$0xff]  ;;  %v6198_v51 = vld [vmem:[%s6112_s8 + $0x20] sm:$0xff]  }
  0x1a   : > { %v408_v37 = vrot.slane %v406_v30, 1  ;;  %v621_v46 = vsel %vm618_vm1, %v619_v40, %v620_v41  ;;  %v5573_v50 = vld [vmem:[%s7782_s3 + $0x1b0] sm:$0xff]  ;;  %v5556_v54 = vld [vmem:[%s7782_s3 + $0x128] sm:$0xff]  ;;  %v394_v56 = vshrl.u32 %v6131_v18, 16  ;;  %v410_v57 = vshrl.u32 %v6141_v23, 16  ;;  %v5555_v61 = vld [vmem:[%s7782_s3 + $0x120] sm:$0xff] }
  0x1b   : > { %482 = vmatpush.bf16.msra.mxu0 %v5531_v9  ;;  %5909 = vmatpush.bf16.msra.mxu3 %v5531_v9  ;;  %v388_v34 = vor.u32 %v387_v27, %v383_v24  ;;  %v404_v36 = vor.u32 %v402_v29, %v6149_v28  ;;  %v5549_v52 = vld [vmem:[%s7782_s3 + $0xf0] sm:$0xff]  ;;  %v5572_v55 = vld [vmem:[%s7782_s3 + $0x1a8] sm:$0xff]  ;;  %v414_v58 = vshll.u32 %v6198_v51, 16  ;;  %v5571_v62 = vld [vmem:[%s7782_s3 + $0x1a0] sm:$0xff]  ;;  %v622_v3 = vrot.slane %v6125_v16, 1  ;;  %s4234_s6 = sshll.u32 %s292_s27, 2 }
  0x1c   : > { %564 = vmatpush.bf16.msra.mxu1 %v5523_v10  ;;  %v5565_v53 = vld [vmem:[%s7782_s3 + $0x170] sm:$0xff]  ;;  %v5548_v59 = vld [vmem:[%s7782_s3 + $0xe8] sm:$0xff]  ;;  %v396_v63 = vor.u32 %v394_v56, %v392_v35  ;;  %v412_v0 = vor.u32 %v410_v57, %v408_v37  ;;  %v5547_v4 = vld [vmem:[%s7782_s3 + $0xe0] sm:$0xff]  ;;  %s6541_s11 = scalar_lea.vmem %s7780_s1, %s4234_s6  ;;  %s7799_s24 = smov (!%p299_p8, %s296_s24), 9 }
  0x1d   : > { %686 = vmatpush.bf16.msra.mxu2 %v5539_v11  ;;  %v393_v44 = vsel %vm381_vm0, %v388_v34, %v392_v35  ;;  %v409_v45 = vsel %vm381_vm0, %v404_v36, %v408_v37  ;;  %v5564_v60 = vld [vmem:[%s7782_s3 + $0x168] sm:$0xff]  ;;  %v416_v1 = vrot.slane %v414_v58, 1  ;;  %v5554_v5 = vld [vmem:[%s7782_s3 + $0x118] sm:$0xff]  ;;  %v5563_v24 = vld [vmem:[%s7782_s3 + $0x160] sm:$0xff]  ;;  %s5925_s10 = smul.u32 14, %s7799_s24 }
  0x1e   : > { %v6234_v2 = vld [vmem:[%s6112_s8 + $0x28] sm:$0xff]   ;;  %v5570_v6 = vld [vmem:[%s7782_s3 + $0x198] sm:$0xff]  ;;  %v401_v8 = vsel %vm381_vm0, %v396_v63, %v6149_v28  ;;  %v5545_v27 = vld [vmem:[%s7782_s3 + $0xd0] sm:$0xff] }
  0x1f   : > { %483 = vmatpush.bf16.msra.mxu0 %v5530_v12  ;;  %5910 = vmatpush.bf16.msra.mxu3 %v5530_v12  ;;  %v6247_v7 = vunpack.c.l.bf16 %v6234_v2  ;;  %v417_v9 = vsel %vm381_vm0, %v412_v0, %v416_v1  ;;  %v6253_v10 = vld [vmem:[%s6112_s8 + $0x4] sm:$0xff]   ;;  %v6256_v11 = vld [vmem:[%s6112_s8 + $0xc] sm:$0xff]   ;;  %v623_v12 = vsel %vm618_vm1, %v620_v41, %v622_v3  ;;  %s303_s14 = sadd.s32 %s5925_s10, %s6088_s9 }
  0x20   : > { %565 = vmatpush.bf16.msra.mxu1 %v5522_v13  ;;  %v5546_v13 = vld [vmem:[%s7782_s3 + $0xd8] sm:$0xff]  ;;  %v886_v19 = vshll.u32 %v6253_v10, 16  ;;  %v5552_v28 = vld [vmem:[%s7782_s3 + $0x108] sm:$0xff]  ;;  %v5551_v40 = vld [vmem:[%s7782_s3 + $0x100] sm:$0xff]  ;;  %s4235_s28 = sshll.u32 %s303_s14, 2 }
  0x21   : > { %687 = vmatpush.bf16.msra.mxu2 %v5538_v14  ;;  %v5553_v14 = vld [vmem:[%s7782_s3 + $0x110] sm:$0xff]  ;;  %v5568_v34 = vld [vmem:[%s7782_s3 + $0x188] sm:$0xff]  ;;  %s7157_s30 = scalar_lea.vmem %s7781_s2, %s4235_s28 }
  0x22   : > { %v888_v36 = vrot.slane %v886_v19, 2  ;;  %v5606_v19 = vld [vmem:[%s7782_s3 + $0x2b8] sm:$0xff] }
  0x23   : > { %484 = vmatpush.bf16.msra.mxu0 %v5529_v17  ;;  %5911 = vmatpush.bf16.msra.mxu3 %v5529_v17  ;;  %v883_v17 = vshrl.u32 %v6253_v10, 16 }
  0x24   : > { %566 = vmatpush.bf16.msra.mxu1 %v5521_v21  ;;  %v891_v21 = vshrl.u32 %v6256_v11, 16 }
  0x25   : > { %688 = vmatpush.bf16.msra.mxu2 %v5537_v22  ;;  %v894_v22 = vshll.u32 %v6256_v11, 16  ;;  %v885_v35 = vrot.slane %v883_v17, 1 }
  0x26   : > { %v893_v37 = vrot.slane %v891_v21, 1  ;;  %v5581_v21 = vld [vmem:[%s7782_s3 + $0x1f0] sm:$0xff] }
  0x27   : > { %485 = vmatpush.bf16.msra.mxu0 %v5528_v26  ;;  %5912 = vmatpush.bf16.msra.mxu3 %v5528_v26  ;;  %v5569_v26 = vld [vmem:[%s7782_s3 + $0x190] sm:$0xff] }
  0x28   : > { %567 = vmatpush.bf16.msra.mxu1 %v5520_v31  ;;  %v5562_v31 = vld [vmem:[%s7782_s3 + $0x158] sm:$0xff] }
  0x29   : > { %689 = vmatpush.bf16.msra.mxu2 %v5536_v32  ;;  %v418_v32 = vshrl.u32 %v6198_v51, 16 }
  0x2b   : > { %486 = vmatpush.bf16.msra.mxu0 %v5527_v33  ;;  %5913 = vmatpush.bf16.msra.mxu3 %v5527_v33  ;;  %v420_v41 = vor.u32 %v418_v32, %v416_v1  ;;  %v5559_v1 = vld [vmem:[%s7782_s3 + $0x140] sm:$0xff] }
  0x2c   : > { %568 = vmatpush.bf16.msra.mxu1 %v5519_v38  ;;  %v896_v38 = vrot.slane %v894_v22, 2  ;;  %v5588_v22 = vld [vmem:[%s7782_s3 + $0x228] sm:$0xff] }
  0x2d   : > { %690 = vmatpush.bf16.msra.mxu2 %v5535_v39  ;;  %v5544_v39 = vld [vmem:[%s7782_s3 + $0xc8] sm:$0xff] }
  0x2e   : > { %487 = vmatmul.bf16.vlgmr.msra.gmra.mxu0 %v393_v44  ;;  %497 = vmatmul.bf16.vlgmr.msra.gmra.mxu3 %v409_v45  ;;  %v897_v44 = vor.u32 %v896_v38, %v893_v37  ;;  %v624_v45 = vrot.slane %v6141_v23, 1 }
  0x2f   : > { %988 = vmatpush.bf16.msrb.mxu0 %v5558_v43  ;;  %569 = vmatmul.bf16.vlgmr.msra.gmra.mxu1 %v5736_v15  ;;  %v6269_v15 = vpack.c.bf16 %v6247_v7, %v6247_v7  ;;  %v889_v43 = vor.u32 %v888_v36, %v885_v35 }
  0x30   : > { %691 = vmatmul.bf16.vlgmr.msra.gmra.mxu2 %v621_v46  ;;  %820 = vmatpush.bf16.msrb.mxu3 %v5550_v47  ;;  %v5543_v46 = vld [vmem:[%s7782_s3 + $0xc0] sm:$0xff] }
  0x31   : > { %1243 = vmatpush.bf16.msrb.mxu2 %v5574_v42  ;;  %1114 = vmatpush.bf16.msrb.mxu1 %v5566_v48  ;;  %v422_v33 = vshll.u32 %v6269_v15, 16  ;;  %v898_v48 = vsel %vm881_vm2, %v889_v43, %v897_v44  ;;  %v628_v36 = vrot.slane %v6269_v15, 1  ;;  %v5604_v43 = vld [vmem:[%s7782_s3 + $0x2a8] sm:$0xff] }
  0x33   : > { %989 = vmatpush.bf16.msrb.mxu0 %v5557_v49  ;;  %v424_v42 = vrot.slane %v422_v33, 1  ;;  %v6311_v49 = vld [vmem:[%s6112_s8 + $0x14] sm:$0xff]   ;;  %v5754_v33 = vunpack.c.h.bf16 %v6198_v51 }
  0x34   : > { %821 = vmatpush.bf16.msrb.mxu3 %v5549_v52  ;;  %v900_v52 = vshrl.u32 %v6311_v49, 16 }
  0x35   : > { %1244 = vmatpush.bf16.msrb.mxu2 %v5573_v50  ;;  %1115 = vmatpush.bf16.msrb.mxu1 %v5565_v53  ;;  %v425_v47 = vsel %vm381_vm0, %v420_v41, %v424_v42  ;;  %v625_v50 = vsel %vm618_vm1, %v622_v3, %v624_v45  ;;  %v903_v53 = vshll.u32 %v6311_v49, 16  ;;  %v756_v3 = vrot.slane %v6253_v10, 1  ;;  %v5586_v41 = vld [vmem:[%s7782_s3 + $0x218] sm:$0xff] }
  0x36   : > { %v902_v63 = vrot.slane %v900_v52, 1  ;;  %v6374_v37 = vpack.c.bf16 %v6247_v7, %v5754_v33  ;;  %v5598_v42 = vld [vmem:[%s7782_s3 + $0x278] sm:$0xff]  ;;  %v5584_v52 = vld [vmem:[%s7782_s3 + $0x208] sm:$0xff]  ;;  %v5575_v33 = vld [vmem:[%s7782_s3 + $0x1c0] sm:$0xff] }
  0x37   : > { %990 = vmatpush.bf16.msrb.mxu0 %v5556_v54  ;;  %v5590_v54 = vld [vmem:[%s7782_s3 + $0x238] sm:$0xff]  ;;  %v905_v0 = vrot.slane %v903_v53, 2 }
  0x38   : > { %822 = vmatpush.bf16.msrb.mxu3 %v5548_v59  ;;  %v5567_v59 = vld [vmem:[%s7782_s3 + $0x180] sm:$0xff]  ;;  %v918_v15 = vshrl.u32 %v6374_v37, 16  ;;  %v921_v7 = vshll.u32 %v6374_v37, 16 }
  0x39   : > { %1245 = vmatpush.bf16.msrb.mxu2 %v5572_v55  ;;  %1116 = vmatpush.bf16.msrb.mxu1 %v5564_v60  ;;  %v5561_v55 = vld [vmem:[%s7782_s3 + $0x150] sm:$0xff]  ;;  %v5582_v60 = vld [vmem:[%s7782_s3 + $0x1f8] sm:$0xff] }
  0x3b   : > { %991 = vmatpush.bf16.msrb.mxu0 %v5555_v61  ;;  %v5560_v61 = vld [vmem:[%s7782_s3 + $0x148] sm:$0xff] }
  0x3c   : > { %823 = vmatpush.bf16.msrb.mxu3 %v5547_v4  ;;  %v757_v4 = vrot.slane %v6256_v11, 1 }
  0x3d   : > { %1246 = vmatpush.bf16.msrb.mxu2 %v5571_v62  ;;  %1117 = vmatpush.bf16.msrb.mxu1 %v5563_v24  ;;  %v5589_v62 = vld [vmem:[%s7782_s3 + $0x230] sm:$0xff] }
  0x3e   : > { %492 = vmatmul.bf16.gmra.mxu0 %v401_v8  ;;  %502 = vmatmul.bf16.gmra.mxu3 %v417_v9  ;;  %v758_v8 = vsel %vm618_vm1, %v756_v3, %v757_v4  ;;  %v5605_v24 = vld [vmem:[%s7782_s3 + $0x2b0] sm:$0xff] }
  0x3f   : > { %992 = vmatpush.bf16.msrb.mxu0 %v5554_v5  ;;  %574 = vmatmul.bf16.gmra.mxu1 %v6131_v18  ;;  %v906_v5 = vor.u32 %v905_v0, %v902_v63  ;;  %v5583_v63 = vld [vmem:[%s7782_s3 + $0x200] sm:$0xff] }
  0x40   : > { %696 = vmatmul.bf16.gmra.mxu2 %v623_v12  ;;  %824 = vmatpush.bf16.msrb.mxu3 %v5546_v13  ;;  %v6346_v12 = vld [vmem:[%s6112_s8 + $0x1c] sm:$0xff]  }
  0x41   : > { %1247 = vmatpush.bf16.msrb.mxu2 %v5570_v6  ;;  %1118 = vmatpush.bf16.msrb.mxu1 %v5562_v31  ;;  %v626_v6 = vrot.slane %v6198_v51, 1  ;;  %v907_v9 = vsel %vm881_vm2, %v897_v44, %v906_v5  ;;  %v912_v17 = vshll.u32 %v6346_v12, 16  ;;  %v5585_v44 = vld [vmem:[%s7782_s3 + $0x210] sm:$0xff]  ;;  %v761_v53 = vrot.slane %v6346_v12, 1 }
  0x43   : > { %993 = vmatpush.bf16.msrb.mxu0 %v5553_v14  ;;  %v627_v13 = vsel %vm618_vm1, %v624_v45, %v626_v6  ;;  %v909_v14 = vshrl.u32 %v6346_v12, 16  ;;  %v914_v31 = vrot.slane %v912_v17, 2  ;;  %v5579_v45 = vld [vmem:[%s7782_s3 + $0x1e0] sm:$0xff] }
  0x44   : > { %825 = vmatpush.bf16.msrb.mxu3 %v5545_v27  ;;  %v5587_v27 = vld [vmem:[%s7782_s3 + $0x220] sm:$0xff] }
  0x45   : > { %1248 = vmatpush.bf16.msrb.mxu2 %v5569_v26  ;;  %1119 = vmatpush.bf16.msrb.mxu1 %v5561_v55  ;;  %v5580_v26 = vld [vmem:[%s7782_s3 + $0x1e8] sm:$0xff]  ;;  %v5758_v55 = vunpack.c.h.bf16 %v6234_v2 }
  0x47   : > { %994 = vmatpush.bf16.msrb.mxu0 %v5552_v28  ;;  %v911_v28 = vrot.slane %v909_v14, 1  ;;  %v6417_v3 = vpack.c.bf16 %v5758_v55, %v5758_v55  ;;  %v1186_v55 = vrot.slane %v6234_v2, 2 }
  0x48   : > { %826 = vmatpush.bf16.msrb.mxu3 %v5544_v39 }
  0x49   : > { %1249 = vmatpush.bf16.msrb.mxu2 %v5568_v34  ;;  %1120 = vmatpush.bf16.msrb.mxu1 %v5560_v61  ;;  %v759_v34 = vrot.slane %v6311_v49, 1  ;;  %v915_v35 = vor.u32 %v914_v31, %v911_v28  ;;  %v1179_v61 = vrot.slane %v6131_v18, 2  ;;  %v1053_v28 = vrot.slane %v6311_v49, 2 }
  0x4a   : > { %v1182_v31 = vrot.slane %v6141_v23, 2 }
  0x4b   : > { %995 = vmatpush.bf16.msrb.mxu0 %v5551_v40  ;;  %v760_v38 = vsel %vm618_vm1, %v757_v4, %v759_v34  ;;  %v916_v39 = vsel %vm881_vm2, %v906_v5, %v915_v35  ;;  %v629_v40 = vsel %vm618_vm1, %v626_v6, %v628_v36  ;;  %v762_v0 = vsel %vm618_vm1, %v759_v34, %v761_v53  ;;  %v5578_v4 = vld [vmem:[%s7782_s3 + $0x1d8] sm:$0xff] }
  0x4c   : > { %827 = vmatpush.bf16.msrb.mxu3 %v5543_v46  ;;  %v5597_v46 = vld [vmem:[%s7782_s3 + $0x270] sm:$0xff]  ;;  %v927_v5 = vshrl.u32 %v6417_v3, 16  ;;  %v930_v6 = vshll.u32 %v6417_v3, 16 }
  0x4d   : > { %1250 = vmatpush.bf16.msrb.mxu2 %v5567_v59  ;;  %1121 = vmatpush.bf16.msrb.mxu1 %v5559_v1  ;;  %v1050_v59 = vrot.slane %v6253_v10, 2 }
  0x4e   : > { %507 = vmatmul.bf16.gmra.mxu3 %v425_v47  ;;  %996 = vmatmul.bf16.vlgmr.msrb.gmra.mxu0 %v898_v48  ;;  %v5603_v47 = vld [vmem:[%s7782_s3 + $0x2a0] sm:$0xff]  ;;  %v920_v48 = vrot.slane %v918_v15, 1  ;;  %v929_v14 = vrot.slane %v927_v5, 1  ;;  %v932_v17 = vrot.slane %v930_v6, 2  ;;  %v1454_v15 = vrot.slane %v6125_v16, 3 }
  0x4f   : > { %579 = vmatmul.bf16.gmra.mxu1 %v6125_v16  ;;  %1517 = vmatpush.bf16.msra.mxu0 %v5590_v54 }
  0x50   : > { %701 = vmatmul.bf16.gmra.mxu2 %v625_v50  ;;  %1391 = vmatpush.bf16.msra.mxu3 %v5582_v60  ;;  %v923_v50 = vrot.slane %v921_v7, 2  ;;  %v1051_v60 = vrot.slane %v6256_v11, 2  ;;  %v1055_v7 = vrot.slane %v6346_v12, 2  ;;  %v5593_v12 = vld [vmem:[%s7782_s3 + $0x250] sm:$0xff] }
  0x51   : > { %1816 = vmatpush.bf16.msra.mxu2 %v5606_v19  ;;  %1657 = vmatpush.bf16.msra.mxu1 %v5598_v42  ;;  %v5576_v19 = vld [vmem:[%s7782_s3 + $0x1c8] sm:$0xff]  ;;  %v1184_v42 = vrot.slane %v6198_v51, 2 }
  0x52   : > { %v924_v54 = vor.u32 %v923_v50, %v920_v48  ;;  %v1052_v10 = vsel %vm1049_vm3, %v1050_v59, %v1051_v60  ;;  %v5599_v48 = vld [vmem:[%s7782_s3 + $0x280] sm:$0xff]  ;;  %v5592_v50 = vld [vmem:[%s7782_s3 + $0x248] sm:$0xff] }
  0x53   : > { %1518 = vmatpush.bf16.msra.mxu0 %v5589_v62  ;;  %v1180_v62 = vrot.slane %v6125_v16, 2  ;;  %v1056_v16 = vsel %vm1049_vm3, %v1053_v28, %v1055_v7  ;;  %v5591_v59 = vld [vmem:[%s7782_s3 + $0x240] sm:$0xff] }
  0x54   : > { %1392 = vmatpush.bf16.msra.mxu3 %v5581_v21  ;;  %v925_v1 = vsel %vm881_vm2, %v915_v35, %v924_v54  ;;  %v1306_v21 = vrot.slane %v390_v25, 3  ;;  %v1309_v25 = vrot.slane %v398_v20, 3  ;;  %v5595_v20 = vld [vmem:[%s7782_s3 + $0x260] sm:$0xff] }
  0x55   : > { %1817 = vmatpush.bf16.msra.mxu2 %v5605_v24  ;;  %1658 = vmatpush.bf16.msra.mxu1 %v5597_v46  ;;  %v1181_v11 = vsel %vm1049_vm3, %v1179_v61, %v1180_v62  ;;  %v933_v24 = vor.u32 %v932_v17, %v929_v14  ;;  %v5600_v46 = vld [vmem:[%s7782_s3 + $0x288] sm:$0xff]  ;;  %v1313_v14 = vrot.slane %v406_v30, 3  ;;  %v5613_v17 = vld [vmem:[%s7782_s3 + $0x2f0] sm:$0xff]  ;;  %v1458_v30 = vrot.slane %v6198_v51, 3 }
  0x57   : > { %1519 = vmatpush.bf16.msra.mxu0 %v5588_v22  ;;  %v763_v22 = vrot.slane %v6374_v37, 1  ;;  %v934_v35 = vsel %vm881_vm2, %v924_v54, %v933_v24  ;;  %v1057_v54 = vrot.slane %v6374_v37, 2  ;;  %v328_v37 = vld [vmem:[%s6112_s8 + $0x30] sm:$0xf]  ;;  %v5620_v24 = vld [vmem:[%s7782_s3 + $0x328] sm:$0xff] }
  0x58   : > { %1393 = vmatpush.bf16.msra.mxu3 %v5580_v26  ;;  %v1308_v26 = vrot.slane %v402_v29, 2  ;;  %v1054_v29 = vsel %vm1049_vm3, %v1051_v60, %v1053_v28 }
  0x59   : > { %1818 = vmatpush.bf16.msra.mxu2 %v5604_v43  ;;  %v764_v34 = vsel %vm618_vm1, %v761_v53, %v763_v22  ;;  %v1456_v53 = vrot.slane %v6141_v23, 3 }
  0x5a   : > { %v6456_v36 = vor.u32 %v1309_v25, %v1308_v26  ;;  %v1059_v26 = vrot.slane %v6417_v3, 2 }
  0x5b   : > { %1520 = vmatpush.bf16.msra.mxu0 %v5587_v27  ;;  %v1305_v27 = vrot.slane %v394_v56, 2  ;;  %v1183_v56 = vsel %vm1049_vm3, %v1180_v62, %v1182_v31  ;;  %v1457_v61 = vsel %vm1452_vm5, %v1454_v15, %v1456_v53 }
  0x5c   : > { %1394 = vmatpush.bf16.msra.mxu3 %v5579_v45  ;;  %v5594_v45 = vld [vmem:[%s7782_s3 + $0x258] sm:$0xff] }
  0x5d   : > { %1819 = vmatpush.bf16.msra.mxu2 %v5603_v47  ;;  %v1307_v49 = vor.u32 %v1306_v21, %v1305_v27  ;;  %v5622_v47 = vld [vmem:[%s7782_s3 + $0x338] sm:$0xff] }
  0x5e   : > { %828 = vmatmul.bf16.vlgmr.msrb.gmra.mxu3 %v758_v8  ;;  %1001 = vmatmul.bf16.gmra.mxu0 %v907_v9  ;;  %v5596_v8 = vld [vmem:[%s7782_s3 + $0x268] sm:$0xff]  ;;  %v5602_v9 = vld [vmem:[%s7782_s3 + $0x298] sm:$0xff] }
  0x5f   : > { %584 = vmatmul.bf16.gmra.mxu1 %v6141_v23  ;;  %1521 = vmatpush.bf16.msra.mxu0 %v5586_v41  ;;  %v1453_v41 = vrot.slane %v6131_v18, 3  ;;  %v1185_v18 = vsel %vm1049_vm3, %v1182_v31, %v1184_v42 }
  0x60   : > { %706 = vmatmul.bf16.gmra.mxu2 %v627_v13  ;;  %1395 = vmatpush.bf16.msra.mxu3 %v5578_v4  ;;  %v5577_v13 = vld [vmem:[%s7782_s3 + $0x1d0] sm:$0xff]  ;;  %v341_v4 = vunpack.c.l.bf16 %v328_v37 }
  0x61   : > { %1659 = vmatpush.bf16.msra.mxu1 %v5596_v8  ;;  %1820 = vmatpush.bf16.msra.mxu2 %v5602_v9 }
  0x62   : > { %v6524_v21 = vpack.c.bf16 %v341_v4, %v341_v4  ;;  %v5629_v4 = vld [vmem:[%s7782_s3 + $0x370] sm:$0xff] }
  0x63   : > { %1522 = vmatpush.bf16.msra.mxu0 %v5585_v44  ;;  %v1455_v44 = vsel %vm1452_vm5, %v1453_v41, %v1454_v15  ;;  %v6566_v15 = vld [vmem:[%s6541_s11 + $0x8] sm:$0xff]  }
  0x64   : > { %1396 = vmatpush.bf16.msra.mxu3 %v5577_v13  ;;  %v1312_v13 = vrot.slane %v410_v57, 2  ;;  %v5637_v57 = vld [vmem:[%s7782_s3 + $0x3b0] sm:$0xff]  ;;  %v1188_v27 = vrot.slane %v6524_v21, 2 }
  0x65   : > { %1660 = vmatpush.bf16.msra.mxu1 %v5595_v20  ;;  %v6554_v20 = vld [vmem:[%s6541_s11] sm:$0xff]  }
  0x66   : > { %v1314_v23 = vor.u32 %v1313_v14, %v1312_v13  ;;  %v1321_v13 = vshrl.u32 %v6234_v2, 16 }
  0x67   : > { %1523 = vmatpush.bf16.msra.mxu0 %v5584_v52  ;;  %v5614_v52 = vld [vmem:[%s7782_s3 + $0x2f8] sm:$0xff] }
  0x68   : > { %1397 = vmatpush.bf16.msra.mxu3 %v5576_v19 }
  0x69   : > { %1661 = vmatpush.bf16.msra.mxu1 %v5594_v45  ;;  %v1316_v45 = vrot.slane %v418_v32, 2 }
  0x6b   : > { %1524 = vmatpush.bf16.msra.mxu0 %v5583_v63  ;;  %v1058_v63 = vsel %vm1049_vm3, %v1055_v7, %v1057_v54 }
  0x6c   : > { %1398 = vmatpush.bf16.msra.mxu3 %v5575_v33  ;;  %v5619_v33 = vld [vmem:[%s7782_s3 + $0x320] sm:$0xff] }
  0x6d   : > { %1662 = vmatpush.bf16.msra.mxu1 %v5593_v12 }
  0x6e   : > { %833 = vmatmul.bf16.gmra.mxu3 %v760_v38  ;;  %1006 = vmatmul.bf16.gmra.mxu0 %v916_v39  ;;  %v1311_v38 = vsel %vm1304_vm4, %v1307_v49, %v6456_v36  ;;  %v5601_v39 = vld [vmem:[%s7782_s3 + $0x290] sm:$0xff]  ;;  %v1189_v49 = vsel %vm1049_vm3, %v1186_v55, %v1188_v27 }
  0x6f   : > { %589 = vmatmul.bf16.gmra.mxu1 %v6198_v51  ;;  %1821 = vmatpush.bf16.msra.mxu2 %v5601_v39  ;;  %v5612_v39 = vld [vmem:[%s7782_s3 + $0x2e8] sm:$0xff]  ;;  %v5611_v51 = vld [vmem:[%s7782_s3 + $0x2e0] sm:$0xff] }
  0x70   : > { %711 = vmatmul.bf16.gmra.mxu2 %v629_v40  ;;  %v765_v40 = vrot.slane %v6417_v3, 1  ;;  %2084 = vmatpush.bf16.msrb.mxu0 %v5622_v47  ;;  %v1315_v3 = vsel %vm1304_vm4, %v6456_v36, %v1314_v23  ;;  %v5618_v36 = vld [vmem:[%s7782_s3 + $0x318] sm:$0xff]  ;;  %v1720_v47 = vshrl.u32 %v6554_v20, 16 }
  0x71   : > { %1947 = vmatpush.bf16.msrb.mxu3 %v5614_v52  ;;  %1663 = vmatpush.bf16.msra.mxu1 %v5592_v50  ;;  %v1727_v50 = vshll.u32 %v6566_v15, 16 }
  0x72   : > { %v766_v43 = vsel %vm618_vm1, %v763_v22, %v765_v40  ;;  %v1722_v40 = vshll.u32 %v6554_v20, 16 }
  0x73   : > { %1822 = vmatpush.bf16.msra.mxu2 %v5600_v46  ;;  %v1317_v46 = vrot.slane %v414_v58, 3  ;;  %v5616_v58 = vld [vmem:[%s7782_s3 + $0x308] sm:$0xff] }
  0x75   : > { %1664 = vmatpush.bf16.msra.mxu1 %v5591_v59  ;;  %1948 = vmatpush.bf16.msrb.mxu3 %v5613_v17  ;;  %v1318_v32 = vor.u32 %v1317_v46, %v1316_v45  ;;  %v6622_v17 = vld [vmem:[%s6541_s11 + $0x10] sm:$0xff]  }
  0x76   : > { %v1735_v27 = vshll.u32 %v6622_v17, 16 }
  0x77   : > { %1823 = vmatpush.bf16.msra.mxu2 %v5599_v48  ;;  %v1724_v48 = vrot.slane %v1722_v40, 1 }
  0x79   : > { %1949 = vmatpush.bf16.msrb.mxu3 %v5612_v39  ;;  %v5607_v39 = vld [vmem:[%s7782_s3 + $0x2c0] sm:$0xff] }
  0x7d   : > { %1950 = vmatpush.bf16.msrb.mxu3 %v5611_v51 }
  0x7e   : > { %838 = vmatmul.bf16.gmra.mxu3 %v762_v0  ;;  %1011 = vmatmul.bf16.gmra.mxu0 %v925_v1  ;;  %v1187_v0 = vsel %vm1049_vm3, %v1184_v42, %v1186_v55  ;;  %v5617_v42 = vld [vmem:[%s7782_s3 + $0x310] sm:$0xff]  ;;  %v1729_v55 = vrot.slane %v1727_v50, 1 }
  0x7f   : > { %1122 = vmatmul.bf16.vlgmr.msrb.gmra.mxu1 %v1052_v10  ;;  %v5621_v10 = vld [vmem:[%s7782_s3 + $0x330] sm:$0xff] }
  0x80   : > { %1251 = vmatmul.bf16.vlgmr.msrb.gmra.mxu2 %v1181_v11  ;;  %v5638_v11 = vld [vmem:[%s7782_s3 + $0x3b8] sm:$0xff]  ;;  %2085 = vmatpush.bf16.msrb.mxu0 %v5621_v10 }
  0x81   : > { %2376 = vmatpush.bf16.msrb.mxu2 %v5638_v11 }
  0x84   : > { %2086 = vmatpush.bf16.msrb.mxu0 %v5620_v24 }
  0x85   : > { %2377 = vmatpush.bf16.msrb.mxu2 %v5637_v57 }
  0x88   : > { %2087 = vmatpush.bf16.msrb.mxu0 %v5619_v33  ;;  %v5628_v33 = vld [vmem:[%s7782_s3 + $0x368] sm:$0xff] }
  0x8c   : > { %2088 = vmatpush.bf16.msrb.mxu0 %v5618_v36 }
  0x8e   : > { %843 = vmatmul.bf16.gmra.mxu3 %v764_v34  ;;  %1016 = vmatmul.bf16.gmra.mxu0 %v934_v35  ;;  %v1459_v35 = vsel %vm1452_vm5, %v1456_v53, %v1458_v30  ;;  %v1460_v53 = vrot.slane %v6234_v2, 3 }
  0x8f   : > { %1127 = vmatmul.bf16.gmra.mxu1 %v1054_v29 }
  0x90   : > { %1256 = vmatmul.bf16.gmra.mxu2 %v1183_v56  ;;  %v1060_v56 = vsel %vm1049_vm3, %v1057_v54, %v1059_v26  ;;  %2089 = vmatpush.bf16.msrb.mxu0 %v5617_v42  ;;  %v1725_v54 = vor.u32 %v1724_v48, %v1720_v47  ;;  %v6671_v48 = vld [vmem:[%s6541_s11 + $0x18] sm:$0xff]  }
  0x92   : > { %v1730_v10 = vsel %vm381_vm0, %v1725_v54, %v1729_v55  ;;  %v6679_v54 = vld [vmem:[%s6541_s11 + $0x4] sm:$0xff]  }
  0x94   : > { %2090 = vmatpush.bf16.msrb.mxu0 %v5616_v58 }
  0x9e   : > { %848 = vmatmul.bf16.gmra.mxu3 %v766_v43  ;;  %1525 = vmatmul.bf16.vlgmr.msra.gmra.mxu0 %v1455_v44 }
  0x9f   : > { %1132 = vmatmul.bf16.gmra.mxu1 %v1056_v16  ;;  %v5630_v16 = vld [vmem:[%s7782_s3 + $0x378] sm:$0xff] }
  0xa0   : > { %1261 = vmatmul.bf16.gmra.mxu2 %v1185_v18  ;;  %v5636_v18 = vld [vmem:[%s7782_s3 + $0x3a8] sm:$0xff]  ;;  %2251 = vmatpush.bf16.msrb.mxu1 %v5630_v16  ;;  %v1330_v16 = vshrl.u32 %v6524_v21, 16 }
  0xa1   : > { %2378 = vmatpush.bf16.msrb.mxu2 %v5636_v18  ;;  %v1333_v18 = vshll.u32 %v6524_v21, 16 }
  0xa4   : > { %2252 = vmatpush.bf16.msrb.mxu1 %v5629_v4 }
  0xa8   : > { %2253 = vmatpush.bf16.msrb.mxu1 %v5628_v33 }
  0xab   : > { %v488_v60 = vpop.f32.mrf.mxu0 }
  0xac   : > { %v570_v62 = vpop.f32.mrf.mxu1 }
  0xad   : > { %v571_v1 = vadd.f32 %v570_v62, %v488_v60 }
  0xae   : > { %1399 = vmatmul.bf16.vlgmr.msra.gmra.mxu3 %v1311_v38  ;;  %1530 = vmatmul.bf16.gmra.mxu0 %v1457_v61  ;;  %v5615_v61 = vld [vmem:[%s7782_s3 + $0x300] sm:$0xff] }
  0xaf   : > { %1137 = vmatmul.bf16.gmra.mxu1 %v1058_v63  ;;  %2091 = vmatpush.bf16.msrb.mxu0 %v5615_v61  ;;  %v1739_v61 = vshrl.u32 %v6622_v17, 16 }
  0xb0   : > { %1266 = vmatmul.bf16.gmra.mxu2 %v1187_v0  ;;  %v1319_v0 = vsel %vm1304_vm4, %v1314_v23, %v1318_v32  ;;  %v1323_v23 = vrot.slane %v1321_v13, 2 }
  0xb1   : > { %v6513_v5 = vpop.f32.mrf.mxu3 }
  0xb3   : > { %v692_v6 = vpop.f32.mrf.mxu2  ;;  %v490_v9 = vpop.f32.mrf.mxu0 }
  0xb4   : > { %v6515_v8 = vadd.f32 %v692_v6, %v571_v1  ;;  %v572_v19 = vpop.f32.mrf.mxu1  ;;  %v1461_v1 = vsel %vm1452_vm5, %v1458_v30, %v1460_v53  ;;  %v5635_v6 = vld [vmem:[%s7782_s3 + $0x3a0] sm:$0xff] }
  0xb5   : > { %v573_v22 = vadd.f32 %v572_v19, %v490_v9  ;;  %v5610_v9 = vld [vmem:[%s7782_s3 + $0x2d8] sm:$0xff]  ;;  %2379 = vmatpush.bf16.msrb.mxu2 %v5635_v6 }
  0xb6   : > { %1951 = vmatpush.bf16.msrb.mxu3 %v5610_v9 }
  0xb9   : > { %v6536_v28 = vpop.f32.mrf.mxu3 }
  0xbb   : > { %v694_v31 = vpop.f32.mrf.mxu2  ;;  %v493_v34 = vpop.f32.mrf.mxu0 }
  0xbc   : > { %v6546_v25 = vadd.f32 %v694_v31, %v573_v22  ;;  %v575_v29 = vpop.f32.mrf.mxu1  ;;  %v5609_v22 = vld [vmem:[%s7782_s3 + $0x2d0] sm:$0xff] }
  0xbd   : > { %v576_v38 = vadd.f32 %v575_v29, %v493_v34  ;;  %1952 = vmatpush.bf16.msrb.mxu3 %v5609_v22  ;;  %v5634_v34 = vld [vmem:[%s7782_s3 + $0x398] sm:$0xff]  ;;  %v1462_v29 = vrot.slane %v6524_v21, 3  ;;  %v1332_v21 = vrot.slane %v1330_v16, 2 }
  0xbe   : > { %1404 = vmatmul.bf16.gmra.mxu3 %v1315_v3  ;;  %1535 = vmatmul.bf16.gmra.mxu0 %v1459_v35  ;;  %v5608_v3 = vld [vmem:[%s7782_s3 + $0x2c8] sm:$0xff]  ;;  %v5646_v16 = vld [vmem:[%s7782_s3 + $0x3f8] sm:$0xff] }
  0xbf   : > { %1142 = vmatmul.bf16.gmra.mxu1 %v1060_v56  ;;  %2380 = vmatpush.bf16.msrb.mxu2 %v5634_v34  ;;  %v1737_v56 = vrot.slane %v1735_v27, 1  ;;  %v1463_v42 = vsel %vm1452_vm5, %v1460_v53, %v1462_v29  ;;  %v1335_v53 = vrot.slane %v1333_v18, 3  ;;  %v1884_v18 = vrot.slane %v6566_v15, 1 }
  0xc0   : > { %1271 = vmatmul.bf16.gmra.mxu2 %v1189_v49 }
  0xc1   : > { %v6563_v41 = vpop.f32.mrf.mxu3  ;;  %1953 = vmatpush.bf16.msrb.mxu3 %v5608_v3  ;;  %v1741_v4 = vor.u32 %v1739_v61, %v1737_v56  ;;  %v6716_v3 = vld [vmem:[%s6541_s11 + $0x20] sm:$0xff]  }
  0xc3   : > { %v697_v7 = vpop.f32.mrf.mxu2  ;;  %v495_v44 = vpop.f32.mrf.mxu0 }
  0xc4   : > { %v6571_v43 = vadd.f32 %v697_v7, %v576_v38  ;;  %v577_v12 = vpop.f32.mrf.mxu1 }
  0xc5   : > { %v578_v52 = vadd.f32 %v577_v12, %v495_v44  ;;  %1954 = vmatpush.bf16.msrb.mxu3 %v5607_v39  ;;  %v5627_v12 = vld [vmem:[%s7782_s3 + $0x360] sm:$0xff] }
  0xc6   : > { %2254 = vmatpush.bf16.msrb.mxu1 %v5627_v12 }
  0xc9   : > { %v6594_v59 = vpop.f32.mrf.mxu3  ;;  %2505 = vmatpush.bf16.msra.mxu3 %v5646_v16  ;;  %v5651_v16 = vld [vmem:[%s7782_s3 + $0x420] sm:$0xff] }
  0xcb   : > { %v699_v60 = vpop.f32.mrf.mxu2  ;;  %v6601_v63 = vpop.f32.mrf.mxu0 }
  0xcc   : > { %v6599_v62 = vadd.f32 %v699_v60, %v578_v52  ;;  %v580_v37 = vpop.f32.mrf.mxu1 }
  0xcd   : > { %v581_v11 = vadd.f32 %v580_v37, %v6513_v5  ;;  %v1324_v5 = vshll.u32 %v6234_v2, 16  ;;  %v1731_v2 = vshrl.u32 %v6566_v15, 16  ;;  %v1336_v37 = vor.u32 %v1335_v53, %v1332_v21 }
  0xce   : > { %1409 = vmatmul.bf16.gmra.mxu3 %v1319_v0  ;;  %1540 = vmatmul.bf16.gmra.mxu0 %v1461_v1  ;;  %v1743_v0 = vshll.u32 %v6671_v48, 16 }
  0xcf   : > { %1665 = vmatmul.bf16.vlgmr.msra.gmra.mxu1 %v6554_v20  ;;  %v1326_v30 = vrot.slane %v1324_v5, 3 }
  0xd0   : > { %1824 = vmatmul.bf16.vlgmr.msra.gmra.mxu2 %v1730_v10  ;;  %v2020_v10 = vrot.slane %v6679_v54, 1  ;;  %v1745_v6 = vrot.slane %v1743_v0, 1 }
  0xd1   : > { %v6619_v14 = vpop.f32.mrf.mxu3  ;;  %v1327_v35 = vor.u32 %v1326_v30, %v1323_v23  ;;  %v5626_v23 = vld [vmem:[%s7782_s3 + $0x358] sm:$0xff]  ;;  %v5632_v30 = vld [vmem:[%s7782_s3 + $0x388] sm:$0xff] }
  0xd2   : > { %2255 = vmatpush.bf16.msrb.mxu1 %v5626_v23 }
  0xd3   : > { %v702_v19 = vpop.f32.mrf.mxu2  ;;  %v6629_v57 = vpop.f32.mrf.mxu0  ;;  %v1328_v7 = vsel %vm1304_vm4, %v1318_v32, %v1327_v35 }
  0xd4   : > { %v6627_v24 = vadd.f32 %v702_v19, %v581_v11  ;;  %v582_v26 = vpop.f32.mrf.mxu1 }
  0xd5   : > { %v583_v31 = vadd.f32 %v582_v26, %v6536_v28  ;;  %v1733_v28 = vor.u32 %v1731_v2, %v1729_v55  ;;  %v6682_v55 = vld [vmem:[%s6541_s11 + $0xc] sm:$0xff]  }
  0xd6   : > { %v2021_v11 = vrot.slane %v6682_v55, 1 }
  0xd7   : > { %v1738_v45 = vsel %vm381_vm0, %v1733_v28, %v1737_v56  ;;  %v6727_v56 = vld [vmem:[%s6541_s11 + $0x14] sm:$0xff]  }
  0xd8   : > { %v2022_v22 = vsel %vm618_vm1, %v2020_v10, %v2021_v11  ;;  %v2023_v12 = vrot.slane %v6727_v56, 1 }
  0xd9   : > { %v6648_v49 = vpop.f32.mrf.mxu3 }
  0xdb   : > { %v704_v38 = vpop.f32.mrf.mxu2  ;;  %v6655_v40 = vpop.f32.mrf.mxu0 }
  0xdc   : > { %v6653_v36 = vadd.f32 %v704_v38, %v583_v31  ;;  %v585_v44 = vpop.f32.mrf.mxu1  ;;  %v5654_v38 = vld [vmem:[%s7782_s3 + $0x438] sm:$0xff] }
  0xdd   : > { %v586_v46 = vadd.f32 %v585_v44, %v6563_v41  ;;  %v5633_v41 = vld [vmem:[%s7782_s3 + $0x390] sm:$0xff]  ;;  %2652 = vmatpush.bf16.msra.mxu0 %v5654_v38  ;;  %v1886_v38 = vrot.slane %v6622_v17, 1 }
  0xde   : > { %1414 = vmatmul.bf16.gmra.mxu3 %v1328_v7  ;;  %1545 = vmatmul.bf16.gmra.mxu0 %v1463_v42  ;;  %v1747_v7 = vshrl.u32 %v6671_v48, 16  ;;  %v1751_v42 = vshll.u32 %v6716_v3, 16 }
  0xdf   : > { %1670 = vmatmul.bf16.gmra.mxu1 %v6566_v15  ;;  %2381 = vmatpush.bf16.msrb.mxu2 %v5633_v41 }
  0xe0   : > { %1829 = vmatmul.bf16.gmra.mxu2 %v1738_v45  ;;  %v5631_v45 = vld [vmem:[%s7782_s3 + $0x380] sm:$0xff]  ;;  %v1753_v41 = vrot.slane %v1751_v42, 1 }
  0xe1   : > { %v829_v47 = vpop.f32.mrf.mxu3 }
  0xe2   : > { %v854_v51 = vadd.f32 %v829_v47, %v6515_v8 }
  0xe3   : > { %v707_v52 = vpop.f32.mrf.mxu2  ;;  %v6676_v32 = vpop.f32.mrf.mxu0  ;;  %2382 = vmatpush.bf16.msrb.mxu2 %v5632_v30  ;;  %v6792_v30 = vld [vmem:[%s6541_s11 + $0x1c] sm:$0xff]  }
  0xe4   : > { %v6674_v58 = vadd.f32 %v707_v52, %v586_v46  ;;  %v587_v60 = vpop.f32.mrf.mxu1  ;;  %v6687_v1 = vadd.f32 %v6601_v63, %v854_v51  ;;  %v5624_v46 = vld [vmem:[%s7782_s3 + $0x348] sm:$0xff] }
  0xe5   : > { %v588_v8 = vadd.f32 %v587_v60, %v6594_v59  ;;  %v1337_v59 = vsel %vm1304_vm4, %v1327_v35, %v1336_v37  ;;  %v6755_v52 = vld [vmem:[%s6541_s11 + $0x28] sm:$0xff]   ;;  %v2024_v37 = vsel %vm618_vm1, %v2021_v11, %v2023_v12  ;;  %v5670_v11 = vld [vmem:[%s7782_s3 + $0x4b8] sm:$0xff] }
  0xe7   : > { %2383 = vmatpush.bf16.msrb.mxu2 %v5631_v45 }
  0xe9   : > { %v831_v9 = vpop.f32.mrf.mxu3 }
  0xea   : > { %v855_v5 = vadd.f32 %v831_v9, %v6546_v25  ;;  %v1746_v25 = vsel %vm381_vm0, %v1741_v4, %v1745_v6 }
  0xeb   : > { %v709_v13 = vpop.f32.mrf.mxu2  ;;  %v6699_v63 = vpop.f32.mrf.mxu0  ;;  %2917 = vmatpush.bf16.msra.mxu2 %v5670_v11  ;;  %v5649_v11 = vld [vmem:[%s7782_s3 + $0x410] sm:$0xff] }
  0xec   : > { %v6697_v19 = vadd.f32 %v709_v13, %v588_v8  ;;  %v590_v26 = vpop.f32.mrf.mxu1  ;;  %v6711_v31 = vadd.f32 %v6629_v57, %v855_v5  ;;  %v5625_v57 = vld [vmem:[%s7782_s3 + $0x350] sm:$0xff] }
  0xed   : > { %v591_v33 = vadd.f32 %v590_v26, %v6619_v14  ;;  %2256 = vmatpush.bf16.msrb.mxu1 %v5625_v57  ;;  %v5653_v13 = vld [vmem:[%s7782_s3 + $0x430] sm:$0xff] }
  0xee   : > { %1419 = vmatmul.bf16.gmra.mxu3 %v1337_v59  ;;  %2092 = vmatmul.bf16.vlgmr.msrb.gmra.mxu0 %v2022_v22  ;;  %v5645_v26 = vld [vmem:[%s7782_s3 + $0x3f0] sm:$0xff] }
  0xef   : > { %1675 = vmatmul.bf16.gmra.mxu1 %v6622_v17  ;;  %2653 = vmatpush.bf16.msra.mxu0 %v5653_v13  ;;  %v5669_v57 = vld [vmem:[%s7782_s3 + $0x4b0] sm:$0xff] }
  0xf0   : > { %1834 = vmatmul.bf16.gmra.mxu2 %v1746_v25  ;;  %2506 = vmatpush.bf16.msra.mxu3 %v5645_v26 }
  0xf1   : > { %v834_v34 = vpop.f32.mrf.mxu3  ;;  %2257 = vmatpush.bf16.msrb.mxu1 %v5624_v46  ;;  %2918 = vmatpush.bf16.msra.mxu2 %v5669_v57 }
  0xf2   : > { %v856_v29 = vadd.f32 %v834_v34, %v6571_v43 }
  0xf3   : > { %v712_v35 = vpop.f32.mrf.mxu2  ;;  %v6724_v14 = vpop.f32.mrf.mxu0 }
  0xf4   : > { %v6722_v28 = vadd.f32 %v712_v35, %v591_v33  ;;  %v592_v39 = vpop.f32.mrf.mxu1  ;;  %v6735_v43 = vadd.f32 %v6655_v40, %v856_v29  ;;  %v1883_v40 = vrot.slane %v6554_v20, 1  ;;  %v5623_v20 = vld [vmem:[%s7782_s3 + $0x340] sm:$0xff]  ;;  %v1755_v33 = vshrl.u32 %v6716_v3, 16  ;;  %v5652_v29 = vld [vmem:[%s7782_s3 + $0x428] sm:$0xff] }
  0xf5   : > { %v593_v44 = vadd.f32 %v592_v39, %v6648_v49  ;;  %v1749_v49 = vor.u32 %v1747_v7, %v1745_v6  ;;  %v6769_v6 = vunpack.c.l.bf16 %v6755_v52  ;;  %2258 = vmatpush.bf16.msrb.mxu1 %v5623_v20  ;;  %v2025_v39 = vrot.slane %v6792_v30, 1  ;;  %2654 = vmatpush.bf16.msra.mxu0 %v5652_v29 }
  0xf6   : > { %v1885_v8 = vsel %vm618_vm1, %v1883_v40, %v1884_v18 }
  0xf7   : > { %v1754_v4 = vsel %vm381_vm0, %v1749_v49, %v1753_v41 }
  0xf9   : > { %v836_v47 = vpop.f32.mrf.mxu3  ;;  %2655 = vmatpush.bf16.msra.mxu0 %v5651_v16 }
  0xfa   : > { %v857_v21 = vadd.f32 %v836_v47, %v6599_v62  ;;  %v1887_v47 = vsel %vm618_vm1, %v1884_v18, %v1886_v38  ;;  %v5650_v18 = vld [vmem:[%s7782_s3 + $0x418] sm:$0xff] }
  0xfb   : > { %v714_v51 = vpop.f32.mrf.mxu2  ;;  %v6763_v60 = vpop.f32.mrf.mxu0 }
  0xfc   : > { %v6761_v53 = vadd.f32 %v714_v51, %v593_v44  ;;  %v1123_v10 = vpop.f32.mrf.mxu1  ;;  %v6772_v62 = vadd.f32 %v6676_v32, %v857_v21  ;;  %v6784_v32 = vpack.c.bf16 %v6769_v6, %v6769_v6 }
  0xfd   : > { %v1148_v9 = vadd.f32 %v1123_v10, %v6687_v1  ;;  %v2157_v10 = vshll.u32 %v6682_v55, 16  ;;  %2656 = vmatpush.bf16.msra.mxu0 %v5650_v18 }
  0xfe   : > { %1955 = vmatmul.bf16.vlgmr.msrb.gmra.mxu3 %v1885_v8  ;;  %2097 = vmatmul.bf16.gmra.mxu0 %v2024_v37  ;;  %v1759_v34 = vshll.u32 %v6784_v32, 16  ;;  %v5644_v8 = vld [vmem:[%s7782_s3 + $0x3e8] sm:$0xff]  ;;  %v2149_v37 = vshll.u32 %v6679_v54, 16 }
  0xff   : > { %1680 = vmatmul.bf16.gmra.mxu1 %v6671_v48  ;;  %2507 = vmatpush.bf16.msra.mxu3 %v5644_v8  ;;  %v2159_v57 = vrot.slane %v2157_v10, 2  ;;  %v5661_v10 = vld [vmem:[%s7782_s3 + $0x470] sm:$0xff] }
 0x100   : > { %1839 = vmatmul.bf16.gmra.mxu2 %v1754_v4  ;;  %v1761_v44 = vrot.slane %v1759_v34, 1 }
 0x101   : > { %v839_v5 = vpop.f32.mrf.mxu3  ;;  %2657 = vmatpush.bf16.msra.mxu0 %v5649_v11  ;;  %v2163_v11 = vshrl.u32 %v6727_v56, 16 }
 0x102   : > { %v858_v1 = vadd.f32 %v839_v5, %v6627_v24 }
 0x103   : > { %v1252_v59 = vpop.f32.mrf.mxu2  ;;  %v6789_v23 = vpop.f32.mrf.mxu0 }
 0x104   : > { %v6787_v22 = vadd.f32 %v1252_v59, %v1148_v9  ;;  %v1125_v25 = vpop.f32.mrf.mxu1  ;;  %v6800_v35 = vadd.f32 %v6699_v63, %v858_v1  ;;  %v1757_v63 = vor.u32 %v1755_v33, %v1753_v41  ;;  %v2026_v41 = vsel %vm618_vm1, %v2023_v12, %v2025_v39 }
 0x105   : > { %v1149_v24 = vadd.f32 %v1125_v25, %v6711_v31  ;;  %v5778_v12 = vunpack.c.h.bf16 %v6716_v3  ;;  %v5662_v25 = vld [vmem:[%s7782_s3 + $0x478] sm:$0xff] }
 0x106   : > { %2777 = vmatpush.bf16.msra.mxu1 %v5662_v25 }
 0x107   : > { %v6849_v5 = vpack.c.bf16 %v6769_v6, %v5778_v12 }
 0x109   : > { %v841_v31 = vpop.f32.mrf.mxu3 }
 0x10a   : > { %v859_v45 = vadd.f32 %v841_v31, %v6653_v36  ;;  %v1762_v36 = vsel %vm381_vm0, %v1757_v63, %v1761_v44  ;;  %v5643_v44 = vld [vmem:[%s7782_s3 + $0x3e0] sm:$0xff]  ;;  %v5648_v31 = vld [vmem:[%s7782_s3 + $0x408] sm:$0xff]  ;;  %2778 = vmatpush.bf16.msra.mxu1 %v5661_v10 }
 0x10b   : > { %v1254_v46 = vpop.f32.mrf.mxu2  ;;  %v6819_v49 = vpop.f32.mrf.mxu0  ;;  %2508 = vmatpush.bf16.msra.mxu3 %v5643_v44  ;;  %2658 = vmatpush.bf16.msra.mxu0 %v5648_v31  ;;  %v2165_v31 = vrot.slane %v2163_v11, 1 }
 0x10c   : > { %v6817_v40 = vadd.f32 %v1254_v46, %v1149_v24  ;;  %v1128_v51 = vpop.f32.mrf.mxu1  ;;  %v6829_v21 = vadd.f32 %v6724_v14, %v859_v45  ;;  %v2146_v14 = vshrl.u32 %v6679_v54, 16  ;;  %v2151_v24 = vrot.slane %v2149_v37, 2 }
 0x10d   : > { %v1150_v20 = vadd.f32 %v1128_v51, %v6735_v43  ;;  %v2154_v43 = vshrl.u32 %v6682_v55, 16  ;;  %v1888_v45 = vrot.slane %v6671_v48, 1  ;;  %v2027_v46 = vrot.slane %v6849_v5, 1 }
 0x10e   : > { %1960 = vmatmul.bf16.gmra.mxu3 %v1887_v47  ;;  %2102 = vmatmul.bf16.gmra.mxu0 %v2026_v41  ;;  %v2148_v26 = vrot.slane %v2146_v14, 1  ;;  %v2313_v47 = vrot.slane %v6682_v55, 2  ;;  %v2567_v41 = vrot.slane %v1727_v50, 3  ;;  %v2566_v51 = vrot.slane %v1731_v2, 2 }
 0x10f   : > { %1685 = vmatmul.bf16.gmra.mxu1 %v6716_v3  ;;  %v2156_v29 = vrot.slane %v2154_v43, 1  ;;  %v1889_v2 = vsel %vm618_vm1, %v1886_v38, %v1888_v45  ;;  %v2172_v55 = vshrl.u32 %v6792_v30, 16 }
 0x110   : > { %1844 = vmatmul.bf16.gmra.mxu2 %v1762_v36  ;;  %v2570_v36 = vrot.slane %v1735_v27, 3  ;;  %v2028_v27 = vsel %vm618_vm1, %v2025_v39, %v2027_v46  ;;  %v5667_v39 = vld [vmem:[%s7782_s3 + $0x4a0] sm:$0xff] }
 0x111   : > { %v844_v4 = vpop.f32.mrf.mxu3  ;;  %v6873_v16 = vor.u32 %v2159_v57, %v2156_v29  ;;  %v2174_v11 = vrot.slane %v2172_v55, 1  ;;  %v2319_v55 = vrot.slane %v6849_v5, 2 }
 0x112   : > { %v860_v9 = vadd.f32 %v844_v4, %v6674_v58  ;;  %v5668_v58 = vld [vmem:[%s7782_s3 + $0x4a8] sm:$0xff]  ;;  %v2568_v4 = vor.u32 %v2567_v41, %v2566_v51  ;;  %v5666_v51 = vld [vmem:[%s7782_s3 + $0x498] sm:$0xff] }
 0x113   : > { %v1257_v13 = vpop.f32.mrf.mxu2  ;;  %v6853_v59 = vpop.f32.mrf.mxu0  ;;  %2919 = vmatpush.bf16.msra.mxu2 %v5668_v58 }
 0x114   : > { %v6851_v1 = vadd.f32 %v1257_v13, %v1150_v20  ;;  %v1130_v34 = vpop.f32.mrf.mxu1  ;;  %v6862_v6 = vadd.f32 %v6763_v60, %v860_v9  ;;  %v2152_v60 = vor.u32 %v2151_v24, %v2148_v26  ;;  %v2569_v20 = vrot.slane %v1739_v61, 2  ;;  %v5641_v24 = vld [vmem:[%s7782_s3 + $0x3d0] sm:$0xff] }
 0x115   : > { %v1151_v63 = vadd.f32 %v1130_v34, %v6772_v62  ;;  %v2312_v62 = vrot.slane %v6679_v54, 2  ;;  %v5647_v54 = vld [vmem:[%s7782_s3 + $0x400] sm:$0xff]  ;;  %v2166_v26 = vshll.u32 %v6727_v56, 16 }
 0x116   : > { %2659 = vmatpush.bf16.msra.mxu0 %v5647_v54  ;;  %v6918_v9 = vor.u32 %v2570_v36, %v2569_v20  ;;  %v5640_v36 = vld [vmem:[%s7782_s3 + $0x3c8] sm:$0xff]  ;;  %v1890_v20 = vrot.slane %v6716_v3, 1 }
 0x117   : > { %v2314_v37 = vsel %vm1049_vm3, %v2312_v62, %v2313_v47  ;;  %2920 = vmatpush.bf16.msra.mxu2 %v5667_v39 }
 0x118   : > { %v6926_v13 = vsel %vm1304_vm4, %v2568_v4, %v6918_v9 }
 0x119   : > { %v846_v8 = vpop.f32.mrf.mxu3 }
 0x11a   : > { %v861_v18 = vadd.f32 %v846_v8, %v6697_v19  ;;  %v2161_v19 = vsel %vm881_vm2, %v2152_v60, %v6873_v16  ;;  %v2168_v60 = vrot.slane %v2166_v26, 2 }
 0x11b   : > { %v1259_v12 = vpop.f32.mrf.mxu2  ;;  %v6891_v50 = vpop.f32.mrf.mxu0  ;;  %2921 = vmatpush.bf16.msra.mxu2 %v5666_v51 }
 0x11c   : > { %v6889_v14 = vadd.f32 %v1259_v12, %v1151_v63  ;;  %v1133_v61 = vpop.f32.mrf.mxu1  ;;  %v6909_v43 = vadd.f32 %v6789_v23, %v861_v18  ;;  %v5642_v23 = vld [vmem:[%s7782_s3 + $0x3d8] sm:$0xff] }
 0x11d   : > { %v1152_v38 = vadd.f32 %v1133_v61, %v6800_v35  ;;  %v5782_v35 = vunpack.c.h.bf16 %v6755_v52  ;;  %2509 = vmatpush.bf16.msra.mxu3 %v5642_v23 }
 0x11e   : > { %1965 = vmatmul.bf16.gmra.mxu3 %v1889_v2  ;;  %2107 = vmatmul.bf16.gmra.mxu0 %v2028_v27  ;;  %v5639_v2 = vld [vmem:[%s7782_s3 + $0x3c0] sm:$0xff] }
 0x11f   : > { %2259 = vmatmul.bf16.vlgmr.msrb.gmra.mxu1 %v2161_v19  ;;  %v6938_v63 = vpack.c.bf16 %v5782_v35, %v5782_v35  ;;  %v1891_v19 = vsel %vm618_vm1, %v1888_v45, %v1890_v20  ;;  %v5659_v45 = vld [vmem:[%s7782_s3 + $0x460] sm:$0xff] }
 0x120   : > { %2384 = vmatmul.bf16.vlgmr.msrb.gmra.mxu2 %v2314_v37 }
 0x121   : > { %v849_v25 = vpop.f32.mrf.mxu3  ;;  %2510 = vmatpush.bf16.msra.mxu3 %v5641_v24  ;;  %v2029_v8 = vrot.slane %v6938_v63, 1 }
 0x122   : > { %v862_v58 = vadd.f32 %v849_v25, %v6722_v28  ;;  %v5660_v28 = vld [vmem:[%s7782_s3 + $0x468] sm:$0xff] }
 0x123   : > { %v1262_v34 = vpop.f32.mrf.mxu2  ;;  %v6936_v57 = vpop.f32.mrf.mxu0  ;;  %2779 = vmatpush.bf16.msra.mxu1 %v5660_v28 }
 0x124   : > { %v6934_v29 = vadd.f32 %v1262_v34, %v1152_v38  ;;  %v1135_v44 = vpop.f32.mrf.mxu1  ;;  %v1030_v62 = vadd.f32 %v6819_v49, %v862_v58  ;;  %v2169_v49 = vor.u32 %v2168_v60, %v2165_v31  ;;  %v1892_v34 = vrot.slane %v6784_v32, 1  ;;  %v5664_v32 = vld [vmem:[%s7782_s3 + $0x488] sm:$0xff] }
 0x125   : > { %v1153_v41 = vadd.f32 %v1135_v44, %v6829_v21  ;;  %v2315_v21 = vrot.slane %v6727_v56, 2  ;;  %2511 = vmatpush.bf16.msra.mxu3 %v5640_v36  ;;  %v2030_v56 = vsel %vm618_vm1, %v2027_v46, %v2029_v8  ;;  %v5665_v46 = vld [vmem:[%s7782_s3 + $0x490] sm:$0xff]  ;;  %v2317_v44 = vrot.slane %v6792_v30, 2 }
 0x126   : > { %2922 = vmatpush.bf16.msra.mxu2 %v5665_v46  ;;  %v1893_v51 = vsel %vm618_vm1, %v1890_v20, %v1892_v34  ;;  %v2181_v20 = vshrl.u32 %v6849_v5, 16 }
 0x127   : > { %v2316_v38 = vsel %vm1049_vm3, %v2313_v47, %v2315_v21  ;;  %2780 = vmatpush.bf16.msra.mxu1 %v5659_v45  ;;  %v2318_v36 = vsel %vm1049_vm3, %v2315_v21, %v2317_v44  ;;  %v2441_v45 = vrot.slane %v6566_v15, 2 }
 0x129   : > { %v851_v18 = vpop.f32.mrf.mxu3  ;;  %2512 = vmatpush.bf16.msra.mxu3 %v5639_v2  ;;  %v2574_v2 = vrot.slane %v1743_v0, 3  ;;  %v5656_v0 = vld [vmem:[%s7782_s3 + $0x448] sm:$0xff] }
 0x12a   : > { %v863_v12 = vadd.f32 %v851_v18, %v6761_v53  ;;  %v2170_v53 = vsel %vm881_vm2, %v6873_v16, %v2169_v49  ;;  %v2175_v16 = vshll.u32 %v6792_v30, 16  ;;  %2923 = vmatpush.bf16.msra.mxu2 %v5664_v32  ;;  %v2184_v18 = vshll.u32 %v6849_v5, 16 }
 0x12b   : > { %v1264_v54 = vpop.f32.mrf.mxu2  ;;  %v6960_v61 = vpop.f32.mrf.mxu0 }
 0x12c   : > { %v6958_v27 = vadd.f32 %v1264_v54, %v1153_v41  ;;  %v1138_v37 = vpop.f32.mrf.mxu1  ;;  %v1031_v10 = vadd.f32 %v6853_v59, %v863_v12  ;;  %v2177_v26 = vrot.slane %v2175_v16, 2 }
 0x12d   : > { %v1154_v39 = vadd.f32 %v1138_v37, %v6862_v6  ;;  %v2186_v37 = vrot.slane %v2184_v18, 2 }
 0x12e   : > { %1970 = vmatmul.bf16.gmra.mxu3 %v1891_v19  ;;  %2112 = vmatmul.bf16.gmra.mxu0 %v2030_v56  ;;  %v2178_v24 = vor.u32 %v2177_v26, %v2174_v11  ;;  %v5686_v19 = vld [vmem:[%s7782_s3 + $0x538] sm:$0xff] }
 0x12f   : > { %2264 = vmatmul.bf16.gmra.mxu1 %v2170_v53  ;;  %3207 = vmatpush.bf16.msrb.mxu0 %v5686_v19  ;;  %v5683_v19 = vld [vmem:[%s7782_s3 + $0x520] sm:$0xff] }
 0x130   : > { %2389 = vmatmul.bf16.gmra.mxu2 %v2316_v38  ;;  %v2179_v30 = vsel %vm881_vm2, %v2169_v49, %v2178_v24 }
 0x131   : > { %v1400_v59 = vpop.f32.mrf.mxu3 }
 0x132   : > { %v1425_v47 = vadd.f32 %v1400_v59, %v6787_v22 }
 0x133   : > { %v1267_v6 = vpop.f32.mrf.mxu2  ;;  %v6986_v23 = vpop.f32.mrf.mxu0 }
 0x134   : > { %v6984_v4 = vadd.f32 %v1267_v6, %v1154_v39  ;;  %v1140_v35 = vpop.f32.mrf.mxu1  ;;  %v6989_v25 = vadd.f32 %v6891_v50, %v1425_v47  ;;  %v5658_v50 = vld [vmem:[%s7782_s3 + $0x458] sm:$0xff]  ;;  %v5655_v47 = vld [vmem:[%s7782_s3 + $0x440] sm:$0xff] }
 0x135   : > { %v1155_v58 = vadd.f32 %v1140_v35, %v6909_v43  ;;  %2781 = vmatpush.bf16.msra.mxu1 %v5658_v50  ;;  %v5678_v39 = vld [vmem:[%s7782_s3 + $0x4f8] sm:$0xff] }
 0x136   : > { %3076 = vmatpush.bf16.msrb.mxu3 %v5678_v39 }
 0x139   : > { %v1402_v31 = vpop.f32.mrf.mxu3 }
 0x13a   : > { %v1426_v22 = vadd.f32 %v1402_v31, %v6817_v40  ;;  %v2320_v31 = vsel %vm1049_vm3, %v2317_v44, %v2319_v55 }
 0x13b   : > { %v1269_v60 = vpop.f32.mrf.mxu2  ;;  %v6997_v28 = vpop.f32.mrf.mxu0 }
 0x13c   : > { %v6995_v41 = vadd.f32 %v1269_v60, %v1155_v58  ;;  %v1143_v43 = vpop.f32.mrf.mxu1  ;;  %v7009_v40 = vadd.f32 %v6936_v57, %v1426_v22  ;;  %v5657_v57 = vld [vmem:[%s7782_s3 + $0x450] sm:$0xff] }
 0x13d   : > { %v1156_v8 = vadd.f32 %v1143_v43, %v1030_v62  ;;  %2782 = vmatpush.bf16.msra.mxu1 %v5657_v57  ;;  %v5685_v22 = vld [vmem:[%s7782_s3 + $0x530] sm:$0xff]  ;;  %v2577_v43 = vrot.slane %v1755_v33, 2  ;;  %v5684_v33 = vld [vmem:[%s7782_s3 + $0x528] sm:$0xff]  ;;  %v2321_v57 = vrot.slane %v6938_v63, 2 }
 0x13e   : > { %1975 = vmatmul.bf16.gmra.mxu3 %v1893_v51  ;;  %2660 = vmatmul.bf16.vlgmr.msra.gmra.mxu0 %v6926_v13  ;;  %v2573_v13 = vrot.slane %v1747_v7, 2  ;;  %v5663_v7 = vld [vmem:[%s7782_s3 + $0x480] sm:$0xff] }
 0x13f   : > { %2269 = vmatmul.bf16.gmra.mxu1 %v2179_v30  ;;  %2924 = vmatpush.bf16.msra.mxu2 %v5663_v7  ;;  %v2578_v30 = vrot.slane %v1751_v42, 3  ;;  %v5701_v42 = vld [vmem:[%s7782_s3 + $0x5b0] sm:$0xff]  ;;  %v2322_v7 = vsel %vm1049_vm3, %v2319_v55, %v2321_v57 }
 0x140   : > { %2394 = vmatmul.bf16.gmra.mxu2 %v2318_v36  ;;  %v2575_v46 = vor.u32 %v2574_v2, %v2573_v13  ;;  %3208 = vmatpush.bf16.msrb.mxu0 %v5685_v22  ;;  %v5677_v36 = vld [vmem:[%s7782_s3 + $0x4f0] sm:$0xff]  ;;  %v5675_v22 = vld [vmem:[%s7782_s3 + $0x4e0] sm:$0xff] }
 0x141   : > { %v1405_v12 = vpop.f32.mrf.mxu3  ;;  %2783 = vmatpush.bf16.msra.mxu1 %v5656_v0  ;;  %3077 = vmatpush.bf16.msrb.mxu3 %v5677_v36 }
 0x142   : > { %v1427_v49 = vadd.f32 %v1405_v12, %v6851_v1  ;;  %v2183_v1 = vrot.slane %v2181_v20, 1  ;;  %v2576_v58 = vsel %vm1304_vm4, %v6918_v9, %v2575_v46  ;;  %v5702_v9 = vld [vmem:[%s7782_s3 + $0x5b8] sm:$0xff] }
 0x143   : > { %v1272_v54 = vpop.f32.mrf.mxu2  ;;  %v7020_v21 = vpop.f32.mrf.mxu0  ;;  %3511 = vmatpush.bf16.msrb.mxu2 %v5702_v9  ;;  %v5680_v9 = vld [vmem:[%s7782_s3 + $0x508] sm:$0xff] }
 0x144   : > { %v7018_v62 = vadd.f32 %v1272_v54, %v1156_v8  ;;  %v1145_v56 = vpop.f32.mrf.mxu1  ;;  %v7030_v53 = vadd.f32 %v6960_v61, %v1427_v49  ;;  %v2442_v61 = vrot.slane %v6622_v17, 2  ;;  %v2444_v54 = vrot.slane %v6671_v48, 2  ;;  %3209 = vmatpush.bf16.msrb.mxu0 %v5684_v33 }
 0x145   : > { %v1157_v38 = vadd.f32 %v1145_v56, %v1031_v10  ;;  %v2187_v10 = vor.u32 %v2186_v37, %v2183_v1  ;;  %2784 = vmatpush.bf16.msra.mxu1 %v5655_v47  ;;  %v7093_v49 = vor.u32 %v2578_v30, %v2577_v43  ;;  %v5679_v30 = vld [vmem:[%s7782_s3 + $0x500] sm:$0xff] }
 0x146   : > { %v2443_v26 = vsel %vm1049_vm3, %v2441_v45, %v2442_v61  ;;  %v2445_v37 = vsel %vm1049_vm3, %v2442_v61, %v2444_v54  ;;  %v5676_v45 = vld [vmem:[%s7782_s3 + $0x4e8] sm:$0xff]  ;;  %v5682_v61 = vld [vmem:[%s7782_s3 + $0x518] sm:$0xff] }
 0x147   : > { %v2188_v5 = vsel %vm881_vm2, %v2178_v24, %v2187_v10  ;;  %v2190_v24 = vshrl.u32 %v6938_v63, 16  ;;  %3512 = vmatpush.bf16.msrb.mxu2 %v5701_v42  ;;  %3078 = vmatpush.bf16.msrb.mxu3 %v5676_v45  ;;  %v5698_v45 = vld [vmem:[%s7782_s3 + $0x598] sm:$0xff] }
 0x148   : > { %3210 = vmatpush.bf16.msrb.mxu0 %v5683_v19 }
 0x149   : > { %v1407_v16 = vpop.f32.mrf.mxu3  ;;  %v2192_v20 = vrot.slane %v2190_v24, 1  ;;  %v2446_v24 = vrot.slane %v6716_v3, 2 }
 0x14a   : > { %v1428_v6 = vadd.f32 %v1407_v16, %v6889_v14  ;;  %v5681_v16 = vld [vmem:[%s7782_s3 + $0x510] sm:$0xff] }
 0x14b   : > { %v1274_v59 = vpop.f32.mrf.mxu2  ;;  %v7050_v11 = vpop.f32.mrf.mxu0  ;;  %3079 = vmatpush.bf16.msrb.mxu3 %v5675_v22  ;;  %v5697_v22 = vld [vmem:[%s7782_s3 + $0x590] sm:$0xff] }
 0x14c   : > { %v7048_v35 = vadd.f32 %v1274_v59, %v1157_v38  ;;  %v1666_v34 = vpop.f32.mrf.mxu1  ;;  %v7058_v14 = vadd.f32 %v6986_v23, %v1428_v6  ;;  %v2193_v23 = vshll.u32 %v6938_v63, 16  ;;  %v2580_v38 = vsel %vm1304_vm4, %v2575_v46, %v7093_v49  ;;  %3211 = vmatpush.bf16.msrb.mxu0 %v5682_v61  ;;  %v5672_v61 = vld [vmem:[%s7782_s3 + $0x4c8] sm:$0xff] }
 0x14d   : > { %v1691_v60 = vadd.f32 %v1666_v34, %v6989_v25  ;;  %v2582_v46 = vshrl.u32 %v6755_v52, 16 }
 0x14e   : > { %2513 = vmatmul.bf16.vlgmr.msra.gmra.mxu3 %v2443_v26  ;;  %2665 = vmatmul.bf16.gmra.mxu0 %v2576_v58  ;;  %v2195_v18 = vrot.slane %v2193_v23, 2  ;;  %v5694_v58 = vld [vmem:[%s7782_s3 + $0x578] sm:$0xff] }
 0x14f   : > { %2274 = vmatmul.bf16.gmra.mxu1 %v2188_v5  ;;  %v2584_v47 = vrot.slane %v2582_v46, 2  ;;  %v2448_v46 = vrot.slane %v6755_v52, 2 }
 0x150   : > { %2399 = vmatmul.bf16.gmra.mxu2 %v2320_v31  ;;  %v1573_v31 = vld [vmem:[%s6541_s11 + $0x30] sm:$0xf]  ;;  %3212 = vmatpush.bf16.msrb.mxu0 %v5681_v16 }
 0x151   : > { %v1410_v44 = vpop.f32.mrf.mxu3  ;;  %3344 = vmatpush.bf16.msrb.mxu1 %v5694_v58 }
 0x152   : > { %v1429_v25 = vadd.f32 %v1410_v44, %v6934_v29  ;;  %v2713_v44 = vrot.slane %v6566_v15, 3 }
 0x153   : > { %v1825_v51 = vpop.f32.mrf.mxu2  ;;  %v7072_v32 = vpop.f32.mrf.mxu0 }
 0x154   : > { %v7070_v50 = vadd.f32 %v1825_v51, %v1691_v60  ;;  %v1668_v8 = vpop.f32.mrf.mxu1  ;;  %v7082_v29 = vadd.f32 %v6997_v28, %v1429_v25  ;;  %v2196_v28 = vor.u32 %v2195_v18, %v2192_v20  ;;  %3213 = vmatpush.bf16.msrb.mxu0 %v5680_v9 }
 0x155   : > { %v1692_v12 = vadd.f32 %v1668_v8, %v7009_v40 }
 0x158   : > { %3214 = vmatpush.bf16.msrb.mxu0 %v5679_v30  ;;  %v2718_v30 = vrot.slane %v6716_v3, 3  ;;  %v5696_v3 = vld [vmem:[%s7782_s3 + $0x588] sm:$0xff] }
 0x159   : > { %v1412_v40 = vpop.f32.mrf.mxu3 }
 0x15a   : > { %v1430_v13 = vadd.f32 %v1412_v40, %v6958_v27  ;;  %v2197_v27 = vsel %vm881_vm2, %v2187_v10, %v2196_v28  ;;  %v5674_v28 = vld [vmem:[%s7782_s3 + $0x4d8] sm:$0xff] }
 0x15b   : > { %v1827_v2 = vpop.f32.mrf.mxu2  ;;  %v7102_v1 = vpop.f32.mrf.mxu0  ;;  %3080 = vmatpush.bf16.msrb.mxu3 %v5674_v28 }
 0x15c   : > { %v7100_v56 = vadd.f32 %v1827_v2, %v1692_v12  ;;  %v1671_v63 = vpop.f32.mrf.mxu1  ;;  %v7112_v0 = vadd.f32 %v7020_v21, %v1430_v13  ;;  %v2585_v21 = vshll.u32 %v6755_v52, 16  ;;  %v7179_v12 = vld [vmem:[%s7157_s30] sm:$0xff]   ;;  %v5673_v2 = vld [vmem:[%s7782_s3 + $0x4d0] sm:$0xff] }
 0x15d   : > { %v1693_v39 = vadd.f32 %v1671_v63, %v7030_v53 }
 0x15e   : > { %2518 = vmatmul.bf16.gmra.mxu3 %v2445_v37  ;;  %2670 = vmatmul.bf16.gmra.mxu0 %v2580_v38  ;;  %v2587_v26 = vrot.slane %v2585_v21, 3 }
 0x15f   : > { %2279 = vmatmul.bf16.gmra.mxu1 %v2197_v27  ;;  %3081 = vmatpush.bf16.msrb.mxu3 %v5673_v2  ;;  %v5689_v2 = vld [vmem:[%s7782_s3 + $0x550] sm:$0xff] }
 0x160   : > { %2404 = vmatmul.bf16.gmra.mxu2 %v2322_v7  ;;  %v7150_v23 = vor.u32 %v2587_v26, %v2584_v47  ;;  %v2449_v26 = vsel %vm1049_vm3, %v2446_v24, %v2448_v46 }
 0x161   : > { %v1415_v53 = vpop.f32.mrf.mxu3 }
 0x162   : > { %v1431_v10 = vadd.f32 %v1415_v53, %v6984_v4  ;;  %v5700_v4 = vld [vmem:[%s7782_s3 + $0x5a8] sm:$0xff]  ;;  %v2589_v8 = vsel %vm1304_vm4, %v7093_v49, %v7150_v23  ;;  %v5699_v49 = vld [vmem:[%s7782_s3 + $0x5a0] sm:$0xff] }
 0x163   : > { %v1830_v55 = vpop.f32.mrf.mxu2  ;;  %v7129_v6 = vpop.f32.mrf.mxu0  ;;  %3513 = vmatpush.bf16.msrb.mxu2 %v5700_v4  ;;  %3082 = vmatpush.bf16.msrb.mxu3 %v5672_v61  ;;  %v5688_v61 = vld [vmem:[%s7782_s3 + $0x548] sm:$0xff] }
 0x164   : > { %v7127_v59 = vadd.f32 %v1830_v55, %v1693_v39  ;;  %v1673_v34 = vpop.f32.mrf.mxu1  ;;  %v7139_v5 = vadd.f32 %v7050_v11, %v1431_v10  ;;  %v1586_v11 = vunpack.c.l.bf16 %v1573_v31  ;;  %v5671_v55 = vld [vmem:[%s7782_s3 + $0x4c0] sm:$0xff] }
 0x165   : > { %v1694_v60 = vadd.f32 %v1673_v34, %v7058_v14  ;;  %v2714_v14 = vrot.slane %v6622_v17, 3  ;;  %v2447_v17 = vsel %vm1049_vm3, %v2444_v54, %v2446_v24  ;;  %v5693_v54 = vld [vmem:[%s7782_s3 + $0x570] sm:$0xff]  ;;  %v7229_v34 = vld [vmem:[%s7157_s30 + $0x8] sm:$0xff]  }
 0x166   : > { %3345 = vmatpush.bf16.msrb.mxu1 %v5693_v54 }
 0x167   : > { %v2715_v18 = vsel %vm1452_vm5, %v2713_v44, %v2714_v14  ;;  %3514 = vmatpush.bf16.msrb.mxu2 %v5699_v49  ;;  %3083 = vmatpush.bf16.msrb.mxu3 %v5671_v55 }
 0x169   : > { %v1417_v25 = vpop.f32.mrf.mxu3 }
 0x16a   : > { %v1432_v51 = vadd.f32 %v1417_v25, %v6995_v41  ;;  %v7175_v41 = vpack.c.bf16 %v1586_v11, %v1586_v11  ;;  %v3143_v25 = vrot.slane %v7179_v12, 1 }
 0x16b   : > { %v1832_v43 = vpop.f32.mrf.mxu2  ;;  %v7165_v15 = vpop.f32.mrf.mxu0  ;;  %3515 = vmatpush.bf16.msrb.mxu2 %v5698_v45 }
 0x16c   : > { %v7163_v36 = vadd.f32 %v1832_v43, %v1694_v60  ;;  %v1676_v20 = vpop.f32.mrf.mxu1  ;;  %v7182_v33 = vadd.f32 %v7072_v32, %v1432_v51  ;;  %v2591_v32 = vshrl.u32 %v7175_v41, 16  ;;  %v5691_v60 = vld [vmem:[%s7782_s3 + $0x560] sm:$0xff]  ;;  %v2450_v51 = vrot.slane %v7175_v41, 2 }
 0x16d   : > { %v1695_v42 = vadd.f32 %v1676_v20, %v7082_v29  ;;  %v2594_v29 = vshll.u32 %v7175_v41, 16  ;;  %v3144_v43 = vrot.slane %v7229_v34, 1 }
 0x16e   : > { %2523 = vmatmul.bf16.gmra.mxu3 %v2447_v17  ;;  %2675 = vmatmul.bf16.gmra.mxu0 %v2589_v8  ;;  %v2593_v38 = vrot.slane %v2591_v32, 2 }
 0x16f   : > { %2785 = vmatmul.bf16.vlgmr.msra.gmra.mxu1 %v2715_v18  ;;  %v2596_v63 = vrot.slane %v2594_v29, 3  ;;  %3516 = vmatpush.bf16.msrb.mxu2 %v5697_v22  ;;  %v2982_v29 = vshll.u32 %v7179_v12, 16 }
 0x170   : > { %2925 = vmatmul.bf16.vlgmr.msra.gmra.mxu2 %v7179_v12 }
 0x171   : > { %v1420_v57 = vpop.f32.mrf.mxu3  ;;  %v2597_v21 = vor.u32 %v2596_v63, %v2593_v38  ;;  %v2984_v38 = vrot.slane %v2982_v29, 1 }
 0x172   : > { %v1433_v40 = vadd.f32 %v1420_v57, %v7018_v62  ;;  %v5692_v62 = vld [vmem:[%s7782_s3 + $0x568] sm:$0xff] }
 0x173   : > { %v1835_v13 = vpop.f32.mrf.mxu2  ;;  %v2095_v37 = vpop.f32.mrf.mxu0  ;;  %3346 = vmatpush.bf16.msrb.mxu1 %v5692_v62  ;;  %v2598_v58 = vsel %vm1304_vm4, %v7150_v23, %v2597_v21  ;;  %3517 = vmatpush.bf16.msrb.mxu2 %v5696_v3 }
 0x174   : > { %v7201_v19 = vadd.f32 %v1835_v13, %v1695_v42  ;;  %v1678_v27 = vpop.f32.mrf.mxu1  ;;  %v1559_v7 = vadd.f32 %v7102_v1, %v1433_v40  ;;  %v2716_v1 = vrot.slane %v6671_v48, 3  ;;  %v5690_v42 = vld [vmem:[%s7782_s3 + $0x558] sm:$0xff] }
 0x175   : > { %v1696_v39 = vadd.f32 %v1678_v27, %v7112_v0 }
 0x176   : > { %v2717_v4 = vsel %vm1452_vm5, %v2714_v14, %v2716_v1  ;;  %v2719_v49 = vsel %vm1452_vm5, %v2716_v1, %v2718_v30 }
 0x177   : > { %3347 = vmatpush.bf16.msrb.mxu1 %v5691_v60  ;;  %v7314_v60 = vld [vmem:[%s7157_s30 + $0x18] sm:$0xff]  }
 0x179   : > { %v1422_v0 = vpop.f32.mrf.mxu3 }
 0x17a   : > { %v1434_v53 = vadd.f32 %v1422_v0, %v7048_v35 }
 0x17b   : > { %v1837_v10 = vpop.f32.mrf.mxu2  ;;  %v2098_v47 = vpop.f32.mrf.mxu0  ;;  %3348 = vmatpush.bf16.msrb.mxu1 %v5690_v42  ;;  %v2722_v42 = vrot.slane %v7175_v41, 3 }
 0x17c   : > { %v7220_v16 = vadd.f32 %v1837_v10, %v1696_v39  ;;  %v1681_v48 = vpop.f32.mrf.mxu1  ;;  %v1560_v35 = vadd.f32 %v7129_v6, %v1434_v53  ;;  %v5718_v39 = vld [vmem:[%s7782_s3 + $0x638] sm:$0xff]  ;;  %v2720_v53 = vrot.slane %v6755_v52, 3 }
 0x17d   : > { %v1697_v31 = vadd.f32 %v1681_v48, %v7139_v5  ;;  %3765 = vmatpush.bf16.msra.mxu0 %v5718_v39 }
 0x17e   : > { %2528 = vmatmul.bf16.gmra.mxu3 %v2449_v26  ;;  %2680 = vmatmul.bf16.gmra.mxu0 %v2598_v58  ;;  %v5687_v26 = vld [vmem:[%s7782_s3 + $0x540] sm:$0xff]  ;;  %v2721_v52 = vsel %vm1452_vm5, %v2718_v30, %v2720_v53 }
 0x17f   : > { %2790 = vmatmul.bf16.gmra.mxu1 %v2717_v4 }
 0x180   : > { %2930 = vmatmul.bf16.gmra.mxu2 %v7229_v34  ;;  %3349 = vmatpush.bf16.msrb.mxu1 %v5689_v2  ;;  %v7370_v2 = vld [vmem:[%s7157_s30 + $0x20] sm:$0xff]  }
 0x181   : > { %v1956_v9 = vpop.f32.mrf.mxu3 }
 0x182   : > { %v1981_v5 = vadd.f32 %v1956_v9, %v7070_v50  ;;  %v5717_v9 = vld [vmem:[%s7782_s3 + $0x630] sm:$0xff] }
 0x183   : > { %v1840_v6 = vpop.f32.mrf.mxu2  ;;  %v7243_v23 = vpop.f32.mrf.mxu0  ;;  %3766 = vmatpush.bf16.msra.mxu0 %v5717_v9 }
 0x184   : > { %v7241_v24 = vadd.f32 %v1840_v6, %v1697_v31  ;;  %v1683_v11 = vpop.f32.mrf.mxu1  ;;  %v7246_v44 = vadd.f32 %v7165_v15, %v1981_v5  ;;  %v2451_v15 = vsel %vm1049_vm3, %v2448_v46, %v2450_v51  ;;  %v5710_v46 = vld [vmem:[%s7782_s3 + $0x5f8] sm:$0xff]  ;;  %3350 = vmatpush.bf16.msrb.mxu1 %v5688_v61 }
 0x185   : > { %v1698_v14 = vadd.f32 %v1683_v11, %v7182_v33  ;;  %v3145_v33 = vsel %vm618_vm1, %v3143_v25, %v3144_v43  ;;  %3636 = vmatpush.bf16.msra.mxu3 %v5710_v46  ;;  %v5734_v6 = vld [vmem:[%s7782_s3 + $0x6b8] sm:$0xff]  ;;  %v2991_v25 = vshrl.u32 %v7229_v34, 16 }
 0x188   : > { %3351 = vmatpush.bf16.msrb.mxu1 %v5687_v26 }
 0x189   : > { %v1958_v50 = vpop.f32.mrf.mxu3 }
 0x18a   : > { %v1982_v8 = vadd.f32 %v1958_v50, %v7100_v56  ;;  %v7268_v56 = vld [vmem:[%s7157_s30 + $0x10] sm:$0xff]  }
 0x18b   : > { %v1842_v17 = vpop.f32.mrf.mxu2  ;;  %v7256_v18 = vpop.f32.mrf.mxu0  ;;  %v3146_v0 = vrot.slane %v7268_v56, 1  ;;  %v2995_v51 = vshll.u32 %v7268_v56, 16 }
 0x18c   : > { %v7254_v20 = vadd.f32 %v1842_v17, %v1698_v14  ;;  %v1686_v54 = vpop.f32.mrf.mxu1  ;;  %v7270_v28 = vadd.f32 %v2095_v37, %v1982_v8  ;;  %v2980_v37 = vshrl.u32 %v7179_v12, 16  ;;  %v5695_v12 = vld [vmem:[%s7782_s3 + $0x580] sm:$0xff]  ;;  %v5733_v8 = vld [vmem:[%s7782_s3 + $0x6b0] sm:$0xff] }
 0x18d   : > { %v1699_v32 = vadd.f32 %v1686_v54, %v1559_v7  ;;  %v2987_v7 = vshll.u32 %v7229_v34, 16  ;;  %3518 = vmatpush.bf16.msrb.mxu2 %v5695_v12 }
 0x18e   : > { %2533 = vmatmul.bf16.gmra.mxu3 %v2451_v15  ;;  %3215 = vmatmul.bf16.vlgmr.msrb.gmra.mxu0 %v3145_v33  ;;  %v2985_v21 = vor.u32 %v2984_v38, %v2980_v37  ;;  %v2997_v33 = vrot.slane %v2995_v51, 1  ;;  %v7373_v37 = vld [vmem:[%s7157_s30 + $0xc] sm:$0xff]  }
 0x18f   : > { %2795 = vmatmul.bf16.gmra.mxu1 %v2719_v49  ;;  %v2989_v1 = vrot.slane %v2987_v7, 1  ;;  %v3414_v61 = vshrl.u32 %v7373_v37, 16 }
 0x190   : > { %2935 = vmatmul.bf16.gmra.mxu2 %v7268_v56 }
 0x191   : > { %v1961_v57 = vpop.f32.mrf.mxu3  ;;  %v2990_v4 = vsel %vm381_vm0, %v2985_v21, %v2989_v1  ;;  %4037 = vmatpush.bf16.msra.mxu2 %v5734_v6  ;;  %v2993_v15 = vor.u32 %v2991_v25, %v2989_v1 }
 0x192   : > { %v1983_v13 = vadd.f32 %v1961_v57, %v7127_v59 }
 0x193   : > { %v1845_v40 = vpop.f32.mrf.mxu2  ;;  %v7281_v27 = vpop.f32.mrf.mxu0  ;;  %v2998_v57 = vsel %vm381_vm0, %v2993_v15, %v2997_v33 }
 0x194   : > { %v7279_v63 = vadd.f32 %v1845_v40, %v1699_v32  ;;  %v1688_v62 = vpop.f32.mrf.mxu1  ;;  %v7287_v45 = vadd.f32 %v2098_v47, %v1983_v13  ;;  %v7366_v13 = vld [vmem:[%s7157_s30 + $0x4] sm:$0xff]  }
 0x195   : > { %v1700_v59 = vadd.f32 %v1688_v62, %v1560_v35  ;;  %v3147_v35 = vsel %vm618_vm1, %v3144_v43, %v3146_v0  ;;  %v5709_v43 = vld [vmem:[%s7782_s3 + $0x5f0] sm:$0xff]  ;;  %4038 = vmatpush.bf16.msra.mxu2 %v5733_v8  ;;  %v5708_v62 = vld [vmem:[%s7782_s3 + $0x5e8] sm:$0xff]  ;;  %v3406_v12 = vshrl.u32 %v7366_v13, 16 }
 0x196   : > { %3637 = vmatpush.bf16.msra.mxu3 %v5709_v43  ;;  %v3150_v43 = vrot.slane %v7370_v2, 1 }
 0x197   : > { %v3408_v26 = vrot.slane %v3406_v12, 1  ;;  %v5706_v12 = vld [vmem:[%s7782_s3 + $0x5d8] sm:$0xff] }
 0x199   : > { %v1963_v10 = vpop.f32.mrf.mxu3 }
 0x19a   : > { %v1984_v47 = vadd.f32 %v1963_v10, %v7163_v36  ;;  %3638 = vmatpush.bf16.msra.mxu3 %v5708_v62 }
 0x19b   : > { %v1847_v55 = vpop.f32.mrf.mxu2  ;;  %v7308_v48 = vpop.f32.mrf.mxu0 }
 0x19c   : > { %v7306_v58 = vadd.f32 %v1847_v55, %v1700_v59  ;;  %v2260_v31 = vpop.f32.mrf.mxu1  ;;  %v7317_v22 = vadd.f32 %v7243_v23, %v1984_v47  ;;  %v5714_v59 = vld [vmem:[%s7782_s3 + $0x618] sm:$0xff]  ;;  %v2999_v55 = vshrl.u32 %v7268_v56, 16  ;;  %v3003_v47 = vshll.u32 %v7314_v60, 16 }
 0x19d   : > { %v2285_v36 = vadd.f32 %v2260_v31, %v7246_v44 }
 0x19e   : > { %3084 = vmatmul.bf16.vlgmr.msrb.gmra.mxu3 %v2990_v4  ;;  %3220 = vmatmul.bf16.gmra.mxu0 %v3147_v35  ;;  %v5726_v4 = vld [vmem:[%s7782_s3 + $0x678] sm:$0xff] }
 0x19f   : > { %2800 = vmatmul.bf16.gmra.mxu1 %v2721_v52  ;;  %v3416_v52 = vrot.slane %v3414_v61, 1 }
 0x1a0   : > { %2940 = vmatmul.bf16.gmra.mxu2 %v7314_v60  ;;  %5914 = vmatpush.bf16.msra.mxu1 %v5726_v4 }
 0x1a1   : > { %v1966_v5 = vpop.f32.mrf.mxu3 }
 0x1a2   : > { %v1985_v23 = vadd.f32 %v1966_v5, %v7201_v19  ;;  %v5716_v19 = vld [vmem:[%s7782_s3 + $0x628] sm:$0xff]  ;;  %v5707_v5 = vld [vmem:[%s7782_s3 + $0x5e0] sm:$0xff] }
 0x1a3   : > { %v2385_v11 = vpop.f32.mrf.mxu2  ;;  %v7330_v14 = vpop.f32.mrf.mxu0  ;;  %3767 = vmatpush.bf16.msra.mxu0 %v5716_v19  ;;  %3639 = vmatpush.bf16.msra.mxu3 %v5707_v5  ;;  %v5730_v5 = vld [vmem:[%s7782_s3 + $0x698] sm:$0xff] }
 0x1a4   : > { %v7328_v44 = vadd.f32 %v2385_v11, %v2285_v36  ;;  %v2262_v30 = vpop.f32.mrf.mxu1  ;;  %v7338_v50 = vadd.f32 %v7256_v18, %v1985_v23  ;;  %v3148_v18 = vrot.slane %v7314_v60, 1  ;;  %v5712_v23 = vld [vmem:[%s7782_s3 + $0x608] sm:$0xff]  ;;  %v3001_v11 = vor.u32 %v2999_v55, %v2997_v33 }
 0x1a5   : > { %v2286_v17 = vadd.f32 %v2262_v30, %v7270_v28  ;;  %v5715_v28 = vld [vmem:[%s7782_s3 + $0x620] sm:$0xff]  ;;  %v3281_v30 = vrot.slane %v7373_v37, 1 }
 0x1a6   : > { %v3149_v40 = vsel %vm618_vm1, %v3146_v0, %v3148_v18  ;;  %v5713_v0 = vld [vmem:[%s7782_s3 + $0x610] sm:$0xff] }
 0x1a7   : > { %3768 = vmatpush.bf16.msra.mxu0 %v5715_v28  ;;  %v3151_v28 = vsel %vm618_vm1, %v3148_v18, %v3150_v43  ;;  %v5725_v18 = vld [vmem:[%s7782_s3 + $0x670] sm:$0xff]  ;;  %3640 = vmatpush.bf16.msra.mxu3 %v5706_v12 }
 0x1a8   : > { %5915 = vmatpush.bf16.msra.mxu1 %v5725_v18 }
 0x1a9   : > { %v1968_v3 = vpop.f32.mrf.mxu3 }
 0x1aa   : > { %v1986_v54 = vadd.f32 %v1968_v3, %v7220_v16  ;;  %v2723_v16 = vsel %vm1452_vm5, %v2720_v53, %v2722_v42  ;;  %v5711_v42 = vld [vmem:[%s7782_s3 + $0x600] sm:$0xff] }
 0x1ab   : > { %v2387_v49 = vpop.f32.mrf.mxu2  ;;  %v7359_v29 = vpop.f32.mrf.mxu0  ;;  %3769 = vmatpush.bf16.msra.mxu0 %v5714_v59  ;;  %v5731_v59 = vld [vmem:[%s7782_s3 + $0x6a0] sm:$0xff] }
 0x1ac   : > { %v7357_v32 = vadd.f32 %v2387_v49, %v2286_v17  ;;  %v2265_v41 = vpop.f32.mrf.mxu1  ;;  %v7376_v38 = vadd.f32 %v7281_v27, %v1986_v54  ;;  %v3409_v27 = vshll.u32 %v7366_v13, 16 }
 0x1ad   : > { %v2287_v39 = vadd.f32 %v2265_v41, %v7287_v45  ;;  %v3417_v45 = vshll.u32 %v7373_v37, 16  ;;  %v7445_v41 = vld [vmem:[%s7157_s30 + $0x28] sm:$0xff]  }
 0x1ae   : > { %3089 = vmatmul.bf16.gmra.mxu3 %v2998_v57  ;;  %3225 = vmatmul.bf16.gmra.mxu0 %v3149_v40  ;;  %v3411_v31 = vrot.slane %v3409_v27, 2 }
 0x1af   : > { %2805 = vmatmul.bf16.gmra.mxu1 %v2723_v16  ;;  %v3419_v36 = vrot.slane %v3417_v45, 2  ;;  %3770 = vmatpush.bf16.msra.mxu0 %v5713_v0  ;;  %v7448_v16 = vld [vmem:[%s7157_s30 + $0x14] sm:$0xff]  }
 0x1b0   : > { %2945 = vmatmul.bf16.gmra.mxu2 %v7370_v2  ;;  %v3412_v17 = vor.u32 %v3411_v31, %v3408_v26  ;;  %v3426_v27 = vshll.u32 %v7448_v16, 16  ;;  %v3007_v26 = vshrl.u32 %v7314_v60, 16 }
 0x1b1   : > { %v1971_v46 = vpop.f32.mrf.mxu3  ;;  %v7423_v19 = vor.u32 %v3419_v36, %v3416_v52 }
 0x1b2   : > { %v1987_v21 = vadd.f32 %v1971_v46, %v7241_v24  ;;  %v5732_v24 = vld [vmem:[%s7782_s3 + $0x6a8] sm:$0xff]  ;;  %v3428_v52 = vrot.slane %v3426_v27, 2 }
 0x1b3   : > { %v2390_v1 = vpop.f32.mrf.mxu2  ;;  %v7396_v10 = vpop.f32.mrf.mxu0  ;;  %4039 = vmatpush.bf16.msra.mxu2 %v5732_v24  ;;  %3771 = vmatpush.bf16.msra.mxu0 %v5712_v23  ;;  %v3421_v40 = vsel %vm881_vm2, %v3412_v17, %v7423_v19  ;;  %v5704_v23 = vld [vmem:[%s7782_s3 + $0x5c8] sm:$0xff] }
 0x1b4   : > { %v7394_v53 = vadd.f32 %v2390_v1, %v2287_v39  ;;  %v2267_v35 = vpop.f32.mrf.mxu1  ;;  %v7407_v9 = vadd.f32 %v7308_v48, %v1987_v21  ;;  %v3005_v48 = vrot.slane %v3003_v47, 1  ;;  %v5705_v21 = vld [vmem:[%s7782_s3 + $0x5d0] sm:$0xff] }
 0x1b5   : > { %v2288_v6 = vadd.f32 %v2267_v35, %v7317_v22  ;;  %v3280_v22 = vrot.slane %v7366_v13, 1  ;;  %3641 = vmatpush.bf16.msra.mxu3 %v5705_v21 }
 0x1b6   : > { %v3006_v49 = vsel %vm381_vm0, %v3001_v11, %v3005_v48  ;;  %v3009_v11 = vor.u32 %v3007_v26, %v3005_v48  ;;  %v5703_v48 = vld [vmem:[%s7782_s3 + $0x5c0] sm:$0xff] }
 0x1b7   : > { %3772 = vmatpush.bf16.msra.mxu0 %v5711_v42  ;;  %4040 = vmatpush.bf16.msra.mxu2 %v5731_v59 }
 0x1b9   : > { %v1973_v8 = vpop.f32.mrf.mxu3  ;;  %3642 = vmatpush.bf16.msra.mxu3 %v5704_v23  ;;  %v3701_v23 = vrot.slane %v7229_v34, 2 }
 0x1ba   : > { %v1988_v15 = vadd.f32 %v1973_v8, %v7254_v20  ;;  %v3282_v20 = vsel %vm618_vm1, %v3280_v22, %v3281_v30  ;;  %v3283_v22 = vrot.slane %v7448_v16, 1 }
 0x1bb   : > { %v2392_v33 = vpop.f32.mrf.mxu2  ;;  %v7431_v54 = vpop.f32.mrf.mxu0  ;;  %3912 = vmatpush.bf16.msrb.mxu0 %v5726_v4  ;;  %v3011_v4 = vshll.u32 %v7370_v2, 16  ;;  %4041 = vmatpush.bf16.msra.mxu2 %v5730_v5 }
 0x1bc   : > { %v7429_v3 = vadd.f32 %v2392_v33, %v2288_v6  ;;  %v2270_v57 = vpop.f32.mrf.mxu1  ;;  %v7451_v39 = vadd.f32 %v7330_v14, %v1988_v15  ;;  %v7464_v14 = vunpack.c.l.bf16 %v7445_v41  ;;  %v5724_v6 = vld [vmem:[%s7782_s3 + $0x668] sm:$0xff] }
 0x1bd   : > { %v2289_v62 = vadd.f32 %v2270_v57, %v7338_v50  ;;  %v3423_v50 = vshrl.u32 %v7448_v16, 16  ;;  %5916 = vmatpush.bf16.msra.mxu1 %v5724_v6  ;;  %3643 = vmatpush.bf16.msra.mxu3 %v5703_v48 }
 0x1be   : > { %3094 = vmatmul.bf16.gmra.mxu3 %v3006_v49  ;;  %3230 = vmatmul.bf16.gmra.mxu0 %v3151_v28  ;;  %v2961_v24 = vpack.c.bf16 %v7464_v14, %v7464_v14 }
 0x1bf   : > { %3352 = vmatmul.bf16.vlgmr.msrb.gmra.mxu1 %v3282_v20  ;;  %3913 = vmatpush.bf16.msrb.mxu0 %v5725_v18  ;;  %v3425_v31 = vrot.slane %v3423_v50, 1 }
 0x1c0   : > { %3519 = vmatmul.bf16.vlgmr.msrb.gmra.mxu2 %v3421_v40 }
 0x1c1   : > { %v1976_v61 = vpop.f32.mrf.mxu3  ;;  %v3429_v17 = vor.u32 %v3428_v52, %v3425_v31 }
 0x1c2   : > { %v1989_v45 = vadd.f32 %v1976_v61, %v7279_v63 }
 0x1c3   : > { %v2395_v46 = vpop.f32.mrf.mxu2  ;;  %v7474_v0 = vpop.f32.mrf.mxu0  ;;  %3914 = vmatpush.bf16.msrb.mxu0 %v5724_v6  ;;  %v3430_v40 = vsel %vm881_vm2, %v7423_v19, %v3429_v17  ;;  %v5802_v6 = vunpack.c.h.bf16 %v7370_v2 }
 0x1c4   : > { %v7472_v1 = vadd.f32 %v2395_v46, %v2289_v62  ;;  %v2272_v35 = vpop.f32.mrf.mxu1  ;;  %v7481_v63 = vadd.f32 %v7359_v29, %v1989_v45  ;;  %v3013_v29 = vrot.slane %v3011_v4, 1  ;;  %v7516_v62 = vld [vmem:[%s7157_s30 + $0x1c] sm:$0xff]   ;;  %v3015_v45 = vshrl.u32 %v7370_v2, 16 }
 0x1c5   : > { %v2290_v36 = vadd.f32 %v2272_v35, %v7376_v38  ;;  %v3152_v38 = vrot.slane %v2961_v24, 1  ;;  %v3432_v19 = vshrl.u32 %v7516_v62, 16  ;;  %v3019_v46 = vshll.u32 %v2961_v24, 16 }
 0x1c6   : > { %v3014_v28 = vsel %vm381_vm0, %v3009_v11, %v3013_v29  ;;  %v3702_v11 = vrot.slane %v7268_v56, 2  ;;  %v3285_v24 = vrot.slane %v7516_v62, 1 }
 0x1c7   : > { %v3153_v57 = vsel %vm618_vm1, %v3150_v43, %v3152_v38  ;;  %v5723_v43 = vld [vmem:[%s7782_s3 + $0x660] sm:$0xff]  ;;  %v3434_v35 = vrot.slane %v3432_v19, 1  ;;  %v3021_v5 = vrot.slane %v3019_v46, 1 }
 0x1c8   : > { %5917 = vmatpush.bf16.msra.mxu1 %v5723_v43  ;;  %3915 = vmatpush.bf16.msrb.mxu0 %v5723_v43 }
 0x1c9   : > { %v1978_v8 = vpop.f32.mrf.mxu3 }
 0x1ca   : > { %v1990_v15 = vadd.f32 %v1978_v8, %v7306_v58  ;;  %v3284_v58 = vsel %vm618_vm1, %v3281_v30, %v3283_v22  ;;  %v5729_v30 = vld [vmem:[%s7782_s3 + $0x690] sm:$0xff] }
 0x1cb   : > { %v2397_v33 = vpop.f32.mrf.mxu2  ;;  %v7504_v49 = vpop.f32.mrf.mxu0  ;;  %4042 = vmatpush.bf16.msra.mxu2 %v5729_v30 }
 0x1cc   : > { %v7502_v42 = vadd.f32 %v2397_v33, %v2290_v36  ;;  %v2275_v20 = vpop.f32.mrf.mxu1  ;;  %v7519_v18 = vadd.f32 %v7396_v10, %v1990_v15  ;;  %v3435_v10 = vshll.u32 %v7516_v62, 16  ;;  %v7548_v33 = vpack.c.bf16 %v7464_v14, %v5802_v6 }
 0x1cd   : > { %v2291_v59 = vadd.f32 %v2275_v20, %v7407_v9  ;;  %v3286_v20 = vsel %vm618_vm1, %v3283_v22, %v3285_v24  ;;  %v3572_v6 = vrot.slane %v7366_v13, 2  ;;  %v3833_v13 = vrot.slane %v3007_v26, 2 }
 0x1ce   : > { %3099 = vmatmul.bf16.gmra.mxu3 %v3014_v28  ;;  %3235 = vmatmul.bf16.gmra.mxu0 %v3153_v57  ;;  %v3437_v31 = vrot.slane %v3435_v10, 2  ;;  %v3703_v28 = vsel %vm1049_vm3, %v3701_v23, %v3702_v11  ;;  %v5722_v57 = vld [vmem:[%s7782_s3 + $0x658] sm:$0xff]  ;;  %v3441_v43 = vshrl.u32 %v7548_v33, 16  ;;  %v3444_v30 = vshll.u32 %v7548_v33, 16 }
 0x1cf   : > { %3357 = vmatmul.bf16.gmra.mxu1 %v3284_v58  ;;  %3916 = vmatpush.bf16.msrb.mxu0 %v5722_v57  ;;  %v5806_v23 = vunpack.c.h.bf16 %v7445_v41 }
 0x1d0   : > { %3524 = vmatmul.bf16.gmra.mxu2 %v3430_v40  ;;  %v3438_v38 = vor.u32 %v3437_v31, %v3434_v35  ;;  %5918 = vmatpush.bf16.msra.mxu1 %v5722_v57  ;;  %v5720_v35 = vld [vmem:[%s7782_s3 + $0x648] sm:$0xff]  ;;  %v3287_v31 = vrot.slane %v7548_v33, 1 }
 0x1d1   : > { %v2514_v12 = vpop.f32.mrf.mxu3 }
 0x1d2   : > { %v2539_v50 = vadd.f32 %v2514_v12, %v7328_v44  ;;  %v3017_v44 = vor.u32 %v3015_v45, %v3013_v29  ;;  %v3439_v58 = vsel %vm881_vm2, %v3429_v17, %v3438_v38  ;;  %v3443_v12 = vrot.slane %v3441_v43, 1 }
 0x1d3   : > { %v2400_v9 = vpop.f32.mrf.mxu2  ;;  %v7533_v61 = vpop.f32.mrf.mxu0 }
 0x1d4   : > { %v7531_v27 = vadd.f32 %v2400_v9, %v2291_v59  ;;  %v2277_v21 = vpop.f32.mrf.mxu1  ;;  %v7537_v52 = vadd.f32 %v7431_v54, %v2539_v50  ;;  %v3022_v29 = vsel %vm381_vm0, %v3017_v44, %v3021_v5  ;;  %v3446_v9 = vrot.slane %v3444_v30, 2 }
 0x1d5   : > { %v2292_v36 = vadd.f32 %v2277_v21, %v7451_v39  ;;  %v3704_v44 = vrot.slane %v7314_v60, 2  ;;  %v3829_v5 = vrot.slane %v2999_v55, 2  ;;  %v5719_v55 = vld [vmem:[%s7782_s3 + $0x640] sm:$0xff] }
 0x1d9   : > { %v2516_v8 = vpop.f32.mrf.mxu3 }
 0x1da   : > { %v2540_v54 = vadd.f32 %v2516_v8, %v7357_v32  ;;  %v5728_v32 = vld [vmem:[%s7782_s3 + $0x688] sm:$0xff]  ;;  %v3834_v8 = vrot.slane %v3003_v47, 3 }
 0x1db   : > { %v2402_v15 = vpop.f32.mrf.mxu2  ;;  %v7552_v48 = vpop.f32.mrf.mxu0  ;;  %4043 = vmatpush.bf16.msra.mxu2 %v5728_v32  ;;  %v7620_v32 = vpack.c.bf16 %v5806_v23, %v5806_v23  ;;  %v3838_v23 = vrot.slane %v3011_v4, 3 }
 0x1dc   : > { %v7550_v39 = vadd.f32 %v2402_v15, %v2292_v36  ;;  %v2280_v14 = vpop.f32.mrf.mxu1  ;;  %v7567_v40 = vadd.f32 %v7474_v0, %v2540_v54  ;;  %v5721_v0 = vld [vmem:[%s7782_s3 + $0x650] sm:$0xff]  ;;  %v7591_v36 = vor.u32 %v3446_v9, %v3443_v12 }
 0x1dd   : > { %v2293_v59 = vadd.f32 %v2280_v14, %v7481_v63  ;;  %5919 = vmatpush.bf16.msra.mxu1 %v5721_v0  ;;  %3917 = vmatpush.bf16.msrb.mxu0 %v5721_v0 }
 0x1de   : > { %3104 = vmatmul.bf16.gmra.mxu3 %v3022_v29  ;;  %3773 = vmatmul.bf16.vlgmr.msra.gmra.mxu0 %v3703_v28  ;;  %v3448_v47 = vsel %vm881_vm2, %v3438_v38, %v7591_v36 }
 0x1df   : > { %3362 = vmatmul.bf16.gmra.mxu1 %v3286_v20 }
 0x1e0   : > { %3529 = vmatmul.bf16.gmra.mxu2 %v3439_v58  ;;  %v3835_v58 = vor.u32 %v3834_v8, %v3833_v13 }
 0x1e1   : > { %v2519_v19 = vpop.f32.mrf.mxu3  ;;  %5920 = vmatpush.bf16.msra.mxu1 %v5720_v35  ;;  %3918 = vmatpush.bf16.msrb.mxu0 %v5720_v35 }
 0x1e2   : > { %v2541_v17 = vadd.f32 %v2519_v19, %v7394_v53  ;;  %v5727_v53 = vld [vmem:[%s7782_s3 + $0x680] sm:$0xff] }
 0x1e3   : > { %v2405_v22 = vpop.f32.mrf.mxu2  ;;  %v7578_v10 = vpop.f32.mrf.mxu0  ;;  %4044 = vmatpush.bf16.msra.mxu2 %v5727_v53  ;;  %v3289_v53 = vrot.slane %v7620_v32, 1 }
 0x1e4   : > { %v7576_v63 = vadd.f32 %v2405_v22, %v2293_v59  ;;  %v2282_v50 = vpop.f32.mrf.mxu1  ;;  %v7581_v46 = vadd.f32 %v7504_v49, %v2541_v17  ;;  %v3573_v49 = vrot.slane %v7373_v37, 2  ;;  %v3453_v59 = vshll.u32 %v7620_v32, 16 }
 0x1e5   : > { %v2294_v21 = vadd.f32 %v2282_v50, %v7519_v18  ;;  %v3830_v18 = vrot.slane %v2995_v51, 3  ;;  %v3288_v51 = vsel %vm618_vm1, %v3285_v24, %v3287_v31  ;;  %5921 = vmatpush.bf16.msra.mxu1 %v5719_v55  ;;  %3919 = vmatpush.bf16.msrb.mxu0 %v5719_v55  ;;  %v3575_v50 = vrot.slane %v7448_v16, 2 }
 0x1e6   : > { %v3574_v26 = vsel %vm1049_vm3, %v3572_v6, %v3573_v49  ;;  %v3455_v0 = vrot.slane %v3453_v59, 2 }
 0x1e7   : > { %v7623_v14 = vor.u32 %v3830_v18, %v3829_v5  ;;  %v3837_v5 = vrot.slane %v3015_v45, 2  ;;  %v3576_v16 = vsel %vm1049_vm3, %v3573_v49, %v3575_v50 }
 0x1e9   : > { %v2521_v37 = vpop.f32.mrf.mxu3  ;;  %v7628_v38 = vsel %vm1304_vm4, %v7623_v14, %v3835_v58 }
 0x1ea   : > { %v2542_v54 = vadd.f32 %v2521_v37, %v7429_v3  ;;  %v3705_v3 = vsel %vm1049_vm3, %v3702_v11, %v3704_v44  ;;  %v3450_v11 = vshrl.u32 %v7620_v32, 16  ;;  %v3290_v37 = vsel %vm618_vm1, %v3287_v31, %v3289_v53 }
 0x1eb   : > { %v2407_v15 = vpop.f32.mrf.mxu2  ;;  %v2676_v28 = vpop.f32.mrf.mxu0 }
 0x1ec   : > { %v7612_v29 = vadd.f32 %v2407_v15, %v2294_v21  ;;  %v2786_v57 = vpop.f32.mrf.mxu1  ;;  %v2689_v24 = vadd.f32 %v7533_v61, %v2542_v54  ;;  %v3452_v17 = vrot.slane %v3450_v11, 1  ;;  %v3706_v21 = vrot.slane %v7370_v2, 2 }
 0x1ed   : > { %v2811_v20 = vadd.f32 %v2786_v57, %v7537_v52  ;;  %v7655_v15 = vor.u32 %v3838_v23, %v3837_v5  ;;  %v3973_v57 = vrot.slane %v7229_v34, 3 }
 0x1ee   : > { %3644 = vmatmul.bf16.vlgmr.msra.gmra.mxu3 %v3574_v26  ;;  %3778 = vmatmul.bf16.gmra.mxu0 %v3705_v3  ;;  %v3456_v35 = vor.u32 %v3455_v0, %v3452_v17  ;;  %v3707_v8 = vsel %vm1049_vm3, %v3704_v44, %v3706_v21  ;;  %v3708_v26 = vrot.slane %v7445_v41, 2  ;;  %v3826_v3 = vrot.slane %v2991_v25, 2 }
 0x1ef   : > { %3367 = vmatmul.bf16.gmra.mxu1 %v3288_v51  ;;  %v3840_v49 = vsel %vm1304_vm4, %v3835_v58, %v7655_v15 }
 0x1f0   : > { %3534 = vmatmul.bf16.gmra.mxu2 %v3448_v47 }
 0x1f1   : > { %v2524_v61 = vpop.f32.mrf.mxu3 }
 0x1f2   : > { %v2543_v43 = vadd.f32 %v2524_v61, %v7472_v1  ;;  %v3709_v61 = vsel %vm1049_vm3, %v3706_v21, %v3708_v26 }
 0x1f3   : > { %v2926_v30 = vpop.f32.mrf.mxu2  ;;  %v2678_v52 = vpop.f32.mrf.mxu0 }
 0x1f4   : > { %v7633_v19 = vadd.f32 %v2926_v30, %v2811_v20  ;;  %v2788_v22 = vpop.f32.mrf.mxu1  ;;  %v2690_v12 = vadd.f32 %v7552_v48, %v2543_v43  ;;  %v3974_v20 = vrot.slane %v7268_v56, 3  ;;  %v2833_v30 = vld [vmem:[%s7157_s30 + $0x30] sm:$0xf]  ;;  %s5926_s30 = smul.u32 10, %s7801_s15 }
 0x1f5   : > { %v2812_v9 = vadd.f32 %v2788_v22, %v7567_v40 }
 0x1f6   : > { %v3975_v25 = vsel %vm1452_vm5, %v3973_v57, %v3974_v20  ;;  %s313_s24 = sadd.s32 %s5927_s23, %s5926_s30 }
 0x1f7   : > { %s4236_s25 = sshll.u32 %s313_s24, 3 }
 0x1f8   : > { %s7745_s26 = scalar_lea.vmem %s7783_s4, %s4236_s25 }
 0x1f9   : > { %v2526_v6 = vpop.f32.mrf.mxu3 }
 0x1fa   : > { %v2544_v1 = vadd.f32 %v2526_v6, %v7502_v42  ;;  %v3457_v42 = vsel %vm881_vm2, %v7591_v36, %v3456_v35  ;;  %v3579_v6 = vrot.slane %v7548_v33, 2 }
 0x1fb   : > { %v2928_v18 = vpop.f32.mrf.mxu2  ;;  %v2681_v40 = vpop.f32.mrf.mxu0 }
 0x1fc   : > { %v7645_v48 = vadd.f32 %v2928_v18, %v2812_v9  ;;  %v2791_v13 = vpop.f32.mrf.mxu1  ;;  %v2691_v45 = vadd.f32 %v7578_v10, %v2544_v1 }
 0x1fd   : > { %v2813_v4 = vadd.f32 %v2791_v13, %v7581_v46  ;;  %v3577_v46 = vrot.slane %v7516_v62, 2 }
 0x1fe   : > { %3649 = vmatmul.bf16.gmra.mxu3 %v3576_v16  ;;  %3783 = vmatmul.bf16.gmra.mxu0 %v3707_v8 }
 0x1ff   : > { %3372 = vmatmul.bf16.gmra.mxu1 %v3290_v37  ;;  %v3578_v62 = vsel %vm1049_vm3, %v3575_v50, %v3577_v46  ;;  %v3580_v16 = vsel %vm1049_vm3, %v3577_v46, %v3579_v6  ;;  %v3581_v46 = vrot.slane %v7620_v32, 2 }
 0x200   : > { %3539 = vmatmul.bf16.gmra.mxu2 %v3457_v42 }
 0x201   : > { %v2529_v44 = vpop.f32.mrf.mxu3 }
 0x202   : > { %v2545_v54 = vadd.f32 %v2529_v44, %v7531_v27 }
 0x203   : > { %v2931_v31 = vpop.f32.mrf.mxu2  ;;  %v2683_v36 = vpop.f32.mrf.mxu0 }
 0x204   : > { %v7661_v51 = vadd.f32 %v2931_v31, %v2813_v4  ;;  %v2793_v55 = vpop.f32.mrf.mxu1  ;;  %v2692_v10 = vadd.f32 %v2676_v28, %v2545_v54  ;;  %v3827_v28 = vrot.slane %v2987_v7, 3  ;;  %v2846_v7 = vunpack.c.l.bf16 %v2833_v30 }
 0x205   : > { %v2814_v47 = vadd.f32 %v2793_v55, %v2689_v24 }
 0x206   : > { %v3828_v56 = vor.u32 %v3827_v28, %v3826_v3  ;;  %v7684_v53 = vpack.c.bf16 %v2846_v7, %v2846_v7 }
 0x208   : > { %v3832_v34 = vsel %vm1304_vm4, %v3828_v56, %v7623_v14  ;;  %v3710_v14 = vrot.slane %v7684_v53, 2 }
 0x209   : > { %v2531_v27 = vpop.f32.mrf.mxu3 }
 0x20a   : > { %v2546_v58 = vadd.f32 %v2531_v27, %v7550_v39  ;;  %v3711_v8 = vsel %vm1049_vm3, %v3708_v26, %v3710_v14  ;;  %v3978_v26 = vrot.slane %v7370_v2, 3  ;;  %v3851_v2 = vshrl.u32 %v7684_v53, 16 }
 0x20b   : > { %v2933_v11 = vpop.f32.mrf.mxu2  ;;  %v3216_v59 = vpop.f32.mrf.mxu0 }
 0x20c   : > { %v7672_v24 = vadd.f32 %v2933_v11, %v2814_v47  ;;  %v2796_v43 = vpop.f32.mrf.mxu1  ;;  %v2693_v22 = vadd.f32 %v2678_v52, %v2546_v58  ;;  %v3582_v58 = vsel %vm1049_vm3, %v3579_v6, %v3581_v46 }
 0x20d   : > { %v2815_v17 = vadd.f32 %v2796_v43, %v2690_v12 }
 0x20e   : > { %3654 = vmatmul.bf16.gmra.mxu3 %v3578_v62  ;;  %3788 = vmatmul.bf16.gmra.mxu0 %v3709_v61 }
 0x20f   : > { %3925 = vmatmul.bf16.vlgmr.msra.gmra.mxu1 %v7628_v38  ;;  %v3976_v38 = vrot.slane %v7314_v60, 3  ;;  %v3842_v60 = vshrl.u32 %v7445_v41, 16 }
 0x210   : > { %4045 = vmatmul.bf16.vlgmr.msra.gmra.mxu2 %v3975_v25 }
 0x211   : > { %v2534_v39 = vpop.f32.mrf.mxu3  ;;  %v3844_v55 = vrot.slane %v3842_v60, 2 }
 0x212   : > { %v2547_v0 = vadd.f32 %v2534_v39, %v7576_v63 }
 0x213   : > { %v2936_v9 = vpop.f32.mrf.mxu2  ;;  %v3218_v21 = vpop.f32.mrf.mxu0 }
 0x214   : > { %v7682_v50 = vadd.f32 %v2936_v9, %v2815_v17  ;;  %v2798_v52 = vpop.f32.mrf.mxu1  ;;  %v2694_v12 = vadd.f32 %v2681_v40, %v2547_v0  ;;  %v3977_v40 = vsel %vm1452_vm5, %v3974_v20, %v3976_v38 }
 0x215   : > { %v2816_v35 = vadd.f32 %v2798_v52, %v2691_v45 }
 0x219   : > { %v2536_v1 = vpop.f32.mrf.mxu3 }
 0x21a   : > { %v2548_v18 = vadd.f32 %v2536_v1, %v7612_v29  ;;  %v3845_v29 = vshll.u32 %v7445_v41, 16 }
 0x21b   : > { %v2938_v5 = vpop.f32.mrf.mxu2  ;;  %v3221_v23 = vpop.f32.mrf.mxu0 }
 0x21c   : > { %v7690_v63 = vadd.f32 %v2938_v5, %v2816_v35  ;;  %v2801_v13 = vpop.f32.mrf.mxu1  ;;  %v2695_v37 = vadd.f32 %v2683_v36, %v2548_v18  ;;  %v3847_v47 = vrot.slane %v3845_v29, 3 }
 0x21d   : > { %v2817_v33 = vadd.f32 %v2801_v13, %v2692_v10 }
 0x21e   : > { %3659 = vmatmul.bf16.gmra.mxu3 %v3580_v16  ;;  %3793 = vmatmul.bf16.gmra.mxu0 %v3711_v8 }
 0x21f   : > { %3930 = vmatmul.bf16.gmra.mxu1 %v3840_v49  ;;  %v3848_v49 = vor.u32 %v3847_v47, %v3844_v55 }
 0x220   : > { %4050 = vmatmul.bf16.gmra.mxu2 %v3977_v40  ;;  %v3982_v40 = vrot.slane %v7684_v53, 3 }
 0x221   : > { %v3085_v42 = vpop.f32.mrf.mxu3  ;;  %v3849_v28 = vsel %vm1304_vm4, %v7655_v15, %v3848_v49  ;;  %v3853_v15 = vrot.slane %v3851_v2, 2 }
 0x222   : > { %v3110_v4 = vadd.f32 %v3085_v42, %v7633_v19 }
 0x223   : > { %v2941_v45 = vpop.f32.mrf.mxu2  ;;  %v3223_v54 = vpop.f32.mrf.mxu0 }
 0x224   : > { %v7698_v44 = vadd.f32 %v2941_v45, %v2817_v33  ;;  %v2803_v31 = vpop.f32.mrf.mxu1  ;;  %v3241_v36 = vadd.f32 %v3216_v59, %v3110_v4  ;;  %v3979_v59 = vsel %vm1452_vm5, %v3976_v38, %v3978_v26 }
 0x225   : > { %v2818_v10 = vadd.f32 %v2803_v31, %v2693_v22 }
 0x229   : > { %v3087_v3 = vpop.f32.mrf.mxu3 }
 0x22a   : > { %v3111_v20 = vadd.f32 %v3087_v3, %v7645_v48  ;;  %v3854_v48 = vshll.u32 %v7684_v53, 16 }
 0x22b   : > { %v2943_v57 = vpop.f32.mrf.mxu2  ;;  %v3226_v19 = vpop.f32.mrf.mxu0 }
 0x22c   : > { %v7703_v27 = vadd.f32 %v2943_v57, %v2818_v10  ;;  %v2806_v11 = vpop.f32.mrf.mxu1  ;;  %v3242_v62 = vadd.f32 %v3218_v21, %v3111_v20  ;;  %v3856_v17 = vrot.slane %v3854_v48, 3 }
 0x22d   : > { %v2819_v32 = vadd.f32 %v2806_v11, %v2694_v12 }
 0x22e   : > { %3664 = vmatmul.bf16.gmra.mxu3 %v3582_v58  ;;  %3920 = vmatmul.bf16.vlgmr.msrb.gmra.mxu0 %v3832_v34  ;;  %v3857_v0 = vor.u32 %v3856_v17, %v3853_v15  ;;  %v3980_v34 = vrot.slane %v7445_v41, 3 }
 0x22f   : > { %3935 = vmatmul.bf16.gmra.mxu1 %v3849_v28 }
 0x230   : > { %4055 = vmatmul.bf16.gmra.mxu2 %v3979_v59  ;;  %v3858_v14 = vsel %vm1304_vm4, %v3848_v49, %v3857_v0  ;;  %v3983_v4 = vsel %vm1452_vm5, %v3980_v34, %v3982_v40 }
 0x231   : > { %v3090_v61 = vpop.f32.mrf.mxu3 }
 0x232   : > { %v3112_v25 = vadd.f32 %v3090_v61, %v7661_v51  ;;  %v3981_v51 = vsel %vm1452_vm5, %v3978_v26, %v3980_v34 }
 0x233   : > { %v2946_v43 = vpop.f32.mrf.mxu2  ;;  %v3228_v22 = vpop.f32.mrf.mxu0 }
 0x234   : > { %v2959_v30 = vadd.f32 %v2946_v43, %v2819_v32  ;;  %v2808_v56 = vpop.f32.mrf.mxu1  ;;  %v3243_v7 = vadd.f32 %v3221_v23, %v3112_v25 }
 0x235   : > { %v2820_v39 = vadd.f32 %v2808_v56, %v2695_v37 }
 0x239   : > { %v3092_v9 = vpop.f32.mrf.mxu3 }
 0x23a   : > { %v3113_v52 = vadd.f32 %v3092_v9, %v7672_v24 }
 0x23b   : > { %v2948_v21 = vpop.f32.mrf.mxu2  ;;  %v3231_v35 = vpop.f32.mrf.mxu0 }
 0x23c   : > { %v2960_v12 = vadd.f32 %v2948_v21, %v2820_v39  ;;  %v3353_v6 = vpop.f32.mrf.mxu1  ;;  %v3244_v38 = vadd.f32 %v3223_v54, %v3113_v52 }
 0x23d   : > { %v3378_v1 = vadd.f32 %v3353_v6, %v3241_v36 }
 0x23f   : > { %3940 = vmatmul.bf16.gmra.mxu1 %v3858_v14 }
 0x240   : > { %4060 = vmatmul.bf16.gmra.mxu2 %v3981_v51 }
 0x241   : > { %v3095_v18 = vpop.f32.mrf.mxu3 }
 0x242   : > { %v3114_v5 = vadd.f32 %v3095_v18, %v7682_v50 }
 0x243   : > { %v3520_v23 = vpop.f32.mrf.mxu2  ;;  %v3233_v16 = vpop.f32.mrf.mxu0 }
 0x244   : > { %v3545_v41 = vadd.f32 %v3520_v23, %v3378_v1  ;;  %v3355_v8 = vpop.f32.mrf.mxu1  ;;  %v3245_v13 = vadd.f32 %v3226_v19, %v3114_v5 }
 0x245   : > { %v3379_v24 = vadd.f32 %v3355_v8, %v3242_v62 }
 0x249   : > { %v3097_v37 = vpop.f32.mrf.mxu3 }
 0x24a   : > { %v3115_v33 = vadd.f32 %v3097_v37, %v7690_v63 }
 0x24b   : > { %v3522_v60 = vpop.f32.mrf.mxu2  ;;  %v3236_v42 = vpop.f32.mrf.mxu0 }
 0x24c   : > { %v3546_v29 = vadd.f32 %v3522_v60, %v3379_v24  ;;  %v3358_v45 = vpop.f32.mrf.mxu1  ;;  %v3246_v54 = vadd.f32 %v3228_v22, %v3115_v33 }
 0x24d   : > { %v3380_v50 = vadd.f32 %v3358_v45, %v3243_v7 }
 0x250   : > { %4065 = vmatmul.bf16.gmra.mxu2 %v3983_v4 }
 0x251   : > { %v3100_v31 = vpop.f32.mrf.mxu3 }
 0x252   : > { %v3116_v55 = vadd.f32 %v3100_v31, %v7698_v44 }
 0x253   : > { %v3525_v47 = vpop.f32.mrf.mxu2  ;;  %v3238_v10 = vpop.f32.mrf.mxu0 }
 0x254   : > { %v7721_v36 = vadd.f32 %v3525_v47, %v3380_v50  ;;  %v3360_v53 = vpop.f32.mrf.mxu1  ;;  %v3247_v46 = vadd.f32 %v3231_v35, %v3116_v55 }
 0x255   : > { %v3381_v49 = vadd.f32 %v3360_v53, %v3244_v38 }
 0x259   : > { %v3102_v63 = vpop.f32.mrf.mxu3 }
 0x25a   : > { %v3117_v26 = vadd.f32 %v3102_v63, %v7703_v27 }
 0x25b   : > { %v3527_v3 = vpop.f32.mrf.mxu2  ;;  %v3774_v20 = vpop.f32.mrf.mxu0 }
 0x25c   : > { %v7724_v57 = vadd.f32 %v3527_v3, %v3381_v49  ;;  %v3363_v19 = vpop.f32.mrf.mxu1  ;;  %v3248_v58 = vadd.f32 %v3233_v16, %v3117_v26 }
 0x25d   : > { %v3382_v11 = vadd.f32 %v3363_v19, %v3245_v13 }
 0x261   : > { %v3105_v28 = vpop.f32.mrf.mxu3 }
 0x262   : > { %v3118_v59 = vadd.f32 %v3105_v28, %v2959_v30 }
 0x263   : > { %v3530_v44 = vpop.f32.mrf.mxu2  ;;  %v3776_v32 = vpop.f32.mrf.mxu0 }
 0x264   : > { %v7726_v62 = vadd.f32 %v3530_v44, %v3382_v11  ;;  %v3365_v2 = vpop.f32.mrf.mxu1  ;;  %v3249_v48 = vadd.f32 %v3236_v42, %v3118_v59 }
 0x265   : > { %v3383_v61 = vadd.f32 %v3365_v2, %v3246_v54 }
 0x269   : > { %v3107_v43 = vpop.f32.mrf.mxu3 }
 0x26a   : > { %v3119_v25 = vadd.f32 %v3107_v43, %v2960_v12 }
 0x26b   : > { %v3532_v22 = vpop.f32.mrf.mxu2  ;;  %v3779_v56 = vpop.f32.mrf.mxu0 }
 0x26c   : > { %v7728_v27 = vadd.f32 %v3532_v22, %v3383_v61  ;;  %v3368_v15 = vpop.f32.mrf.mxu1  ;;  %v3250_v17 = vadd.f32 %v3238_v10, %v3119_v25 }
 0x26d   : > { %v3384_v7 = vadd.f32 %v3368_v15, %v3247_v46 }
 0x271   : > { %v3645_v39 = vpop.f32.mrf.mxu3 }
 0x272   : > { %v3670_v34 = vadd.f32 %v3645_v39, %v3545_v41 }
 0x273   : > { %v3535_v0 = vpop.f32.mrf.mxu2  ;;  %v3781_v9 = vpop.f32.mrf.mxu0 }
 0x274   : > { %v7730_v30 = vadd.f32 %v3535_v0, %v3384_v7  ;;  %v3370_v21 = vpop.f32.mrf.mxu1  ;;  %v3799_v52 = vadd.f32 %v3774_v20, %v3670_v34 }
 0x275   : > { %v3385_v35 = vadd.f32 %v3370_v21, %v3248_v58 }
 0x279   : > { %v3647_v6 = vpop.f32.mrf.mxu3 }
 0x27a   : > { %v3671_v12 = vadd.f32 %v3647_v6, %v3546_v29 }
 0x27b   : > { %v3537_v14 = vpop.f32.mrf.mxu2  ;;  %v3784_v38 = vpop.f32.mrf.mxu0 }
 0x27c   : > { %v7732_v51 = vadd.f32 %v3537_v14, %v3385_v35  ;;  %v3373_v1 = vpop.f32.mrf.mxu1  ;;  %v3800_v18 = vadd.f32 %v3776_v32, %v3671_v12 }
 0x27d   : > { %v3386_v5 = vadd.f32 %v3373_v1, %v3249_v48 }
 0x281   : > { %v3650_v24 = vpop.f32.mrf.mxu3 }
 0x282   : > { %v3672_v50 = vadd.f32 %v3650_v24, %v7721_v36 }
 0x283   : > { %v3540_v23 = vpop.f32.mrf.mxu2  ;;  %v3786_v16 = vpop.f32.mrf.mxu0 }
 0x284   : > { %v7734_v41 = vadd.f32 %v3540_v23, %v3386_v5  ;;  %v3375_v8 = vpop.f32.mrf.mxu1  ;;  %v3801_v47 = vadd.f32 %v3779_v56, %v3672_v50 }
 0x285   : > { %v3387_v13 = vadd.f32 %v3375_v8, %v3250_v17 }
 0x289   : > { %v3652_v45 = vpop.f32.mrf.mxu3 }
 0x28a   : > { %v3673_v46 = vadd.f32 %v3652_v45, %v7724_v57 }
 0x28b   : > { %v3542_v40 = vpop.f32.mrf.mxu2  ;;  %v3789_v33 = vpop.f32.mrf.mxu0 }
 0x28c   : > { %v7736_v37 = vadd.f32 %v3542_v40, %v3387_v13  ;;  %v3926_v60 = vpop.f32.mrf.mxu1  ;;  %v3802_v26 = vadd.f32 %v3781_v9, %v3673_v46 }
 0x28d   : > { %v3948_v10 = vadd.f32 %v3926_v60, %v3801_v47 }
 0x291   : > { %v3655_v55 = vpop.f32.mrf.mxu3 }
 0x292   : > { %v3674_v58 = vadd.f32 %v3655_v55, %v7726_v62 }
 0x293   : > { %v4046_v29 = vpop.f32.mrf.mxu2  ;;  %v3791_v42 = vpop.f32.mrf.mxu0 }
 0x294   : > { %v3928_v4 = vpop.f32.mrf.mxu1  ;;  %v3803_v57 = vadd.f32 %v3784_v38, %v3674_v58 }
 0x295   : > { %v3949_v20 = vadd.f32 %v3928_v4, %v3802_v26 }
 0x299   : > { %v3657_v3 = vpop.f32.mrf.mxu3 }
 0x29a   : > { %v3675_v43 = vadd.f32 %v3657_v3, %v7728_v27 }
 0x29b   : > { %v4048_v54 = vpop.f32.mrf.mxu2  ;;  %v3794_v31 = vpop.f32.mrf.mxu0 }
 0x29c   : > { %v3931_v36 = vpop.f32.mrf.mxu1  ;;  %v3804_v15 = vadd.f32 %v3786_v16, %v3675_v43 }
 0x29d   : > { %v3950_v2 = vadd.f32 %v3931_v36, %v3803_v57 }
 0x2a1   : > { %v3660_v48 = vpop.f32.mrf.mxu3 }
 0x2a2   : > { %v3676_v0 = vadd.f32 %v3660_v48, %v7730_v30 }
 0x2a3   : > { %v4051_v53 = vpop.f32.mrf.mxu2  ;;  %v3796_v63 = vpop.f32.mrf.mxu0 }
 0x2a4   : > { %v4073_v49 = vadd.f32 %v4051_v53, %v3948_v10  ;;  %v3933_v44 = vpop.f32.mrf.mxu1  ;;  %v3805_v21 = vadd.f32 %v3789_v33, %v3676_v0 }
 0x2a5   : > { %v3951_v7 = vadd.f32 %v3933_v44, %v3804_v15 }
 0x2a6   : > { %4083 = vst [vmem:[%s7745_s26 + $0x10] sm:$0xff] %v4073_v49 }
 0x2a9   : > { %v3662_v9 = vpop.f32.mrf.mxu3 }
 0x2aa   : > { %v3677_v6 = vadd.f32 %v3662_v9, %v7732_v51 }
 0x2ab   : > { %v4053_v19 = vpop.f32.mrf.mxu2  ;;  %v3921_v28 = vpop.f32.mrf.mxu0 }
 0x2ac   : > { %v4074_v11 = vadd.f32 %v4053_v19, %v3949_v20  ;;  %v3946_v59 = vadd.f32 %v3921_v28, %v3799_v52  ;;  %v3936_v17 = vpop.f32.mrf.mxu1  ;;  %v3806_v38 = vadd.f32 %v3791_v42, %v3677_v6 }
 0x2ad   : > { %v3952_v52 = vadd.f32 %v3936_v17, %v3805_v21 }
 0x2ae   : > { %4084 = vst [vmem:[%s7745_s26 + $0x18] sm:$0xff] %v4074_v11  ;;  %v4071_v32 = vadd.f32 %v4046_v29, %v3946_v59 }
 0x2b0   : > { %4081 = vst [vmem:[%s7745_s26] sm:$0xff] %v4071_v32 }
 0x2b1   : > { %v3665_v12 = vpop.f32.mrf.mxu3 }
 0x2b2   : > { %v3678_v5 = vadd.f32 %v3665_v12, %v7734_v41 }
 0x2b3   : > { %v4056_v61 = vpop.f32.mrf.mxu2  ;;  %v3923_v22 = vpop.f32.mrf.mxu0 }
 0x2b4   : > { %v4075_v25 = vadd.f32 %v4056_v61, %v3950_v2  ;;  %v3947_v56 = vadd.f32 %v3923_v22, %v3800_v18  ;;  %v3938_v27 = vpop.f32.mrf.mxu1  ;;  %v3807_v16 = vadd.f32 %v3794_v31, %v3678_v5 }
 0x2b5   : > { %v3953_v1 = vadd.f32 %v3938_v27, %v3806_v38 }
 0x2b6   : > { %4085 = vst [vmem:[%s7745_s26 + $0x20] sm:$0xff] %v4075_v25  ;;  %v4072_v62 = vadd.f32 %v4048_v54, %v3947_v56 }
 0x2b8   : > { %4082 = vst [vmem:[%s7745_s26 + $0x8] sm:$0xff] %v4072_v62 }
 0x2b9   : > { %v3667_v8 = vpop.f32.mrf.mxu3 }
 0x2ba   : > { %v3679_v40 = vadd.f32 %v3667_v8, %v7736_v37 }
 0x2bb   : > { %v4058_v39 = vpop.f32.mrf.mxu2 }
 0x2bc   : > { %v4076_v34 = vadd.f32 %v4058_v39, %v3951_v7  ;;  %v3941_v23 = vpop.f32.mrf.mxu1  ;;  %v3808_v60 = vadd.f32 %v3796_v63, %v3679_v40 }
 0x2bd   : > { %v3954_v13 = vadd.f32 %v3941_v23, %v3807_v16 }
 0x2be   : > { %4086 = vst [vmem:[%s7745_s26 + $0x28] sm:$0xff] %v4076_v34 }
 0x2c3   : > { %v4061_v35 = vpop.f32.mrf.mxu2 }
 0x2c4   : > { %v4077_v14 = vadd.f32 %v4061_v35, %v3952_v52  ;;  %v3943_v33 = vpop.f32.mrf.mxu1 }
 0x2c5   : > { %v3955_v29 = vadd.f32 %v3943_v33, %v3808_v60 }
 0x2c6   : > { %4087 = vst [vmem:[%s7745_s26 + $0x30] sm:$0xff] %v4077_v14 }
 0x2cb   : > { %v4063_v18 = vpop.f32.mrf.mxu2 }
 0x2cc   : > { %v4078_v30 = vadd.f32 %v4063_v18, %v3953_v1 }
 0x2ce   : > { %4088 = vst [vmem:[%s7745_s26 + $0x38] sm:$0xff] %v4078_v30 }
 0x2d3   : > { %v4066_v24 = vpop.f32.mrf.mxu2 }
 0x2d4   : > { %v4079_v51 = vadd.f32 %v4066_v24, %v3954_v13 }
 0x2d6   : > { %4089 = vst [vmem:[%s7745_s26 + $0x40] sm:$0xff] %v4079_v51 }
 0x2db   : > { %v4068_v42 = vpop.f32.mrf.mxu2 }
 0x2dc   : > { %v4080_v45 = vadd.f32 %v4068_v42, %v3955_v29 }
 0x2de   : > { %4090 = vst [vmem:[%s7745_s26 + $0x48] sm:$0xff] %v4080_v45 }
 0x2df PF: > { %s14_s19 = sadd.s32 1, %s6006_s19   ;;  %s7784_s15 = smov %s5998_s17 }
 0x2e0   : > { %p11_p10 = scmp.ge.s32.totalorder %s14_s19, 18   ;;  %s7785_s16 = smov %s6002_s18 }
 0x2e1   : > { %s7786_s17 = smov %s7789_s20  ;;  %s7787_s18 = smov %s7793_s21 }
 0x2e2   :  { %13 = sbr.rel (!%p11_p10) target bundleno = 3 (0x3), region = 98 }

// kernel: dense_block3d_forward.10
= control target key start
LH: loop header
LB: loop body
LE: loop exit
PB: predicated region body
PF: predicated region fallthrough
CT: control target
= control target key end

     0   :  { %s1345_s18 = smov 0   ;;  %s1711_s0 = inlined_call_operand.vmem [shape: f32[1024,12], index: 0, kind: input, shape index: {}]   ;;  %s1712_s1 = inlined_call_operand.vmem [shape: f32[1,12], index: 1, kind: input, shape index: {}]   ;;  %s1713_s2 = inlined_call_operand.vmem [shape: f32[1,12], index: 2, kind: input, shape index: {}]   ;;  %s1714_s3 = inlined_call_operand.vmem [shape: bf16[12,128], index: 3, kind: input, shape index: {}]   ;;  %s1715_s4 = inlined_call_operand.vmem [shape: f32[1,128], index: 4, kind: input, shape index: {}]   ;;  %s1716_s5 = inlined_call_operand.vmem [shape: bf16[1024,128], index: 5, kind: output, shape index: {}]  }
   0x1 LB: > { %s1054_s19 = sadd.s32 4294967295, %s1313_s18   ;;  %p1058_p0 = scmp.ge.s32.totalorder %s1313_s18, 1  ;;  %s1313_s18 = sphi %s1345_s18, %s15_s18  }
   0x2   : > { %p188_p1 = scmp.lt.s32.totalorder %s1313_s18, 3 }
   0x4   : > { %p189_p2 = pnand %p1058_p0, %p188_p1 }
   0x5   : > { %s1059_s24 = sshll.u32 (!%p189_p2), %s1054_s19, 6 }
   0x6   : > { %192 = sbr.rel (%p189_p2) target bundleno = 285 (0x11d), region = 40  ;;  %p217_p3 = scmp.lt.s32.totalorder (!%p189_p2), %s1059_s24, 127 }
   0xb   : > { %v1065_v0 = vld [vmem:[%s1714_s3] sm:$0xf]  ;;  %v1101_v1 = vld [vmem:[%s1714_s3] sm:$0x30]  ;;  %vm633_vm0 = vcmask 1045504   ;;  %s1718_s24 = smov (!%p217_p3, %s1059_s24), 127 }
   0xc   : > { %v1066_v2 = vor.u32 %v1101_v1, %v1065_v0  ;;  %v1364_v4 = vld [vmem:[%s1712_s1] ss:$0 sm:$0xff]  ;;  %s1060_s27 = sshll.u32 %s1718_s24, 3  ;;  %vm536_vm1 = vcmask 97280   ;;  %s1062_s10 = sshll.u32 %s1718_s24, 2 }
   0xd   : > { %s1370_s30 = scalar_lea.vmem %s1711_s0, %s1060_s27  ;;  %v1375_v5 = vld [vmem:[%s1713_s2] ss:$0 sm:$0xff]  ;;  %s1614_s13 = scalar_lea.vmem %s1716_s5, %s1062_s10 }
   0xe   : > { %v635_v3 = vsel %vm633_vm0, %v1066_v2, 0  ;;  %v229_v6 = vld [vmem:[%s1370_s30] sm:$0xff]  ;;  %v230_v7 = vld [vmem:[%s1370_s30 + $0x8] sm:$0xff]  ;;  %v231_v32 = vld [vmem:[%s1370_s30 + $0x10] sm:$0xff] }
   0xf   : > { %644 = vmatpush.bf16.msra.mxu0 %v635_v3  ;;  %1293 = vmatpush.bf16.msra.mxu1 %v635_v3  ;;  %v245_v8 = vld [vmem:[%s1370_s30 + $0x80] sm:$0xff]  ;;  %v297_v9 = vmul.f32 %v1364_v4, %v229_v6  ;;  %v298_v10 = vmul.f32 %v1364_v4, %v230_v7  ;;  %v246_v11 = vld [vmem:[%s1370_s30 + $0x88] sm:$0xff]  ;;  %v232_v37 = vld [vmem:[%s1370_s30 + $0x18] sm:$0xff]  ;;  %v299_v47 = vmul.f32 %v1364_v4, %v231_v32 }
  0x10   : > { %1294 = vmatpush.bf16.msra.mxu2 %v635_v3  ;;  %1295 = vmatpush.bf16.msra.mxu3 %v635_v3  ;;  %v313_v12 = vmul.f32 %v1364_v4, %v245_v8  ;;  %v261_v13 = vld [vmem:[%s1370_s30 + $0x100] sm:$0xff]  ;;  %v262_v14 = vld [vmem:[%s1370_s30 + $0x108] sm:$0xff]  ;;  %v314_v15 = vmul.f32 %v1364_v4, %v246_v11  ;;  %v247_v38 = vld [vmem:[%s1370_s30 + $0x90] sm:$0xff]  ;;  %v300_v48 = vmul.f32 %v1364_v4, %v232_v37 }
  0x11   : > { %v329_v16 = vmul.f32 %v1364_v4, %v261_v13  ;;  %v330_v17 = vmul.f32 %v1364_v4, %v262_v14  ;;  %v277_v18 = vld [vmem:[%s1370_s30 + $0x180] sm:$0xff]  ;;  %v278_v19 = vld [vmem:[%s1370_s30 + $0x188] sm:$0xff]  ;;  %v365_v20 = vadd.f32 %v1375_v5, %v297_v9  ;;  %v366_v21 = vadd.f32 %v1375_v5, %v298_v10  ;;  %v248_v39 = vld [vmem:[%s1370_s30 + $0x98] sm:$0xff] }
  0x12   : > { %v381_v22 = vadd.f32 %v1375_v5, %v313_v12  ;;  %v345_v23 = vmul.f32 %v1364_v4, %v277_v18  ;;  %v382_v24 = vadd.f32 %v1375_v5, %v314_v15  ;;  %v346_v27 = vmul.f32 %v1364_v4, %v278_v19  ;;  %v263_v42 = vld [vmem:[%s1370_s30 + $0x110] sm:$0xff]  ;;  %v264_v43 = vld [vmem:[%s1370_s30 + $0x118] sm:$0xff]  ;;  %v233_v15 = vld [vmem:[%s1370_s30 + $0x20] sm:$0xff] }
  0x13   : > { %v397_v25 = vadd.f32 %v1375_v5, %v329_v16  ;;  %v398_v26 = vadd.f32 %v1375_v5, %v330_v17  ;;  %v429_v28 = vmax.f32 %v365_v20, 0.0  ;;  %v430_v29 = vmax.f32 %v366_v21, 0.0  ;;  %v279_v51 = vld [vmem:[%s1370_s30 + $0x190] sm:$0xff]  ;;  %v280_v52 = vld [vmem:[%s1370_s30 + $0x198] sm:$0xff]  ;;  %v234_v16 = vld [vmem:[%s1370_s30 + $0x28] sm:$0xff] }
  0x14   : > { %v445_v30 = vmax.f32 %v381_v22, 0.0  ;;  %v413_v31 = vadd.f32 %v1375_v5, %v345_v23  ;;  %v446_v33 = vmax.f32 %v382_v24, 0.0  ;;  %v414_v36 = vadd.f32 %v1375_v5, %v346_v27  ;;  %v249_v17 = vld [vmem:[%s1370_s30 + $0xa0] sm:$0xff]  ;;  %v250_v18 = vld [vmem:[%s1370_s30 + $0xa8] sm:$0xff] }
  0x15   : > { %v461_v34 = vmax.f32 %v397_v25, 0.0  ;;  %v462_v35 = vmax.f32 %v398_v26, 0.0  ;;  %v493_v40 = vpack.c.bf16 %v430_v29, %v429_v28  ;;  %v315_v49 = vmul.f32 %v1364_v4, %v247_v38  ;;  %v265_v19 = vld [vmem:[%s1370_s30 + $0x120] sm:$0xff]  ;;  %v266_v20 = vld [vmem:[%s1370_s30 + $0x128] sm:$0xff] }
  0x16   : > { %v477_v41 = vmax.f32 %v413_v31, 0.0  ;;  %v501_v44 = vpack.c.bf16 %v446_v33, %v445_v30  ;;  %v478_v46 = vmax.f32 %v414_v36, 0.0  ;;  %v316_v50 = vmul.f32 %v1364_v4, %v248_v39  ;;  %v281_v25 = vld [vmem:[%s1370_s30 + $0x1a0] sm:$0xff]  ;;  %v282_v26 = vld [vmem:[%s1370_s30 + $0x1a8] sm:$0xff] }
  0x17   : > { %v509_v45 = vpack.c.bf16 %v462_v35, %v461_v34  ;;  %1067 = vmatmul.msk.bf16.vlgmr.msra.gmra.mxu0 %vm536_vm1, %v493_v40  ;;  %v331_v54 = vmul.f32 %v1364_v4, %v263_v42  ;;  %v332_v55 = vmul.f32 %v1364_v4, %v264_v43  ;;  %v347_v56 = vmul.f32 %v1364_v4, %v279_v51  ;;  %v235_v51 = vld [vmem:[%s1370_s30 + $0x30] sm:$0xff] }
  0x18   : > { %1075 = vmatmul.msk.bf16.vlgmr.msra.gmra.mxu1 %vm536_vm1, %v501_v44  ;;  %v517_v53 = vpack.c.bf16 %v478_v46, %v477_v41  ;;  %v348_v57 = vmul.f32 %v1364_v4, %v280_v52  ;;  %v367_v58 = vadd.f32 %v1375_v5, %v299_v47  ;;  %v368_v59 = vadd.f32 %v1375_v5, %v300_v48  ;;  %v236_v52 = vld [vmem:[%s1370_s30 + $0x38] sm:$0xff] }
  0x19   : > { %1083 = vmatmul.msk.bf16.vlgmr.msra.gmra.mxu2 %vm536_vm1, %v509_v45  ;;  %v383_v60 = vadd.f32 %v1375_v5, %v315_v49  ;;  %v384_v61 = vadd.f32 %v1375_v5, %v316_v50  ;;  %v399_v62 = vadd.f32 %v1375_v5, %v331_v54  ;;  %v400_v63 = vadd.f32 %v1375_v5, %v332_v55  ;;  %v252_v54 = vld [vmem:[%s1370_s30 + $0xb8] sm:$0xff]  ;;  %v267_v55 = vld [vmem:[%s1370_s30 + $0x130] sm:$0xff] }
  0x1a   : > { %1091 = vmatmul.msk.bf16.vlgmr.msra.gmra.mxu3 %vm536_vm1, %v517_v53  ;;  %v415_v0 = vadd.f32 %v1375_v5, %v347_v56  ;;  %v416_v1 = vadd.f32 %v1375_v5, %v348_v57  ;;  %v431_v2 = vmax.f32 %v367_v58, 0.0  ;;  %v432_v3 = vmax.f32 %v368_v59, 0.0  ;;  %v251_v53 = vld [vmem:[%s1370_s30 + $0xb0] sm:$0xff]  ;;  %v268_v56 = vld [vmem:[%s1370_s30 + $0x138] sm:$0xff] }
  0x1b   : > { %v447_v6 = vmax.f32 %v383_v60, 0.0  ;;  %v448_v7 = vmax.f32 %v384_v61, 0.0  ;;  %v463_v8 = vmax.f32 %v399_v62, 0.0  ;;  %v464_v9 = vmax.f32 %v400_v63, 0.0  ;;  %v283_v61 = vld [vmem:[%s1370_s30 + $0x1b0] sm:$0xff]  ;;  %v284_v62 = vld [vmem:[%s1370_s30 + $0x1b8] sm:$0xff] }
  0x1c   : > { %v479_v10 = vmax.f32 %v415_v0, 0.0  ;;  %v480_v11 = vmax.f32 %v416_v1, 0.0  ;;  %v494_v12 = vpack.c.bf16 %v432_v3, %v431_v2  ;;  %v301_v22 = vmul.f32 %v1364_v4, %v233_v15 }
  0x1d   : > { %v502_v13 = vpack.c.bf16 %v448_v7, %v447_v6  ;;  %v510_v14 = vpack.c.bf16 %v464_v9, %v463_v8  ;;  %v302_v23 = vmul.f32 %v1364_v4, %v234_v16  ;;  %v317_v24 = vmul.f32 %v1364_v4, %v249_v17 }
  0x1e   : > { %v518_v21 = vpack.c.bf16 %v480_v11, %v479_v10  ;;  %v318_v27 = vmul.f32 %v1364_v4, %v250_v18  ;;  %v333_v28 = vmul.f32 %v1364_v4, %v265_v19  ;;  %v334_v29 = vmul.f32 %v1364_v4, %v266_v20 }
  0x1f   : > { %v349_v30 = vmul.f32 %v1364_v4, %v281_v25  ;;  %v350_v31 = vmul.f32 %v1364_v4, %v282_v26  ;;  %v369_v32 = vadd.f32 %v1375_v5, %v301_v22  ;;  %v370_v33 = vadd.f32 %v1375_v5, %v302_v23  ;;  %v237_v25 = vld [vmem:[%s1370_s30 + $0x40] sm:$0xff]  ;;  %v238_v26 = vld [vmem:[%s1370_s30 + $0x48] sm:$0xff] }
  0x20   : > { %v385_v34 = vadd.f32 %v1375_v5, %v317_v24  ;;  %v386_v35 = vadd.f32 %v1375_v5, %v318_v27  ;;  %v401_v36 = vadd.f32 %v1375_v5, %v333_v28  ;;  %v402_v37 = vadd.f32 %v1375_v5, %v334_v29  ;;  %v253_v27 = vld [vmem:[%s1370_s30 + $0xc0] sm:$0xff]  ;;  %v254_v28 = vld [vmem:[%s1370_s30 + $0xc8] sm:$0xff] }
  0x21   : > { %v417_v38 = vadd.f32 %v1375_v5, %v349_v30  ;;  %v418_v39 = vadd.f32 %v1375_v5, %v350_v31  ;;  %v433_v40 = vmax.f32 %v369_v32, 0.0  ;;  %v434_v41 = vmax.f32 %v370_v33, 0.0  ;;  %v269_v29 = vld [vmem:[%s1370_s30 + $0x140] sm:$0xff]  ;;  %v270_v30 = vld [vmem:[%s1370_s30 + $0x148] sm:$0xff] }
  0x22   : > { %v449_v42 = vmax.f32 %v385_v34, 0.0  ;;  %v450_v43 = vmax.f32 %v386_v35, 0.0  ;;  %v465_v44 = vmax.f32 %v401_v36, 0.0  ;;  %v466_v45 = vmax.f32 %v402_v37, 0.0  ;;  %v285_v35 = vld [vmem:[%s1370_s30 + $0x1c0] sm:$0xff]  ;;  %v286_v36 = vld [vmem:[%s1370_s30 + $0x1c8] sm:$0xff] }
  0x23   : > { %v481_v46 = vmax.f32 %v417_v38, 0.0  ;;  %v482_v47 = vmax.f32 %v418_v39, 0.0  ;;  %v495_v48 = vpack.c.bf16 %v434_v41, %v433_v40  ;;  %v303_v58 = vmul.f32 %v1364_v4, %v235_v51 }
  0x24   : > { %v503_v49 = vpack.c.bf16 %v450_v43, %v449_v42  ;;  %v511_v50 = vpack.c.bf16 %v466_v45, %v465_v44  ;;  %v304_v59 = vmul.f32 %v1364_v4, %v236_v52  ;;  %v319_v60 = vmul.f32 %v1364_v4, %v251_v53 }
  0x25   : > { %v519_v57 = vpack.c.bf16 %v482_v47, %v481_v46  ;;  %v320_v63 = vmul.f32 %v1364_v4, %v252_v54  ;;  %v335_v0 = vmul.f32 %v1364_v4, %v267_v55  ;;  %v336_v1 = vmul.f32 %v1364_v4, %v268_v56 }
  0x26   : > { %v351_v2 = vmul.f32 %v1364_v4, %v283_v61  ;;  %v352_v3 = vmul.f32 %v1364_v4, %v284_v62  ;;  %v371_v6 = vadd.f32 %v1375_v5, %v303_v58  ;;  %v372_v7 = vadd.f32 %v1375_v5, %v304_v59  ;;  %v239_v61 = vld [vmem:[%s1370_s30 + $0x50] sm:$0xff]  ;;  %v240_v62 = vld [vmem:[%s1370_s30 + $0x58] sm:$0xff] }
  0x27   : > { %1068 = vmatmul.msk.bf16.gmra.mxu0 %vm536_vm1, %v494_v12  ;;  %v387_v8 = vadd.f32 %v1375_v5, %v319_v60  ;;  %v388_v9 = vadd.f32 %v1375_v5, %v320_v63  ;;  %v403_v10 = vadd.f32 %v1375_v5, %v335_v0  ;;  %v404_v11 = vadd.f32 %v1375_v5, %v336_v1  ;;  %v255_v63 = vld [vmem:[%s1370_s30 + $0xd0] sm:$0xff]  ;;  %v256_v0 = vld [vmem:[%s1370_s30 + $0xd8] sm:$0xff] }
  0x28   : > { %1076 = vmatmul.msk.bf16.gmra.mxu1 %vm536_vm1, %v502_v13  ;;  %v419_v12 = vadd.f32 %v1375_v5, %v351_v2  ;;  %v420_v13 = vadd.f32 %v1375_v5, %v352_v3  ;;  %v436_v15 = vmax.f32 %v372_v7, 0.0  ;;  %v305_v32 = vmul.f32 %v1364_v4, %v237_v25  ;;  %v271_v1 = vld [vmem:[%s1370_s30 + $0x150] sm:$0xff]  ;;  %v272_v2 = vld [vmem:[%s1370_s30 + $0x158] sm:$0xff] }
  0x29   : > { %1084 = vmatmul.msk.bf16.gmra.mxu2 %vm536_vm1, %v510_v14  ;;  %v435_v14 = vmax.f32 %v371_v6, 0.0  ;;  %v451_v16 = vmax.f32 %v387_v8, 0.0  ;;  %v452_v17 = vmax.f32 %v388_v9, 0.0  ;;  %v467_v18 = vmax.f32 %v403_v10, 0.0  ;;  %v287_v9 = vld [vmem:[%s1370_s30 + $0x1d0] sm:$0xff]  ;;  %v288_v10 = vld [vmem:[%s1370_s30 + $0x1d8] sm:$0xff] }
  0x2a   : > { %1092 = vmatmul.msk.bf16.gmra.mxu3 %vm536_vm1, %v518_v21  ;;  %v468_v19 = vmax.f32 %v404_v11, 0.0  ;;  %v483_v20 = vmax.f32 %v419_v12, 0.0  ;;  %v484_v21 = vmax.f32 %v420_v13, 0.0  ;;  %v306_v33 = vmul.f32 %v1364_v4, %v238_v26 }
  0x2b   : > { %v496_v22 = vpack.c.bf16 %v436_v15, %v435_v14  ;;  %v504_v23 = vpack.c.bf16 %v452_v17, %v451_v16  ;;  %v321_v34 = vmul.f32 %v1364_v4, %v253_v27  ;;  %v322_v37 = vmul.f32 %v1364_v4, %v254_v28 }
  0x2c   : > { %v512_v24 = vpack.c.bf16 %v468_v19, %v467_v18  ;;  %v520_v31 = vpack.c.bf16 %v484_v21, %v483_v20  ;;  %v337_v38 = vmul.f32 %v1364_v4, %v269_v29  ;;  %v338_v39 = vmul.f32 %v1364_v4, %v270_v30 }
  0x2d   : > { %v353_v40 = vmul.f32 %v1364_v4, %v285_v35  ;;  %v354_v41 = vmul.f32 %v1364_v4, %v286_v36  ;;  %v373_v42 = vadd.f32 %v1375_v5, %v305_v32  ;;  %v374_v43 = vadd.f32 %v1375_v5, %v306_v33  ;;  %v241_v35 = vld [vmem:[%s1370_s30 + $0x60] sm:$0xff]  ;;  %v242_v36 = vld [vmem:[%s1370_s30 + $0x68] sm:$0xff] }
  0x2e   : > { %v389_v44 = vadd.f32 %v1375_v5, %v321_v34  ;;  %v390_v45 = vadd.f32 %v1375_v5, %v322_v37  ;;  %v405_v46 = vadd.f32 %v1375_v5, %v337_v38  ;;  %v406_v47 = vadd.f32 %v1375_v5, %v338_v39  ;;  %v257_v37 = vld [vmem:[%s1370_s30 + $0xe0] sm:$0xff]  ;;  %v258_v38 = vld [vmem:[%s1370_s30 + $0xe8] sm:$0xff] }
  0x2f   : > { %v438_v51 = vmax.f32 %v374_v43, 0.0  ;;  %v307_v6 = vmul.f32 %v1364_v4, %v239_v61  ;;  %v308_v7 = vmul.f32 %v1364_v4, %v240_v62  ;;  %v323_v8 = vmul.f32 %v1364_v4, %v255_v63  ;;  %v273_v39 = vld [vmem:[%s1370_s30 + $0x160] sm:$0xff] }
  0x30   : > { %v453_v52 = vmax.f32 %v389_v44, 0.0  ;;  %v454_v53 = vmax.f32 %v390_v45, 0.0  ;;  %v469_v54 = vmax.f32 %v405_v46, 0.0  ;;  %v470_v55 = vmax.f32 %v406_v47, 0.0  ;;  %v289_v45 = vld [vmem:[%s1370_s30 + $0x1e0] sm:$0xff]  ;;  %v290_v46 = vld [vmem:[%s1370_s30 + $0x1e8] sm:$0xff] }
  0x31   : > { %v324_v11 = vmul.f32 %v1364_v4, %v256_v0  ;;  %v339_v12 = vmul.f32 %v1364_v4, %v271_v1  ;;  %v340_v13 = vmul.f32 %v1364_v4, %v272_v2  ;;  %v355_v14 = vmul.f32 %v1364_v4, %v287_v9  ;;  %v243_v9 = vld [vmem:[%s1370_s30 + $0x70] sm:$0xff] }
  0x32   : > { %v505_v59 = vpack.c.bf16 %v454_v53, %v453_v52  ;;  %v513_v60 = vpack.c.bf16 %v470_v55, %v469_v54  ;;  %v356_v15 = vmul.f32 %v1364_v4, %v288_v10  ;;  %v375_v16 = vadd.f32 %v1375_v5, %v307_v6  ;;  %v244_v10 = vld [vmem:[%s1370_s30 + $0x78] sm:$0xff] }
  0x33   : > { %v376_v17 = vadd.f32 %v1375_v5, %v308_v7  ;;  %v391_v18 = vadd.f32 %v1375_v5, %v323_v8  ;;  %v392_v19 = vadd.f32 %v1375_v5, %v324_v11  ;;  %v407_v20 = vadd.f32 %v1375_v5, %v339_v12  ;;  %v259_v11 = vld [vmem:[%s1370_s30 + $0xf0] sm:$0xff]  ;;  %v260_v12 = vld [vmem:[%s1370_s30 + $0xf8] sm:$0xff] }
  0x34   : > { %v408_v21 = vadd.f32 %v1375_v5, %v340_v13  ;;  %v310_v43 = vmul.f32 %v1364_v4, %v242_v36  ;;  %v325_v44 = vmul.f32 %v1364_v4, %v257_v37  ;;  %v326_v47 = vmul.f32 %v1364_v4, %v258_v38  ;;  %v275_v13 = vld [vmem:[%s1370_s30 + $0x170] sm:$0xff] }
  0x35   : > { %v440_v25 = vmax.f32 %v376_v17, 0.0  ;;  %v455_v26 = vmax.f32 %v391_v18, 0.0  ;;  %v456_v27 = vmax.f32 %v392_v19, 0.0  ;;  %v471_v28 = vmax.f32 %v407_v20, 0.0  ;;  %v291_v19 = vld [vmem:[%s1370_s30 + $0x1f0] sm:$0xff]  ;;  %v292_v20 = vld [vmem:[%s1370_s30 + $0x1f8] sm:$0xff] }
  0x36   : > { %v472_v29 = vmax.f32 %v408_v21, 0.0  ;;  %v378_v53 = vadd.f32 %v1375_v5, %v310_v43  ;;  %v393_v54 = vadd.f32 %v1375_v5, %v325_v44  ;;  %v394_v55 = vadd.f32 %v1375_v5, %v326_v47 }
  0x37   : > { %1069 = vmatmul.msk.bf16.gmra.mxu0 %vm536_vm1, %v495_v48  ;;  %v421_v48 = vadd.f32 %v1375_v5, %v353_v40  ;;  %v506_v33 = vpack.c.bf16 %v456_v27, %v455_v26  ;;  %v274_v40 = vld [vmem:[%s1370_s30 + $0x168] sm:$0xff]  ;;  %v312_v17 = vmul.f32 %v1364_v4, %v244_v10  ;;  %v327_v18 = vmul.f32 %v1364_v4, %v259_v11 }
  0x38   : > { %1077 = vmatmul.msk.bf16.gmra.mxu1 %vm536_vm1, %v503_v49  ;;  %v422_v49 = vadd.f32 %v1375_v5, %v354_v41  ;;  %v514_v34 = vpack.c.bf16 %v472_v29, %v471_v28  ;;  %v442_v61 = vmax.f32 %v378_v53, 0.0  ;;  %v457_v62 = vmax.f32 %v393_v54, 0.0 }
  0x39   : > { %1085 = vmatmul.msk.bf16.gmra.mxu2 %vm536_vm1, %v511_v50  ;;  %v437_v50 = vmax.f32 %v373_v42, 0.0  ;;  %v485_v56 = vmax.f32 %v421_v48, 0.0  ;;  %v309_v42 = vmul.f32 %v1364_v4, %v241_v35  ;;  %v341_v48 = vmul.f32 %v1364_v4, %v273_v39 }
  0x3a   : > { %1093 = vmatmul.msk.bf16.gmra.mxu3 %vm536_vm1, %v519_v57  ;;  %v486_v57 = vmax.f32 %v422_v49, 0.0  ;;  %v342_v49 = vmul.f32 %v1364_v4, %v274_v40  ;;  %v458_v63 = vmax.f32 %v394_v55, 0.0  ;;  %v328_v21 = vmul.f32 %v1364_v4, %v260_v12 }
  0x3b   : > { %v497_v58 = vpack.c.bf16 %v438_v51, %v437_v50  ;;  %v357_v50 = vmul.f32 %v1364_v4, %v289_v45  ;;  %v358_v51 = vmul.f32 %v1364_v4, %v290_v46  ;;  %v377_v52 = vadd.f32 %v1375_v5, %v309_v42  ;;  %v1604_v46 = vld [vmem:[%s1715_s4] ss:$0 sm:$0xff] }
  0x3c   : > { %v521_v3 = vpack.c.bf16 %v486_v57, %v485_v56  ;;  %v409_v56 = vadd.f32 %v1375_v5, %v341_v48  ;;  %v410_v57 = vadd.f32 %v1375_v5, %v342_v49  ;;  %v507_v7 = vpack.c.bf16 %v458_v63, %v457_v62 }
  0x3d   : > { %v380_v27 = vadd.f32 %v1375_v5, %v312_v17  ;;  %v395_v28 = vadd.f32 %v1375_v5, %v327_v18  ;;  %v396_v29 = vadd.f32 %v1375_v5, %v328_v21 }
  0x3e   : > { %v473_v0 = vmax.f32 %v409_v56, 0.0  ;;  %v474_v1 = vmax.f32 %v410_v57, 0.0 }
  0x3f   : > { %v444_v35 = vmax.f32 %v380_v27, 0.0  ;;  %v459_v36 = vmax.f32 %v395_v28, 0.0 }
  0x40   : > { %v515_v8 = vpack.c.bf16 %v474_v1, %v473_v0 }
  0x47   : > { %1070 = vmatmul.msk.bf16.gmra.mxu0 %vm536_vm1, %v496_v22  ;;  %v423_v22 = vadd.f32 %v1375_v5, %v355_v14  ;;  %v276_v14 = vld [vmem:[%s1370_s30 + $0x178] sm:$0xff] }
  0x48   : > { %1078 = vmatmul.msk.bf16.gmra.mxu1 %vm536_vm1, %v504_v23  ;;  %v424_v23 = vadd.f32 %v1375_v5, %v356_v15 }
  0x49   : > { %1086 = vmatmul.msk.bf16.gmra.mxu2 %vm536_vm1, %v512_v24  ;;  %v439_v24 = vmax.f32 %v375_v16, 0.0  ;;  %v487_v30 = vmax.f32 %v423_v22, 0.0  ;;  %v311_v16 = vmul.f32 %v1364_v4, %v243_v9  ;;  %v343_v22 = vmul.f32 %v1364_v4, %v275_v13 }
  0x4a   : > { %1094 = vmatmul.msk.bf16.gmra.mxu3 %vm536_vm1, %v520_v31  ;;  %v488_v31 = vmax.f32 %v424_v23, 0.0  ;;  %v344_v23 = vmul.f32 %v1364_v4, %v276_v14 }
  0x4b   : > { %v498_v32 = vpack.c.bf16 %v440_v25, %v439_v24  ;;  %v359_v24 = vmul.f32 %v1364_v4, %v291_v19  ;;  %v360_v25 = vmul.f32 %v1364_v4, %v292_v20  ;;  %v379_v26 = vadd.f32 %v1375_v5, %v311_v16 }
  0x4c   : > { %v522_v41 = vpack.c.bf16 %v488_v31, %v487_v30  ;;  %v411_v30 = vadd.f32 %v1375_v5, %v343_v22  ;;  %v412_v31 = vadd.f32 %v1375_v5, %v344_v23  ;;  %v460_v4 = vmax.f32 %v396_v29, 0.0 }
  0x4e   : > { %v475_v37 = vmax.f32 %v411_v30, 0.0  ;;  %v476_v38 = vmax.f32 %v412_v31, 0.0  ;;  %v508_v42 = vpack.c.bf16 %v460_v4, %v459_v36 }
  0x50   : > { %v516_v43 = vpack.c.bf16 %v476_v38, %v475_v37 }
  0x57   : > { %1071 = vmatmul.msk.bf16.gmra.mxu0 %vm536_vm1, %v497_v58  ;;  %v425_v58 = vadd.f32 %v1375_v5, %v357_v50 }
  0x58   : > { %1079 = vmatmul.msk.bf16.gmra.mxu1 %vm536_vm1, %v505_v59  ;;  %v426_v59 = vadd.f32 %v1375_v5, %v358_v51 }
  0x59   : > { %1087 = vmatmul.msk.bf16.gmra.mxu2 %vm536_vm1, %v513_v60  ;;  %v441_v60 = vmax.f32 %v377_v52, 0.0  ;;  %v489_v2 = vmax.f32 %v425_v58, 0.0 }
  0x5a   : > { %1095 = vmatmul.msk.bf16.gmra.mxu3 %vm536_vm1, %v521_v3  ;;  %v490_v3 = vmax.f32 %v426_v59, 0.0 }
  0x5b   : > { %v499_v6 = vpack.c.bf16 %v442_v61, %v441_v60 }
  0x5c   : > { %v523_v15 = vpack.c.bf16 %v490_v3, %v489_v2 }
  0x67   : > { %1072 = vmatmul.msk.bf16.gmra.mxu0 %vm536_vm1, %v498_v32  ;;  %v427_v32 = vadd.f32 %v1375_v5, %v359_v24 }
  0x68   : > { %1080 = vmatmul.msk.bf16.gmra.mxu1 %vm536_vm1, %v506_v33  ;;  %v428_v33 = vadd.f32 %v1375_v5, %v360_v25 }
  0x69   : > { %1088 = vmatmul.msk.bf16.gmra.mxu2 %vm536_vm1, %v514_v34  ;;  %v443_v34 = vmax.f32 %v379_v26, 0.0  ;;  %v491_v39 = vmax.f32 %v427_v32, 0.0 }
  0x6a   : > { %1096 = vmatmul.msk.bf16.gmra.mxu3 %vm536_vm1, %v522_v41  ;;  %v492_v40 = vmax.f32 %v428_v33, 0.0 }
  0x6b   : > { %v500_v41 = vpack.c.bf16 %v444_v35, %v443_v34 }
  0x6c   : > { %v524_v44 = vpack.c.bf16 %v492_v40, %v491_v39 }
  0x77   : > { %1073 = vmatmul.msk.bf16.gmra.mxu0 %vm536_vm1, %v499_v6 }
  0x78   : > { %1081 = vmatmul.msk.bf16.gmra.mxu1 %vm536_vm1, %v507_v7 }
  0x79   : > { %1089 = vmatmul.msk.bf16.gmra.mxu2 %vm536_vm1, %v515_v8 }
  0x7a   : > { %1097 = vmatmul.msk.bf16.gmra.mxu3 %vm536_vm1, %v523_v15 }
  0x87   : > { %1074 = vmatmul.msk.bf16.gmra.mxu0 %vm536_vm1, %v500_v41 }
  0x88   : > { %1082 = vmatmul.msk.bf16.gmra.mxu1 %vm536_vm1, %v508_v42 }
  0x89   : > { %1090 = vmatmul.msk.bf16.gmra.mxu2 %vm536_vm1, %v516_v43 }
  0x8a   : > { %1098 = vmatmul.msk.bf16.gmra.mxu3 %vm536_vm1, %v524_v44 }
  0x94   : > { %v646_v5 = vpop.f32.mrf.mxu0 }
  0x95   : > { %v686_v45 = vpop.f32.mrf.mxu1  ;;  %v647_v47 = vadd.f32 %v1604_v46, %v646_v5 }
  0x96   : > { %v687_v49 = vadd.f32 %v1604_v46, %v686_v45 }
  0x97   : > { %v806_v55 = vmax.f32 %v647_v47, 0.0 }
  0x98   : > { %v822_v57 = vmax.f32 %v687_v49, 0.0 }
  0x9c   : > { %v726_v48 = vpop.f32.mrf.mxu2  ;;  %v648_v50 = vpop.f32.mrf.mxu0 }
  0x9d   : > { %v766_v51 = vpop.f32.mrf.mxu3  ;;  %v649_v52 = vadd.f32 %v1604_v46, %v648_v50  ;;  %v688_v53 = vpop.f32.mrf.mxu1  ;;  %v727_v60 = vadd.f32 %v1604_v46, %v726_v48 }
  0x9e   : > { %v689_v54 = vadd.f32 %v1604_v46, %v688_v53  ;;  %v767_v63 = vadd.f32 %v1604_v46, %v766_v51 }
  0x9f   : > { %v807_v56 = vmax.f32 %v649_v52, 0.0  ;;  %v838_v6 = vmax.f32 %v727_v60, 0.0 }
  0xa0   : > { %v823_v58 = vmax.f32 %v689_v54, 0.0  ;;  %v854_v9 = vmax.f32 %v767_v63, 0.0 }
  0xa1   : > { %v1105_v59 = vpack.c.bf16 %v807_v56, %v806_v55 }
  0xa2   : > { %v1145_v61 = vpack.c.bf16 %v823_v58, %v822_v57 }
  0xa3   : > { %1106 = vst [vmem:[%s1614_s13] sm:$0xff] %v1105_v59  }
  0xa4   : > { %v728_v62 = vpop.f32.mrf.mxu2  ;;  %1269 = vst [vmem:[%s1614_s13 + $0x40] sm:$0xff] %v1145_v61   ;;  %v651_v1 = vpop.f32.mrf.mxu0 }
  0xa5   : > { %v729_v0 = vadd.f32 %v1604_v46, %v728_v62  ;;  %v768_v2 = vpop.f32.mrf.mxu3  ;;  %v691_v3 = vpop.f32.mrf.mxu1  ;;  %v652_v13 = vadd.f32 %v1604_v46, %v651_v1 }
  0xa6   : > { %v769_v8 = vadd.f32 %v1604_v46, %v768_v2  ;;  %v692_v15 = vadd.f32 %v1604_v46, %v691_v3 }
  0xa7   : > { %v839_v7 = vmax.f32 %v729_v0, 0.0  ;;  %v808_v21 = vmax.f32 %v652_v13, 0.0 }
  0xa8   : > { %v855_v11 = vmax.f32 %v769_v8, 0.0  ;;  %v824_v23 = vmax.f32 %v692_v15, 0.0 }
  0xa9   : > { %v1185_v10 = vpack.c.bf16 %v839_v7, %v838_v6 }
  0xaa   : > { %v1225_v12 = vpack.c.bf16 %v855_v11, %v854_v9 }
  0xab   : > { %1277 = vst [vmem:[%s1614_s13 + $0x80] sm:$0xff] %v1185_v10  }
  0xac   : > { %v731_v14 = vpop.f32.mrf.mxu2  ;;  %1285 = vst [vmem:[%s1614_s13 + $0xc0] sm:$0xff] %v1225_v12   ;;  %v653_v16 = vpop.f32.mrf.mxu0 }
  0xad   : > { %v771_v17 = vpop.f32.mrf.mxu3  ;;  %v654_v18 = vadd.f32 %v1604_v46, %v653_v16  ;;  %v693_v19 = vpop.f32.mrf.mxu1  ;;  %v732_v26 = vadd.f32 %v1604_v46, %v731_v14 }
  0xae   : > { %v694_v20 = vadd.f32 %v1604_v46, %v693_v19  ;;  %v772_v29 = vadd.f32 %v1604_v46, %v771_v17 }
  0xaf   : > { %v809_v22 = vmax.f32 %v654_v18, 0.0  ;;  %v840_v34 = vmax.f32 %v732_v26, 0.0 }
  0xb0   : > { %v825_v24 = vmax.f32 %v694_v20, 0.0  ;;  %v856_v4 = vmax.f32 %v772_v29, 0.0 }
  0xb1   : > { %v1110_v25 = vpack.c.bf16 %v809_v22, %v808_v21 }
  0xb2   : > { %v1150_v27 = vpack.c.bf16 %v825_v24, %v824_v23 }
  0xb3   : > { %1262 = vst [vmem:[%s1614_s13 + $0x8] sm:$0xff] %v1110_v25  }
  0xb4   : > { %v733_v28 = vpop.f32.mrf.mxu2  ;;  %1270 = vst [vmem:[%s1614_s13 + $0x48] sm:$0xff] %v1150_v27   ;;  %v656_v31 = vpop.f32.mrf.mxu0 }
  0xb5   : > { %v734_v30 = vadd.f32 %v1604_v46, %v733_v28  ;;  %v773_v32 = vpop.f32.mrf.mxu3  ;;  %v696_v33 = vpop.f32.mrf.mxu1  ;;  %v657_v40 = vadd.f32 %v1604_v46, %v656_v31 }
  0xb6   : > { %v774_v36 = vadd.f32 %v1604_v46, %v773_v32  ;;  %v697_v42 = vadd.f32 %v1604_v46, %v696_v33 }
  0xb7   : > { %v841_v35 = vmax.f32 %v734_v30, 0.0  ;;  %v810_v48 = vmax.f32 %v657_v40, 0.0 }
  0xb8   : > { %v857_v38 = vmax.f32 %v774_v36, 0.0  ;;  %v826_v50 = vmax.f32 %v697_v42, 0.0 }
  0xb9   : > { %v1190_v37 = vpack.c.bf16 %v841_v35, %v840_v34 }
  0xba   : > { %v1230_v39 = vpack.c.bf16 %v857_v38, %v856_v4 }
  0xbb   : > { %1278 = vst [vmem:[%s1614_s13 + $0x88] sm:$0xff] %v1190_v37  }
  0xbc   : > { %v736_v41 = vpop.f32.mrf.mxu2  ;;  %1286 = vst [vmem:[%s1614_s13 + $0xc8] sm:$0xff] %v1230_v39   ;;  %v658_v43 = vpop.f32.mrf.mxu0 }
  0xbd   : > { %v776_v44 = vpop.f32.mrf.mxu3  ;;  %v659_v5 = vadd.f32 %v1604_v46, %v658_v43  ;;  %v698_v45 = vpop.f32.mrf.mxu1  ;;  %v737_v53 = vadd.f32 %v1604_v46, %v736_v41 }
  0xbe   : > { %v699_v47 = vadd.f32 %v1604_v46, %v698_v45  ;;  %v777_v56 = vadd.f32 %v1604_v46, %v776_v44 }
  0xbf   : > { %v811_v49 = vmax.f32 %v659_v5, 0.0  ;;  %v842_v61 = vmax.f32 %v737_v53, 0.0 }
  0xc0   : > { %v827_v51 = vmax.f32 %v699_v47, 0.0  ;;  %v858_v0 = vmax.f32 %v777_v56, 0.0 }
  0xc1   : > { %v1115_v52 = vpack.c.bf16 %v811_v49, %v810_v48 }
  0xc2   : > { %v1155_v54 = vpack.c.bf16 %v827_v51, %v826_v50 }
  0xc3   : > { %1263 = vst [vmem:[%s1614_s13 + $0x10] sm:$0xff] %v1115_v52  }
  0xc4   : > { %v738_v55 = vpop.f32.mrf.mxu2  ;;  %1271 = vst [vmem:[%s1614_s13 + $0x50] sm:$0xff] %v1155_v54   ;;  %v661_v58 = vpop.f32.mrf.mxu0 }
  0xc5   : > { %v739_v57 = vadd.f32 %v1604_v46, %v738_v55  ;;  %v778_v59 = vpop.f32.mrf.mxu3  ;;  %v701_v60 = vpop.f32.mrf.mxu1  ;;  %v662_v6 = vadd.f32 %v1604_v46, %v661_v58 }
  0xc6   : > { %v779_v63 = vadd.f32 %v1604_v46, %v778_v59  ;;  %v702_v8 = vadd.f32 %v1604_v46, %v701_v60 }
  0xc7   : > { %v843_v62 = vmax.f32 %v739_v57, 0.0  ;;  %v812_v14 = vmax.f32 %v662_v6, 0.0 }
  0xc8   : > { %v859_v2 = vmax.f32 %v779_v63, 0.0  ;;  %v828_v16 = vmax.f32 %v702_v8, 0.0 }
  0xc9   : > { %v1195_v1 = vpack.c.bf16 %v843_v62, %v842_v61 }
  0xca   : > { %v1235_v3 = vpack.c.bf16 %v859_v2, %v858_v0 }
  0xcb   : > { %1279 = vst [vmem:[%s1614_s13 + $0x90] sm:$0xff] %v1195_v1  }
  0xcc   : > { %v741_v7 = vpop.f32.mrf.mxu2  ;;  %1287 = vst [vmem:[%s1614_s13 + $0xd0] sm:$0xff] %v1235_v3   ;;  %v663_v9 = vpop.f32.mrf.mxu0 }
  0xcd   : > { %v781_v10 = vpop.f32.mrf.mxu3  ;;  %v664_v11 = vadd.f32 %v1604_v46, %v663_v9  ;;  %v703_v12 = vpop.f32.mrf.mxu1  ;;  %v742_v19 = vadd.f32 %v1604_v46, %v741_v7 }
  0xce   : > { %v704_v13 = vadd.f32 %v1604_v46, %v703_v12  ;;  %v782_v22 = vadd.f32 %v1604_v46, %v781_v10 }
  0xcf   : > { %v813_v15 = vmax.f32 %v664_v11, 0.0  ;;  %v844_v27 = vmax.f32 %v742_v19, 0.0 }
  0xd0   : > { %v829_v17 = vmax.f32 %v704_v13, 0.0  ;;  %v860_v30 = vmax.f32 %v782_v22, 0.0 }
  0xd1   : > { %v1120_v18 = vpack.c.bf16 %v813_v15, %v812_v14 }
  0xd2   : > { %v1160_v20 = vpack.c.bf16 %v829_v17, %v828_v16 }
  0xd3   : > { %1264 = vst [vmem:[%s1614_s13 + $0x18] sm:$0xff] %v1120_v18  }
  0xd4   : > { %v743_v21 = vpop.f32.mrf.mxu2  ;;  %1272 = vst [vmem:[%s1614_s13 + $0x58] sm:$0xff] %v1160_v20   ;;  %v666_v24 = vpop.f32.mrf.mxu0 }
  0xd5   : > { %v744_v23 = vadd.f32 %v1604_v46, %v743_v21  ;;  %v783_v25 = vpop.f32.mrf.mxu3  ;;  %v706_v26 = vpop.f32.mrf.mxu1  ;;  %v667_v34 = vadd.f32 %v1604_v46, %v666_v24 }
  0xd6   : > { %v784_v29 = vadd.f32 %v1604_v46, %v783_v25  ;;  %v707_v36 = vadd.f32 %v1604_v46, %v706_v26 }
  0xd7   : > { %v845_v28 = vmax.f32 %v744_v23, 0.0  ;;  %v814_v41 = vmax.f32 %v667_v34, 0.0 }
  0xd8   : > { %v861_v32 = vmax.f32 %v784_v29, 0.0  ;;  %v830_v43 = vmax.f32 %v707_v36, 0.0 }
  0xd9   : > { %v1200_v31 = vpack.c.bf16 %v845_v28, %v844_v27 }
  0xda   : > { %v1240_v33 = vpack.c.bf16 %v861_v32, %v860_v30 }
  0xdb   : > { %1280 = vst [vmem:[%s1614_s13 + $0x98] sm:$0xff] %v1200_v31  }
  0xdc   : > { %v746_v35 = vpop.f32.mrf.mxu2  ;;  %1288 = vst [vmem:[%s1614_s13 + $0xd8] sm:$0xff] %v1240_v33   ;;  %v668_v4 = vpop.f32.mrf.mxu0 }
  0xdd   : > { %v786_v37 = vpop.f32.mrf.mxu3  ;;  %v669_v38 = vadd.f32 %v1604_v46, %v668_v4  ;;  %v708_v39 = vpop.f32.mrf.mxu1  ;;  %v747_v45 = vadd.f32 %v1604_v46, %v746_v35 }
  0xde   : > { %v709_v40 = vadd.f32 %v1604_v46, %v708_v39  ;;  %v787_v49 = vadd.f32 %v1604_v46, %v786_v37 }
  0xdf   : > { %v815_v42 = vmax.f32 %v669_v38, 0.0  ;;  %v846_v54 = vmax.f32 %v747_v45, 0.0 }
  0xe0   : > { %v831_v44 = vmax.f32 %v709_v40, 0.0  ;;  %v862_v57 = vmax.f32 %v787_v49, 0.0 }
  0xe1   : > { %v1125_v5 = vpack.c.bf16 %v815_v42, %v814_v41 }
  0xe2   : > { %v1165_v47 = vpack.c.bf16 %v831_v44, %v830_v43 }
  0xe3   : > { %1265 = vst [vmem:[%s1614_s13 + $0x20] sm:$0xff] %v1125_v5  }
  0xe4   : > { %v748_v48 = vpop.f32.mrf.mxu2  ;;  %1273 = vst [vmem:[%s1614_s13 + $0x60] sm:$0xff] %v1165_v47   ;;  %v671_v51 = vpop.f32.mrf.mxu0 }
  0xe5   : > { %v749_v50 = vadd.f32 %v1604_v46, %v748_v48  ;;  %v788_v52 = vpop.f32.mrf.mxu3  ;;  %v711_v53 = vpop.f32.mrf.mxu1  ;;  %v672_v61 = vadd.f32 %v1604_v46, %v671_v51 }
  0xe6   : > { %v789_v56 = vadd.f32 %v1604_v46, %v788_v52  ;;  %v712_v63 = vadd.f32 %v1604_v46, %v711_v53 }
  0xe7   : > { %v847_v55 = vmax.f32 %v749_v50, 0.0  ;;  %v816_v7 = vmax.f32 %v672_v61, 0.0 }
  0xe8   : > { %v863_v59 = vmax.f32 %v789_v56, 0.0  ;;  %v832_v9 = vmax.f32 %v712_v63, 0.0 }
  0xe9   : > { %v1205_v58 = vpack.c.bf16 %v847_v55, %v846_v54 }
  0xea   : > { %v1245_v60 = vpack.c.bf16 %v863_v59, %v862_v57 }
  0xeb   : > { %1281 = vst [vmem:[%s1614_s13 + $0xa0] sm:$0xff] %v1205_v58  }
  0xec   : > { %v751_v62 = vpop.f32.mrf.mxu2  ;;  %1289 = vst [vmem:[%s1614_s13 + $0xe0] sm:$0xff] %v1245_v60   ;;  %v673_v0 = vpop.f32.mrf.mxu0 }
  0xed   : > { %v791_v1 = vpop.f32.mrf.mxu3  ;;  %v674_v2 = vadd.f32 %v1604_v46, %v673_v0  ;;  %v713_v3 = vpop.f32.mrf.mxu1  ;;  %v752_v12 = vadd.f32 %v1604_v46, %v751_v62 }
  0xee   : > { %v714_v6 = vadd.f32 %v1604_v46, %v713_v3  ;;  %v792_v15 = vadd.f32 %v1604_v46, %v791_v1 }
  0xef   : > { %v817_v8 = vmax.f32 %v674_v2, 0.0  ;;  %v848_v20 = vmax.f32 %v752_v12, 0.0 }
  0xf0   : > { %v833_v10 = vmax.f32 %v714_v6, 0.0  ;;  %v864_v23 = vmax.f32 %v792_v15, 0.0 }
  0xf1   : > { %v1130_v11 = vpack.c.bf16 %v817_v8, %v816_v7 }
  0xf2   : > { %v1170_v13 = vpack.c.bf16 %v833_v10, %v832_v9 }
  0xf3   : > { %1266 = vst [vmem:[%s1614_s13 + $0x28] sm:$0xff] %v1130_v11  }
  0xf4   : > { %v753_v14 = vpop.f32.mrf.mxu2  ;;  %1274 = vst [vmem:[%s1614_s13 + $0x68] sm:$0xff] %v1170_v13   ;;  %v676_v17 = vpop.f32.mrf.mxu0 }
  0xf5   : > { %v754_v16 = vadd.f32 %v1604_v46, %v753_v14  ;;  %v793_v18 = vpop.f32.mrf.mxu3  ;;  %v716_v19 = vpop.f32.mrf.mxu1  ;;  %v677_v27 = vadd.f32 %v1604_v46, %v676_v17 }
  0xf6   : > { %v794_v22 = vadd.f32 %v1604_v46, %v793_v18  ;;  %v717_v29 = vadd.f32 %v1604_v46, %v716_v19 }
  0xf7   : > { %v849_v21 = vmax.f32 %v754_v16, 0.0  ;;  %v818_v35 = vmax.f32 %v677_v27, 0.0 }
  0xf8   : > { %v865_v25 = vmax.f32 %v794_v22, 0.0  ;;  %v834_v4 = vmax.f32 %v717_v29, 0.0 }
  0xf9   : > { %v1210_v24 = vpack.c.bf16 %v849_v21, %v848_v20 }
  0xfa   : > { %v1250_v26 = vpack.c.bf16 %v865_v25, %v864_v23 }
  0xfb   : > { %1282 = vst [vmem:[%s1614_s13 + $0xa8] sm:$0xff] %v1210_v24  }
  0xfc   : > { %v756_v28 = vpop.f32.mrf.mxu2  ;;  %1290 = vst [vmem:[%s1614_s13 + $0xe8] sm:$0xff] %v1250_v26   ;;  %v678_v30 = vpop.f32.mrf.mxu0 }
  0xfd   : > { %v796_v31 = vpop.f32.mrf.mxu3  ;;  %v679_v32 = vadd.f32 %v1604_v46, %v678_v30  ;;  %v718_v33 = vpop.f32.mrf.mxu1  ;;  %v757_v39 = vadd.f32 %v1604_v46, %v756_v28 }
  0xfe   : > { %v719_v34 = vadd.f32 %v1604_v46, %v718_v33  ;;  %v797_v42 = vadd.f32 %v1604_v46, %v796_v31 }
  0xff   : > { %v819_v36 = vmax.f32 %v679_v32, 0.0  ;;  %v850_v47 = vmax.f32 %v757_v39, 0.0 }
 0x100   : > { %v835_v37 = vmax.f32 %v719_v34, 0.0  ;;  %v866_v50 = vmax.f32 %v797_v42, 0.0 }
 0x101   : > { %v1135_v38 = vpack.c.bf16 %v819_v36, %v818_v35 }
 0x102   : > { %v1175_v40 = vpack.c.bf16 %v835_v37, %v834_v4 }
 0x103   : > { %1267 = vst [vmem:[%s1614_s13 + $0x30] sm:$0xff] %v1135_v38  }
 0x104   : > { %v758_v41 = vpop.f32.mrf.mxu2  ;;  %1275 = vst [vmem:[%s1614_s13 + $0x70] sm:$0xff] %v1175_v40   ;;  %v681_v44 = vpop.f32.mrf.mxu0 }
 0x105   : > { %v759_v43 = vadd.f32 %v1604_v46, %v758_v41  ;;  %v798_v5 = vpop.f32.mrf.mxu3  ;;  %v721_v45 = vpop.f32.mrf.mxu1  ;;  %v682_v54 = vadd.f32 %v1604_v46, %v681_v44 }
 0x106   : > { %v799_v49 = vadd.f32 %v1604_v46, %v798_v5  ;;  %v722_v56 = vadd.f32 %v1604_v46, %v721_v45 }
 0x107   : > { %v851_v48 = vmax.f32 %v759_v43, 0.0  ;;  %v820_v62 = vmax.f32 %v682_v54, 0.0 }
 0x108   : > { %v867_v52 = vmax.f32 %v799_v49, 0.0  ;;  %v836_v0 = vmax.f32 %v722_v56, 0.0 }
 0x109   : > { %v1215_v51 = vpack.c.bf16 %v851_v48, %v850_v47 }
 0x10a   : > { %v1255_v53 = vpack.c.bf16 %v867_v52, %v866_v50 }
 0x10b   : > { %1283 = vst [vmem:[%s1614_s13 + $0xb0] sm:$0xff] %v1215_v51  }
 0x10c   : > { %v761_v55 = vpop.f32.mrf.mxu2  ;;  %1291 = vst [vmem:[%s1614_s13 + $0xf0] sm:$0xff] %v1255_v53   ;;  %v683_v57 = vpop.f32.mrf.mxu0 }
 0x10d   : > { %v801_v58 = vpop.f32.mrf.mxu3  ;;  %v684_v59 = vadd.f32 %v1604_v46, %v683_v57  ;;  %v723_v60 = vpop.f32.mrf.mxu1  ;;  %v762_v3 = vadd.f32 %v1604_v46, %v761_v55 }
 0x10e   : > { %v724_v61 = vadd.f32 %v1604_v46, %v723_v60  ;;  %v802_v8 = vadd.f32 %v1604_v46, %v801_v58 }
 0x10f   : > { %v821_v63 = vmax.f32 %v684_v59, 0.0  ;;  %v852_v11 = vmax.f32 %v762_v3, 0.0 }
 0x110   : > { %v837_v1 = vmax.f32 %v724_v61, 0.0  ;;  %v868_v14 = vmax.f32 %v802_v8, 0.0 }
 0x111   : > { %v1140_v2 = vpack.c.bf16 %v821_v63, %v820_v62 }
 0x112   : > { %v1180_v6 = vpack.c.bf16 %v837_v1, %v836_v0 }
 0x113   : > { %1268 = vst [vmem:[%s1614_s13 + $0x38] sm:$0xff] %v1140_v2  }
 0x114   : > { %v763_v7 = vpop.f32.mrf.mxu2  ;;  %1276 = vst [vmem:[%s1614_s13 + $0x78] sm:$0xff] %v1180_v6  }
 0x115   : > { %v764_v9 = vadd.f32 %v1604_v46, %v763_v7  ;;  %v803_v10 = vpop.f32.mrf.mxu3 }
 0x116   : > { %v804_v13 = vadd.f32 %v1604_v46, %v803_v10 }
 0x117   : > { %v853_v12 = vmax.f32 %v764_v9, 0.0 }
 0x118   : > { %v869_v16 = vmax.f32 %v804_v13, 0.0 }
 0x119   : > { %v1220_v15 = vpack.c.bf16 %v853_v12, %v852_v11 }
 0x11a   : > { %v1260_v17 = vpack.c.bf16 %v869_v16, %v868_v14 }
 0x11b   : > { %1284 = vst [vmem:[%s1614_s13 + $0xb8] sm:$0xff] %v1220_v15  }
 0x11c   : > { %1292 = vst [vmem:[%s1614_s13 + $0xf8] sm:$0xff] %v1260_v17  }
 0x11d PF: > { %s15_s18 = sadd.s32 1, %s1313_s18  }
 0x11e   : > { %p12_p4 = scmp.ge.s32.totalorder %s15_s18, 4  }
 0x120   :  { %14 = sbr.rel (!%p12_p4) target bundleno = 1 (0x1), region = 70 }

</bundles_post_ra>
